<compile_context>
chip_gen: v5e
topology: v5e:2x2
jax: 0.10.0
libtpu: 0.0.40
codegen_flags: <defaults>
</compile_context>

<pallas_src>
import numpy as np
import jax
import jax.numpy as jnp
from jax.experimental import pallas as pl
from jax.experimental.pallas import tpu as pltpu


_NEG_SLOPE = 0.2
_CIN0_PAD = 8        # pad the single gray input channel to 8 lanes (zeros)

# (cin, cout, ksize, stride, pad) for the 6 spectral-norm convs
_CONV_CFG = [
    (1, 32, 3, 2, 1),
    (32, 32, 3, 1, 1),
    (32, 64, 3, 2, 1),
    (64, 64, 3, 1, 1),
    (64, 128, 3, 2, 1),
    (128, 128, 3, 1, 1),
]


def _round_up(x, m):
    return (x + m - 1) // m * m


# ----------------------------------------------------------------------------
# Gather ("selection") matrices: conv tap extraction as 0/1 matmuls
# ----------------------------------------------------------------------------
def _build_gather_matrix(h_in, w_in, p_in, ksize, stride, pad):
    """0/1 matrix S of shape (K*K*Mp, p_in) such that S[t*Mp:(t+1)*Mp] @ A
    extracts the (zero-padded) conv taps for kernel offset t from the
    row-major activation A of shape (p_in, Cin).  Mp = round_up(Ho*Wo, 8);
    padded rows / columns are all zero, so they contribute nothing."""
    ho = (h_in + 2 * pad - ksize) // stride + 1
    wo = (w_in + 2 * pad - ksize) // stride + 1
    m = ho * wo
    mp = _round_up(m, 8)
    s = np.zeros((ksize * ksize * mp, p_in), np.float32)
    for kh in range(ksize):
        for kw in range(ksize):
            t = kh * ksize + kw
            for oh in range(ho):
                ih = stride * oh + kh - pad
                if ih < 0 or ih >= h_in:
                    continue
                for ow in range(wo):
                    iw = stride * ow + kw - pad
                    if iw < 0 or iw >= w_in:
                        continue
                    s[t * mp + oh * wo + ow, ih * w_in + iw] = 1.0
    return s, ho, wo, m, mp


# ----------------------------------------------------------------------------
# Fused whole-network Pallas kernel (one batch element per grid step)
# ----------------------------------------------------------------------------
def _make_fused_kernel(layer_shapes, m_last, n_layers):
    """layer_shapes: tuple of (mp, cout) per conv layer.
    m_last: real (unpadded) number of spatial positions of the last conv."""

    def kernel(*refs):
        x_ref = refs[0]
        o_ref = refs[-1]
        args = refs[1:-1]
        wp_ref = args[3 * n_layers]
        bp_ref = args[3 * n_layers + 1]

        a = x_ref[0]                                       # (P0, 8) bf16
        feat = None
        for li, (mp, cout) in enumerate(layer_shapes):
            s_ref, w_ref, b_ref = args[3 * li:3 * li + 3]
            # One MXU "gather" matmul builds all 9 zero-padded tap planes.
            taps = jnp.dot(s_ref[...], a,
                           preferred_element_type=jnp.float32)    # (9*mp, cin)
            acc = jnp.zeros((mp, cout), jnp.float32)
            for t in range(9):
                tap_t = taps[t * mp:(t + 1) * mp, :].astype(jnp.bfloat16)
                acc = acc + jnp.dot(tap_t, w_ref[t],
                                    preferred_element_type=jnp.float32)
            acc = acc + b_ref[...]
            acc = jnp.where(acc >= 0.0, acc, _NEG_SLOPE * acc)    # LeakyReLU
            if li + 1 < n_layers:
                a = acc.astype(jnp.bfloat16)
            else:
                feat = acc                                        # (mp, 128) f32
        # Fused 1x1 patch head (128 -> 1, no activation), f32 lane reduce.
        feat = feat[0:m_last, :]
        out = jnp.sum(feat * wp_ref[...], axis=-1, keepdims=True) + bp_ref[...]
        o_ref[0] = out

    return kernel


# ----------------------------------------------------------------------------
# Parameter setup (deterministic, synthetic) + spectral normalization
# ----------------------------------------------------------------------------
def _spectral_normalize(w, n_iter=30):
    """Divide conv weight (Cout, Cin, Kh, Kw) by its largest singular value
    (deterministic power iteration, fixed random u init)."""
    w2 = w.reshape(w.shape[0], -1)
    u = jax.random.normal(jax.random.PRNGKey(42), (w2.shape[0],), w.dtype)
    u = u / (jnp.linalg.norm(u) + 1e-12)
    v = jnp.zeros((w2.shape[1],), w.dtype)
    for _ in range(n_iter):
        v = w2.T @ u
        v = v / (jnp.linalg.norm(v) + 1e-12)
        u = w2 @ v
        u = u / (jnp.linalg.norm(u) + 1e-12)
    sigma = u @ (w2 @ v)
    return w / sigma


def init_params(key):
    params = {"convs": [], "patch": None}
    keys = jax.random.split(key, len(_CONV_CFG) + 1)
    for k, (cin, cout, ks, _, _) in zip(keys[:-1], _CONV_CFG):
        w = 0.02 * jax.random.normal(k, (cout, cin, ks, ks), jnp.float32)
        b = jnp.zeros((cout,), jnp.float32)
        params["convs"].append((w, b))
    # layer_patch: Conv2d(128, 1, 1, 1, 0)  (no spectral norm)
    wp = 0.02 * jax.random.normal(keys[-1], (1, 128, 1, 1), jnp.float32)
    bp = jnp.zeros((1,), jnp.float32)
    params["patch"] = (wp, bp)
    return params


def prepare_params(params):
    """One-time weight prep (hoisted out of the forward): spectral norm,
    tap-major (kh*kw, cin, cout) reshape, bf16 cast, gray-channel padding."""
    prepped = {"convs": [], "patch": None}
    for li, ((w, b), (cin, cout, ks, _, _)) in enumerate(
            zip(params["convs"], _CONV_CFG)):
        w_sn = _spectral_normalize(w)                          # (cout,cin,kh,kw)
        w_t = jnp.transpose(w_sn, (2, 3, 1, 0)).reshape(ks * ks, cin, cout)
        if li == 0:
            w_t = jnp.pad(w_t, ((0, 0), (0, _CIN0_PAD - cin), (0, 0)))
        prepped["convs"].append((w_t.astype(jnp.bfloat16),
                                 b.reshape(1, cout).astype(jnp.float32)))
    wp, bp = params["patch"]
    prepped["patch"] = (wp.reshape(1, wp.shape[1]).astype(jnp.float32),
                        bp.reshape(1, 1).astype(jnp.float32))
    return prepped


def _const_index_map(ndim):
    return lambda i, _nd=ndim: (0,) * _nd


# ----------------------------------------------------------------------------
# Forward pass (patch=True branch) — single fused pallas_call
# ----------------------------------------------------------------------------
def discriminator_forward(x_nchw, prepped):
    n, c0, h, w = x_nchw.shape
    assert c0 == 1 and (h * w) % 8 == 0

    # Gather matrices + per-layer shapes from the (static) spatial dims.
    gather_mats, layer_shapes = [], []
    h_in, w_in, p_in = h, w, h * w
    m_real = None
    for (cin, cout, ks, stride, pad) in _CONV_CFG:
        s_np, h_in, w_in, m_real, mp = _build_gather_matrix(
            h_in, w_in, p_in, ks, stride, pad)
        gather_mats.append(jnp.asarray(s_np, jnp.bfloat16))
        layer_shapes.append((mp, cout))
        p_in = mp
    m_last, ho_last, wo_last = m_real, h_in, w_in

    # NCHW -> (N, H*W, 8) bf16, gray channel zero-padded to 8 lanes.
    x = jnp.transpose(x_nchw, (0, 2, 3, 1)).reshape(n, h * w, c0)
    x = jnp.pad(x, ((0, 0), (0, 0), (0, _CIN0_PAD - c0))).astype(jnp.bfloat16)

    wp, bp = prepped["patch"]
    inputs = [x]
    in_specs = [pl.BlockSpec((1, h * w, _CIN0_PAD), lambda i: (i, 0, 0))]
    for s_mat, (w_t, b_t) in zip(gather_mats, prepped["convs"]):
        for arr in (s_mat, w_t, b_t):                  # all VMEM resident
            inputs.append(arr)
            in_specs.append(pl.BlockSpec(arr.shape, _const_index_map(arr.ndim)))
    for arr in (wp, bp):
        inputs.append(arr)
        in_specs.append(pl.BlockSpec(arr.shape, _const_index_map(arr.ndim)))

    out = pl.pallas_call(
        _make_fused_kernel(tuple(layer_shapes), m_last, len(_CONV_CFG)),
        out_shape=jax.ShapeDtypeStruct((n, m_last, 1), jnp.float32),
        grid_spec=pltpu.PrefetchScalarGridSpec(
            num_scalar_prefetch=0,
            grid=(n,),                                  # >= 2 steps at N=2
            in_specs=in_specs,
            out_specs=pl.BlockSpec((1, m_last, 1), lambda i: (i, 0, 0)),
        ),
        compiler_params=pltpu.CompilerParams(
            dimension_semantics=("parallel",)),
    )(*inputs)

    return out.reshape(n, ho_last, wo_last)[:, None]    # (N, 1, Ho, Wo)


# ----------------------------------------------------------------------------
# Pure-JAX reference (same bf16-input / f32-accumulate numerics)
# ----------------------------------------------------------------------------
def _ref_forward(x_nchw, params):
    x = x_nchw.astype(jnp.float32)
    for (w, b), (_, _, _, stride, pad) in zip(params["convs"], _CONV_CFG):
        w_sn = _spectral_normalize(w)
        y = jax.lax.conv_general_dilated(
            x.astype(jnp.bfloat16), w_sn.astype(jnp.bfloat16),
            (stride, stride), [(pad, pad), (pad, pad)],
            dimension_numbers=("NCHW", "OIHW", "NCHW"),
            preferred_element_type=jnp.float32)
        y = y + b[None, :, None, None]
        x = jnp.where(y >= 0.0, y, _NEG_SLOPE * y)
    wp, bp = params["patch"]
    x = jax.lax.conv_general_dilated(
        x, wp, (1, 1), [(0, 0), (0, 0)],
        dimension_numbers=("NCHW", "OIHW", "NCHW"),
        preferred_element_type=jnp.float32)
    return x + bp[None, :, None, None]


if __name__ == "__main__":
    key = jax.random.PRNGKey(0)
    k_param, k_x = jax.random.split(key)

    params = init_params(k_param)
    prepped = prepare_params(params)        # hoisted: once, not per-forward
    x = jax.random.normal(k_x, (2, 1, 16, 16), jnp.float32)  # N=2, gray, 16x16

    fwd = jax.jit(discriminator_forward)
    out = jax.block_until_ready(fwd(x, prepped))
    ref = jax.block_until_ready(_ref_forward(x, params))

    assert out.shape == (2, 1, 2, 2), out.shape
    assert jnp.allclose(out, ref, atol=1e-2, rtol=1e-2), (
        float(jnp.max(jnp.abs(out - ref))))

    print("KERNEL_OK")
</pallas_src>

<mosaic_0001>
module attributes {stable_mosaic.version = 11 : i64} {
  func.func @kernel(%arg0: i32, %arg1: memref<1x256x8xbf16, #tpu.memory_space<vmem>>, %arg2: memref<576x256xbf16, #tpu.memory_space<vmem>>, %arg3: memref<9x8x32xbf16, #tpu.memory_space<vmem>>, %arg4: memref<1x32xf32, #tpu.memory_space<vmem>>, %arg5: memref<576x64xbf16, #tpu.memory_space<vmem>>, %arg6: memref<9x32x32xbf16, #tpu.memory_space<vmem>>, %arg7: memref<1x32xf32, #tpu.memory_space<vmem>>, %arg8: memref<144x64xbf16, #tpu.memory_space<vmem>>, %arg9: memref<9x32x64xbf16, #tpu.memory_space<vmem>>, %arg10: memref<1x64xf32, #tpu.memory_space<vmem>>, %arg11: memref<144x16xbf16, #tpu.memory_space<vmem>>, %arg12: memref<9x64x64xbf16, #tpu.memory_space<vmem>>, %arg13: memref<1x64xf32, #tpu.memory_space<vmem>>, %arg14: memref<72x16xbf16, #tpu.memory_space<vmem>>, %arg15: memref<9x64x128xbf16, #tpu.memory_space<vmem>>, %arg16: memref<1x128xf32, #tpu.memory_space<vmem>>, %arg17: memref<72x8xbf16, #tpu.memory_space<vmem>>, %arg18: memref<9x128x128xbf16, #tpu.memory_space<vmem>>, %arg19: memref<1x128xf32, #tpu.memory_space<vmem>>, %arg20: memref<1x128xf32, #tpu.memory_space<vmem>>, %arg21: memref<1x1xf32, #tpu.memory_space<vmem>>, %arg22: memref<1x4x1xf32, #tpu.memory_space<vmem>>) attributes {dimension_semantics = [#tpu.dimension_semantics<parallel>], iteration_bounds = array<i64: 2>, scalar_prefetch = 0 : i64, scratch_operands = 0 : i64, tpu.core_type = #tpu.core_type<tc>, window_params = [{transform_indices = @transform_0, window_bounds = array<i64: 1, 256, 8>}, {pipeline_mode = #tpu.pipeline_mode<synchronous>, transform_indices = @transform_1, window_bounds = array<i64: 576, 256>}, {pipeline_mode = #tpu.pipeline_mode<synchronous>, transform_indices = @transform_2, window_bounds = array<i64: 9, 8, 32>}, {pipeline_mode = #tpu.pipeline_mode<synchronous>, transform_indices = @transform_3, window_bounds = array<i64: 1, 32>}, {pipeline_mode = #tpu.pipeline_mode<synchronous>, transform_indices = @transform_4, window_bounds = array<i64: 576, 64>}, {pipeline_mode = #tpu.pipeline_mode<synchronous>, transform_indices = @transform_5, window_bounds = array<i64: 9, 32, 32>}, {pipeline_mode = #tpu.pipeline_mode<synchronous>, transform_indices = @transform_6, window_bounds = array<i64: 1, 32>}, {pipeline_mode = #tpu.pipeline_mode<synchronous>, transform_indices = @transform_7, window_bounds = array<i64: 144, 64>}, {pipeline_mode = #tpu.pipeline_mode<synchronous>, transform_indices = @transform_8, window_bounds = array<i64: 9, 32, 64>}, {pipeline_mode = #tpu.pipeline_mode<synchronous>, transform_indices = @transform_9, window_bounds = array<i64: 1, 64>}, {pipeline_mode = #tpu.pipeline_mode<synchronous>, transform_indices = @transform_10, window_bounds = array<i64: 144, 16>}, {pipeline_mode = #tpu.pipeline_mode<synchronous>, transform_indices = @transform_11, window_bounds = array<i64: 9, 64, 64>}, {pipeline_mode = #tpu.pipeline_mode<synchronous>, transform_indices = @transform_12, window_bounds = array<i64: 1, 64>}, {pipeline_mode = #tpu.pipeline_mode<synchronous>, transform_indices = @transform_13, window_bounds = array<i64: 72, 16>}, {pipeline_mode = #tpu.pipeline_mode<synchronous>, transform_indices = @transform_14, window_bounds = array<i64: 9, 64, 128>}, {pipeline_mode = #tpu.pipeline_mode<synchronous>, transform_indices = @transform_15, window_bounds = array<i64: 1, 128>}, {pipeline_mode = #tpu.pipeline_mode<synchronous>, transform_indices = @transform_16, window_bounds = array<i64: 72, 8>}, {pipeline_mode = #tpu.pipeline_mode<synchronous>, transform_indices = @transform_17, window_bounds = array<i64: 9, 128, 128>}, {pipeline_mode = #tpu.pipeline_mode<synchronous>, transform_indices = @transform_18, window_bounds = array<i64: 1, 128>}, {pipeline_mode = #tpu.pipeline_mode<synchronous>, transform_indices = @transform_19, window_bounds = array<i64: 1, 128>}, {pipeline_mode = #tpu.pipeline_mode<synchronous>, transform_indices = @transform_20, window_bounds = array<i64: 1, 1>}, {transform_indices = @transform_21, window_bounds = array<i64: 1, 4, 1>}]} {
    %c0 = arith.constant 0 : index
    %c0_0 = arith.constant 0 : index
    %c0_1 = arith.constant 0 : index
    %0 = vector.load %arg1[%c0, %c0_0, %c0_1] : memref<1x256x8xbf16, #tpu.memory_space<vmem>>, vector<1x256x8xbf16>
    %1 = vector.shape_cast %0 : vector<1x256x8xbf16> to vector<256x8xbf16>
    %c0_2 = arith.constant 0 : index
    %c0_3 = arith.constant 0 : index
    %2 = vector.load %arg2[%c0_2, %c0_3] : memref<576x256xbf16, #tpu.memory_space<vmem>>, vector<576x256xbf16>
    %cst = arith.constant dense<0.000000e+00> : vector<576x8xf32>
    %3 = tpu.matmul %2, %1, %cst {dimension_numbers = #tpu.dot_dimension_numbers<[1], [0], [0], [1], [0, 0, 1, 1], [], []>} : vector<576x256xbf16>, vector<256x8xbf16>, vector<576x8xf32> -> vector<576x8xf32>
    %cst_4 = arith.constant 0.000000e+00 : f32
    %4 = vector.broadcast %cst_4 : f32 to vector<64x32xf32>
    %5 = vector.extract_strided_slice %3 {offsets = [0, 0], sizes = [64, 8], strides = [1, 1]} : vector<576x8xf32> to vector<64x8xf32>
    %6 = arith.truncf %5 : vector<64x8xf32> to vector<64x8xbf16>
    %c0_5 = arith.constant 0 : index
    %c0_6 = arith.constant 0 : index
    %c0_7 = arith.constant 0 : index
    %7 = vector.load %arg3[%c0_5, %c0_6, %c0_7] : memref<9x8x32xbf16, #tpu.memory_space<vmem>>, vector<1x8x32xbf16>
    %8 = vector.shape_cast %7 : vector<1x8x32xbf16> to vector<8x32xbf16>
    %cst_8 = arith.constant dense<0.000000e+00> : vector<64x32xf32>
    %9 = tpu.matmul %6, %8, %cst_8 {dimension_numbers = #tpu.dot_dimension_numbers<[1], [0], [0], [1], [0, 0, 1, 1], [], []>} : vector<64x8xbf16>, vector<8x32xbf16>, vector<64x32xf32> -> vector<64x32xf32>
    %10 = arith.addf %4, %9 : vector<64x32xf32>
    %11 = vector.extract_strided_slice %3 {offsets = [64, 0], sizes = [64, 8], strides = [1, 1]} : vector<576x8xf32> to vector<64x8xf32>
    %12 = arith.truncf %11 : vector<64x8xf32> to vector<64x8xbf16>
    %c1 = arith.constant 1 : index
    %c0_9 = arith.constant 0 : index
    %c0_10 = arith.constant 0 : index
    %13 = vector.load %arg3[%c1, %c0_9, %c0_10] : memref<9x8x32xbf16, #tpu.memory_space<vmem>>, vector<1x8x32xbf16>
    %14 = vector.shape_cast %13 : vector<1x8x32xbf16> to vector<8x32xbf16>
    %cst_11 = arith.constant dense<0.000000e+00> : vector<64x32xf32>
    %15 = tpu.matmul %12, %14, %cst_11 {dimension_numbers = #tpu.dot_dimension_numbers<[1], [0], [0], [1], [0, 0, 1, 1], [], []>} : vector<64x8xbf16>, vector<8x32xbf16>, vector<64x32xf32> -> vector<64x32xf32>
    %16 = arith.addf %10, %15 : vector<64x32xf32>
    %17 = vector.extract_strided_slice %3 {offsets = [128, 0], sizes = [64, 8], strides = [1, 1]} : vector<576x8xf32> to vector<64x8xf32>
    %18 = arith.truncf %17 : vector<64x8xf32> to vector<64x8xbf16>
    %c2 = arith.constant 2 : index
    %c0_12 = arith.constant 0 : index
    %c0_13 = arith.constant 0 : index
    %19 = vector.load %arg3[%c2, %c0_12, %c0_13] : memref<9x8x32xbf16, #tpu.memory_space<vmem>>, vector<1x8x32xbf16>
    %20 = vector.shape_cast %19 : vector<1x8x32xbf16> to vector<8x32xbf16>
    %cst_14 = arith.constant dense<0.000000e+00> : vector<64x32xf32>
    %21 = tpu.matmul %18, %20, %cst_14 {dimension_numbers = #tpu.dot_dimension_numbers<[1], [0], [0], [1], [0, 0, 1, 1], [], []>} : vector<64x8xbf16>, vector<8x32xbf16>, vector<64x32xf32> -> vector<64x32xf32>
    %22 = arith.addf %16, %21 : vector<64x32xf32>
    %23 = vector.extract_strided_slice %3 {offsets = [192, 0], sizes = [64, 8], strides = [1, 1]} : vector<576x8xf32> to vector<64x8xf32>
    %24 = arith.truncf %23 : vector<64x8xf32> to vector<64x8xbf16>
    %c3 = arith.constant 3 : index
    %c0_15 = arith.constant 0 : index
    %c0_16 = arith.constant 0 : index
    %25 = vector.load %arg3[%c3, %c0_15, %c0_16] : memref<9x8x32xbf16, #tpu.memory_space<vmem>>, vector<1x8x32xbf16>
    %26 = vector.shape_cast %25 : vector<1x8x32xbf16> to vector<8x32xbf16>
    %cst_17 = arith.constant dense<0.000000e+00> : vector<64x32xf32>
    %27 = tpu.matmul %24, %26, %cst_17 {dimension_numbers = #tpu.dot_dimension_numbers<[1], [0], [0], [1], [0, 0, 1, 1], [], []>} : vector<64x8xbf16>, vector<8x32xbf16>, vector<64x32xf32> -> vector<64x32xf32>
    %28 = arith.addf %22, %27 : vector<64x32xf32>
    %29 = vector.extract_strided_slice %3 {offsets = [256, 0], sizes = [64, 8], strides = [1, 1]} : vector<576x8xf32> to vector<64x8xf32>
    %30 = arith.truncf %29 : vector<64x8xf32> to vector<64x8xbf16>
    %c4 = arith.constant 4 : index
    %c0_18 = arith.constant 0 : index
    %c0_19 = arith.constant 0 : index
    %31 = vector.load %arg3[%c4, %c0_18, %c0_19] : memref<9x8x32xbf16, #tpu.memory_space<vmem>>, vector<1x8x32xbf16>
    %32 = vector.shape_cast %31 : vector<1x8x32xbf16> to vector<8x32xbf16>
    %cst_20 = arith.constant dense<0.000000e+00> : vector<64x32xf32>
    %33 = tpu.matmul %30, %32, %cst_20 {dimension_numbers = #tpu.dot_dimension_numbers<[1], [0], [0], [1], [0, 0, 1, 1], [], []>} : vector<64x8xbf16>, vector<8x32xbf16>, vector<64x32xf32> -> vector<64x32xf32>
    %34 = arith.addf %28, %33 : vector<64x32xf32>
    %35 = vector.extract_strided_slice %3 {offsets = [320, 0], sizes = [64, 8], strides = [1, 1]} : vector<576x8xf32> to vector<64x8xf32>
    %36 = arith.truncf %35 : vector<64x8xf32> to vector<64x8xbf16>
    %c5 = arith.constant 5 : index
    %c0_21 = arith.constant 0 : index
    %c0_22 = arith.constant 0 : index
    %37 = vector.load %arg3[%c5, %c0_21, %c0_22] : memref<9x8x32xbf16, #tpu.memory_space<vmem>>, vector<1x8x32xbf16>
    %38 = vector.shape_cast %37 : vector<1x8x32xbf16> to vector<8x32xbf16>
    %cst_23 = arith.constant dense<0.000000e+00> : vector<64x32xf32>
    %39 = tpu.matmul %36, %38, %cst_23 {dimension_numbers = #tpu.dot_dimension_numbers<[1], [0], [0], [1], [0, 0, 1, 1], [], []>} : vector<64x8xbf16>, vector<8x32xbf16>, vector<64x32xf32> -> vector<64x32xf32>
    %40 = arith.addf %34, %39 : vector<64x32xf32>
    %41 = vector.extract_strided_slice %3 {offsets = [384, 0], sizes = [64, 8], strides = [1, 1]} : vector<576x8xf32> to vector<64x8xf32>
    %42 = arith.truncf %41 : vector<64x8xf32> to vector<64x8xbf16>
    %c6 = arith.constant 6 : index
    %c0_24 = arith.constant 0 : index
    %c0_25 = arith.constant 0 : index
    %43 = vector.load %arg3[%c6, %c0_24, %c0_25] : memref<9x8x32xbf16, #tpu.memory_space<vmem>>, vector<1x8x32xbf16>
    %44 = vector.shape_cast %43 : vector<1x8x32xbf16> to vector<8x32xbf16>
    %cst_26 = arith.constant dense<0.000000e+00> : vector<64x32xf32>
    %45 = tpu.matmul %42, %44, %cst_26 {dimension_numbers = #tpu.dot_dimension_numbers<[1], [0], [0], [1], [0, 0, 1, 1], [], []>} : vector<64x8xbf16>, vector<8x32xbf16>, vector<64x32xf32> -> vector<64x32xf32>
    %46 = arith.addf %40, %45 : vector<64x32xf32>
    %47 = vector.extract_strided_slice %3 {offsets = [448, 0], sizes = [64, 8], strides = [1, 1]} : vector<576x8xf32> to vector<64x8xf32>
    %48 = arith.truncf %47 : vector<64x8xf32> to vector<64x8xbf16>
    %c7 = arith.constant 7 : index
    %c0_27 = arith.constant 0 : index
    %c0_28 = arith.constant 0 : index
    %49 = vector.load %arg3[%c7, %c0_27, %c0_28] : memref<9x8x32xbf16, #tpu.memory_space<vmem>>, vector<1x8x32xbf16>
    %50 = vector.shape_cast %49 : vector<1x8x32xbf16> to vector<8x32xbf16>
    %cst_29 = arith.constant dense<0.000000e+00> : vector<64x32xf32>
    %51 = tpu.matmul %48, %50, %cst_29 {dimension_numbers = #tpu.dot_dimension_numbers<[1], [0], [0], [1], [0, 0, 1, 1], [], []>} : vector<64x8xbf16>, vector<8x32xbf16>, vector<64x32xf32> -> vector<64x32xf32>
    %52 = arith.addf %46, %51 : vector<64x32xf32>
    %53 = vector.extract_strided_slice %3 {offsets = [512, 0], sizes = [64, 8], strides = [1, 1]} : vector<576x8xf32> to vector<64x8xf32>
    %54 = arith.truncf %53 : vector<64x8xf32> to vector<64x8xbf16>
    %c8 = arith.constant 8 : index
    %c0_30 = arith.constant 0 : index
    %c0_31 = arith.constant 0 : index
    %55 = vector.load %arg3[%c8, %c0_30, %c0_31] : memref<9x8x32xbf16, #tpu.memory_space<vmem>>, vector<1x8x32xbf16>
    %56 = vector.shape_cast %55 : vector<1x8x32xbf16> to vector<8x32xbf16>
    %cst_32 = arith.constant dense<0.000000e+00> : vector<64x32xf32>
    %57 = tpu.matmul %54, %56, %cst_32 {dimension_numbers = #tpu.dot_dimension_numbers<[1], [0], [0], [1], [0, 0, 1, 1], [], []>} : vector<64x8xbf16>, vector<8x32xbf16>, vector<64x32xf32> -> vector<64x32xf32>
    %58 = arith.addf %52, %57 : vector<64x32xf32>
    %c0_33 = arith.constant 0 : index
    %c0_34 = arith.constant 0 : index
    %59 = vector.load %arg4[%c0_33, %c0_34] : memref<1x32xf32, #tpu.memory_space<vmem>>, vector<1x32xf32>
    %60 = vector.broadcast %59 : vector<1x32xf32> to vector<64x32xf32>
    %61 = arith.addf %58, %60 : vector<64x32xf32>
    %cst_35 = arith.constant 0.000000e+00 : f32
    %62 = vector.broadcast %cst_35 : f32 to vector<64x32xf32>
    %63 = arith.cmpf oge, %61, %62 : vector<64x32xf32>
    %cst_36 = arith.constant 2.000000e-01 : f32
    %64 = vector.broadcast %cst_36 : f32 to vector<64x32xf32>
    %65 = arith.mulf %64, %61 : vector<64x32xf32>
    %66 = arith.select %63, %61, %65 : vector<64x32xi1>, vector<64x32xf32>
    %67 = arith.truncf %66 : vector<64x32xf32> to vector<64x32xbf16>
    %c0_37 = arith.constant 0 : index
    %c0_38 = arith.constant 0 : index
    %68 = vector.load %arg5[%c0_37, %c0_38] : memref<576x64xbf16, #tpu.memory_space<vmem>>, vector<576x64xbf16>
    %cst_39 = arith.constant dense<0.000000e+00> : vector<576x32xf32>
    %69 = tpu.matmul %68, %67, %cst_39 {dimension_numbers = #tpu.dot_dimension_numbers<[1], [0], [0], [1], [0, 0, 1, 1], [], []>} : vector<576x64xbf16>, vector<64x32xbf16>, vector<576x32xf32> -> vector<576x32xf32>
    %cst_40 = arith.constant 0.000000e+00 : f32
    %70 = vector.broadcast %cst_40 : f32 to vector<64x32xf32>
    %71 = vector.extract_strided_slice %69 {offsets = [0, 0], sizes = [64, 32], strides = [1, 1]} : vector<576x32xf32> to vector<64x32xf32>
    %72 = arith.truncf %71 : vector<64x32xf32> to vector<64x32xbf16>
    %c0_41 = arith.constant 0 : index
    %c0_42 = arith.constant 0 : index
    %c0_43 = arith.constant 0 : index
    %73 = vector.load %arg6[%c0_41, %c0_42, %c0_43] : memref<9x32x32xbf16, #tpu.memory_space<vmem>>, vector<1x32x32xbf16>
    %74 = vector.shape_cast %73 : vector<1x32x32xbf16> to vector<32x32xbf16>
    %cst_44 = arith.constant dense<0.000000e+00> : vector<64x32xf32>
    %75 = tpu.matmul %72, %74, %cst_44 {dimension_numbers = #tpu.dot_dimension_numbers<[1], [0], [0], [1], [0, 0, 1, 1], [], []>} : vector<64x32xbf16>, vector<32x32xbf16>, vector<64x32xf32> -> vector<64x32xf32>
    %76 = arith.addf %70, %75 : vector<64x32xf32>
    %77 = vector.extract_strided_slice %69 {offsets = [64, 0], sizes = [64, 32], strides = [1, 1]} : vector<576x32xf32> to vector<64x32xf32>
    %78 = arith.truncf %77 : vector<64x32xf32> to vector<64x32xbf16>
    %c1_45 = arith.constant 1 : index
    %c0_46 = arith.constant 0 : index
    %c0_47 = arith.constant 0 : index
    %79 = vector.load %arg6[%c1_45, %c0_46, %c0_47] : memref<9x32x32xbf16, #tpu.memory_space<vmem>>, vector<1x32x32xbf16>
    %80 = vector.shape_cast %79 : vector<1x32x32xbf16> to vector<32x32xbf16>
    %cst_48 = arith.constant dense<0.000000e+00> : vector<64x32xf32>
    %81 = tpu.matmul %78, %80, %cst_48 {dimension_numbers = #tpu.dot_dimension_numbers<[1], [0], [0], [1], [0, 0, 1, 1], [], []>} : vector<64x32xbf16>, vector<32x32xbf16>, vector<64x32xf32> -> vector<64x32xf32>
    %82 = arith.addf %76, %81 : vector<64x32xf32>
    %83 = vector.extract_strided_slice %69 {offsets = [128, 0], sizes = [64, 32], strides = [1, 1]} : vector<576x32xf32> to vector<64x32xf32>
    %84 = arith.truncf %83 : vector<64x32xf32> to vector<64x32xbf16>
    %c2_49 = arith.constant 2 : index
    %c0_50 = arith.constant 0 : index
    %c0_51 = arith.constant 0 : index
    %85 = vector.load %arg6[%c2_49, %c0_50, %c0_51] : memref<9x32x32xbf16, #tpu.memory_space<vmem>>, vector<1x32x32xbf16>
    %86 = vector.shape_cast %85 : vector<1x32x32xbf16> to vector<32x32xbf16>
    %cst_52 = arith.constant dense<0.000000e+00> : vector<64x32xf32>
    %87 = tpu.matmul %84, %86, %cst_52 {dimension_numbers = #tpu.dot_dimension_numbers<[1], [0], [0], [1], [0, 0, 1, 1], [], []>} : vector<64x32xbf16>, vector<32x32xbf16>, vector<64x32xf32> -> vector<64x32xf32>
    %88 = arith.addf %82, %87 : vector<64x32xf32>
    %89 = vector.extract_strided_slice %69 {offsets = [192, 0], sizes = [64, 32], strides = [1, 1]} : vector<576x32xf32> to vector<64x32xf32>
    %90 = arith.truncf %89 : vector<64x32xf32> to vector<64x32xbf16>
    %c3_53 = arith.constant 3 : index
    %c0_54 = arith.constant 0 : index
    %c0_55 = arith.constant 0 : index
    %91 = vector.load %arg6[%c3_53, %c0_54, %c0_55] : memref<9x32x32xbf16, #tpu.memory_space<vmem>>, vector<1x32x32xbf16>
    %92 = vector.shape_cast %91 : vector<1x32x32xbf16> to vector<32x32xbf16>
    %cst_56 = arith.constant dense<0.000000e+00> : vector<64x32xf32>
    %93 = tpu.matmul %90, %92, %cst_56 {dimension_numbers = #tpu.dot_dimension_numbers<[1], [0], [0], [1], [0, 0, 1, 1], [], []>} : vector<64x32xbf16>, vector<32x32xbf16>, vector<64x32xf32> -> vector<64x32xf32>
    %94 = arith.addf %88, %93 : vector<64x32xf32>
    %95 = vector.extract_strided_slice %69 {offsets = [256, 0], sizes = [64, 32], strides = [1, 1]} : vector<576x32xf32> to vector<64x32xf32>
    %96 = arith.truncf %95 : vector<64x32xf32> to vector<64x32xbf16>
    %c4_57 = arith.constant 4 : index
    %c0_58 = arith.constant 0 : index
    %c0_59 = arith.constant 0 : index
    %97 = vector.load %arg6[%c4_57, %c0_58, %c0_59] : memref<9x32x32xbf16, #tpu.memory_space<vmem>>, vector<1x32x32xbf16>
    %98 = vector.shape_cast %97 : vector<1x32x32xbf16> to vector<32x32xbf16>
    %cst_60 = arith.constant dense<0.000000e+00> : vector<64x32xf32>
    %99 = tpu.matmul %96, %98, %cst_60 {dimension_numbers = #tpu.dot_dimension_numbers<[1], [0], [0], [1], [0, 0, 1, 1], [], []>} : vector<64x32xbf16>, vector<32x32xbf16>, vector<64x32xf32> -> vector<64x32xf32>
    %100 = arith.addf %94, %99 : vector<64x32xf32>
    %101 = vector.extract_strided_slice %69 {offsets = [320, 0], sizes = [64, 32], strides = [1, 1]} : vector<576x32xf32> to vector<64x32xf32>
    %102 = arith.truncf %101 : vector<64x32xf32> to vector<64x32xbf16>
    %c5_61 = arith.constant 5 : index
    %c0_62 = arith.constant 0 : index
    %c0_63 = arith.constant 0 : index
    %103 = vector.load %arg6[%c5_61, %c0_62, %c0_63] : memref<9x32x32xbf16, #tpu.memory_space<vmem>>, vector<1x32x32xbf16>
    %104 = vector.shape_cast %103 : vector<1x32x32xbf16> to vector<32x32xbf16>
    %cst_64 = arith.constant dense<0.000000e+00> : vector<64x32xf32>
    %105 = tpu.matmul %102, %104, %cst_64 {dimension_numbers = #tpu.dot_dimension_numbers<[1], [0], [0], [1], [0, 0, 1, 1], [], []>} : vector<64x32xbf16>, vector<32x32xbf16>, vector<64x32xf32> -> vector<64x32xf32>
    %106 = arith.addf %100, %105 : vector<64x32xf32>
    %107 = vector.extract_strided_slice %69 {offsets = [384, 0], sizes = [64, 32], strides = [1, 1]} : vector<576x32xf32> to vector<64x32xf32>
    %108 = arith.truncf %107 : vector<64x32xf32> to vector<64x32xbf16>
    %c6_65 = arith.constant 6 : index
    %c0_66 = arith.constant 0 : index
    %c0_67 = arith.constant 0 : index
    %109 = vector.load %arg6[%c6_65, %c0_66, %c0_67] : memref<9x32x32xbf16, #tpu.memory_space<vmem>>, vector<1x32x32xbf16>
    %110 = vector.shape_cast %109 : vector<1x32x32xbf16> to vector<32x32xbf16>
    %cst_68 = arith.constant dense<0.000000e+00> : vector<64x32xf32>
    %111 = tpu.matmul %108, %110, %cst_68 {dimension_numbers = #tpu.dot_dimension_numbers<[1], [0], [0], [1], [0, 0, 1, 1], [], []>} : vector<64x32xbf16>, vector<32x32xbf16>, vector<64x32xf32> -> vector<64x32xf32>
    %112 = arith.addf %106, %111 : vector<64x32xf32>
    %113 = vector.extract_strided_slice %69 {offsets = [448, 0], sizes = [64, 32], strides = [1, 1]} : vector<576x32xf32> to vector<64x32xf32>
    %114 = arith.truncf %113 : vector<64x32xf32> to vector<64x32xbf16>
    %c7_69 = arith.constant 7 : index
    %c0_70 = arith.constant 0 : index
    %c0_71 = arith.constant 0 : index
    %115 = vector.load %arg6[%c7_69, %c0_70, %c0_71] : memref<9x32x32xbf16, #tpu.memory_space<vmem>>, vector<1x32x32xbf16>
    %116 = vector.shape_cast %115 : vector<1x32x32xbf16> to vector<32x32xbf16>
    %cst_72 = arith.constant dense<0.000000e+00> : vector<64x32xf32>
    %117 = tpu.matmul %114, %116, %cst_72 {dimension_numbers = #tpu.dot_dimension_numbers<[1], [0], [0], [1], [0, 0, 1, 1], [], []>} : vector<64x32xbf16>, vector<32x32xbf16>, vector<64x32xf32> -> vector<64x32xf32>
    %118 = arith.addf %112, %117 : vector<64x32xf32>
    %119 = vector.extract_strided_slice %69 {offsets = [512, 0], sizes = [64, 32], strides = [1, 1]} : vector<576x32xf32> to vector<64x32xf32>
    %120 = arith.truncf %119 : vector<64x32xf32> to vector<64x32xbf16>
    %c8_73 = arith.constant 8 : index
    %c0_74 = arith.constant 0 : index
    %c0_75 = arith.constant 0 : index
    %121 = vector.load %arg6[%c8_73, %c0_74, %c0_75] : memref<9x32x32xbf16, #tpu.memory_space<vmem>>, vector<1x32x32xbf16>
    %122 = vector.shape_cast %121 : vector<1x32x32xbf16> to vector<32x32xbf16>
    %cst_76 = arith.constant dense<0.000000e+00> : vector<64x32xf32>
    %123 = tpu.matmul %120, %122, %cst_76 {dimension_numbers = #tpu.dot_dimension_numbers<[1], [0], [0], [1], [0, 0, 1, 1], [], []>} : vector<64x32xbf16>, vector<32x32xbf16>, vector<64x32xf32> -> vector<64x32xf32>
    %124 = arith.addf %118, %123 : vector<64x32xf32>
    %c0_77 = arith.constant 0 : index
    %c0_78 = arith.constant 0 : index
    %125 = vector.load %arg7[%c0_77, %c0_78] : memref<1x32xf32, #tpu.memory_space<vmem>>, vector<1x32xf32>
    %126 = vector.broadcast %125 : vector<1x32xf32> to vector<64x32xf32>
    %127 = arith.addf %124, %126 : vector<64x32xf32>
    %cst_79 = arith.constant 0.000000e+00 : f32
    %128 = vector.broadcast %cst_79 : f32 to vector<64x32xf32>
    %129 = arith.cmpf oge, %127, %128 : vector<64x32xf32>
    %cst_80 = arith.constant 2.000000e-01 : f32
    %130 = vector.broadcast %cst_80 : f32 to vector<64x32xf32>
    %131 = arith.mulf %130, %127 : vector<64x32xf32>
    %132 = arith.select %129, %127, %131 : vector<64x32xi1>, vector<64x32xf32>
    %133 = arith.truncf %132 : vector<64x32xf32> to vector<64x32xbf16>
    %c0_81 = arith.constant 0 : index
    %c0_82 = arith.constant 0 : index
    %134 = vector.load %arg8[%c0_81, %c0_82] : memref<144x64xbf16, #tpu.memory_space<vmem>>, vector<144x64xbf16>
    %cst_83 = arith.constant dense<0.000000e+00> : vector<144x32xf32>
    %135 = tpu.matmul %134, %133, %cst_83 {dimension_numbers = #tpu.dot_dimension_numbers<[1], [0], [0], [1], [0, 0, 1, 1], [], []>} : vector<144x64xbf16>, vector<64x32xbf16>, vector<144x32xf32> -> vector<144x32xf32>
    %cst_84 = arith.constant 0.000000e+00 : f32
    %136 = vector.broadcast %cst_84 : f32 to vector<16x64xf32>
    %137 = vector.extract_strided_slice %135 {offsets = [0, 0], sizes = [16, 32], strides = [1, 1]} : vector<144x32xf32> to vector<16x32xf32>
    %138 = arith.truncf %137 : vector<16x32xf32> to vector<16x32xbf16>
    %c0_85 = arith.constant 0 : index
    %c0_86 = arith.constant 0 : index
    %c0_87 = arith.constant 0 : index
    %139 = vector.load %arg9[%c0_85, %c0_86, %c0_87] : memref<9x32x64xbf16, #tpu.memory_space<vmem>>, vector<1x32x64xbf16>
    %140 = vector.shape_cast %139 : vector<1x32x64xbf16> to vector<32x64xbf16>
    %cst_88 = arith.constant dense<0.000000e+00> : vector<16x64xf32>
    %141 = tpu.matmul %138, %140, %cst_88 {dimension_numbers = #tpu.dot_dimension_numbers<[1], [0], [0], [1], [0, 0, 1, 1], [], []>} : vector<16x32xbf16>, vector<32x64xbf16>, vector<16x64xf32> -> vector<16x64xf32>
    %142 = arith.addf %136, %141 : vector<16x64xf32>
    %143 = vector.extract_strided_slice %135 {offsets = [16, 0], sizes = [16, 32], strides = [1, 1]} : vector<144x32xf32> to vector<16x32xf32>
    %144 = arith.truncf %143 : vector<16x32xf32> to vector<16x32xbf16>
    %c1_89 = arith.constant 1 : index
    %c0_90 = arith.constant 0 : index
    %c0_91 = arith.constant 0 : index
    %145 = vector.load %arg9[%c1_89, %c0_90, %c0_91] : memref<9x32x64xbf16, #tpu.memory_space<vmem>>, vector<1x32x64xbf16>
    %146 = vector.shape_cast %145 : vector<1x32x64xbf16> to vector<32x64xbf16>
    %cst_92 = arith.constant dense<0.000000e+00> : vector<16x64xf32>
    %147 = tpu.matmul %144, %146, %cst_92 {dimension_numbers = #tpu.dot_dimension_numbers<[1], [0], [0], [1], [0, 0, 1, 1], [], []>} : vector<16x32xbf16>, vector<32x64xbf16>, vector<16x64xf32> -> vector<16x64xf32>
    %148 = arith.addf %142, %147 : vector<16x64xf32>
    %149 = vector.extract_strided_slice %135 {offsets = [32, 0], sizes = [16, 32], strides = [1, 1]} : vector<144x32xf32> to vector<16x32xf32>
    %150 = arith.truncf %149 : vector<16x32xf32> to vector<16x32xbf16>
    %c2_93 = arith.constant 2 : index
    %c0_94 = arith.constant 0 : index
    %c0_95 = arith.constant 0 : index
    %151 = vector.load %arg9[%c2_93, %c0_94, %c0_95] : memref<9x32x64xbf16, #tpu.memory_space<vmem>>, vector<1x32x64xbf16>
    %152 = vector.shape_cast %151 : vector<1x32x64xbf16> to vector<32x64xbf16>
    %cst_96 = arith.constant dense<0.000000e+00> : vector<16x64xf32>
    %153 = tpu.matmul %150, %152, %cst_96 {dimension_numbers = #tpu.dot_dimension_numbers<[1], [0], [0], [1], [0, 0, 1, 1], [], []>} : vector<16x32xbf16>, vector<32x64xbf16>, vector<16x64xf32> -> vector<16x64xf32>
    %154 = arith.addf %148, %153 : vector<16x64xf32>
    %155 = vector.extract_strided_slice %135 {offsets = [48, 0], sizes = [16, 32], strides = [1, 1]} : vector<144x32xf32> to vector<16x32xf32>
    %156 = arith.truncf %155 : vector<16x32xf32> to vector<16x32xbf16>
    %c3_97 = arith.constant 3 : index
    %c0_98 = arith.constant 0 : index
    %c0_99 = arith.constant 0 : index
    %157 = vector.load %arg9[%c3_97, %c0_98, %c0_99] : memref<9x32x64xbf16, #tpu.memory_space<vmem>>, vector<1x32x64xbf16>
    %158 = vector.shape_cast %157 : vector<1x32x64xbf16> to vector<32x64xbf16>
    %cst_100 = arith.constant dense<0.000000e+00> : vector<16x64xf32>
    %159 = tpu.matmul %156, %158, %cst_100 {dimension_numbers = #tpu.dot_dimension_numbers<[1], [0], [0], [1], [0, 0, 1, 1], [], []>} : vector<16x32xbf16>, vector<32x64xbf16>, vector<16x64xf32> -> vector<16x64xf32>
    %160 = arith.addf %154, %159 : vector<16x64xf32>
    %161 = vector.extract_strided_slice %135 {offsets = [64, 0], sizes = [16, 32], strides = [1, 1]} : vector<144x32xf32> to vector<16x32xf32>
    %162 = arith.truncf %161 : vector<16x32xf32> to vector<16x32xbf16>
    %c4_101 = arith.constant 4 : index
    %c0_102 = arith.constant 0 : index
    %c0_103 = arith.constant 0 : index
    %163 = vector.load %arg9[%c4_101, %c0_102, %c0_103] : memref<9x32x64xbf16, #tpu.memory_space<vmem>>, vector<1x32x64xbf16>
    %164 = vector.shape_cast %163 : vector<1x32x64xbf16> to vector<32x64xbf16>
    %cst_104 = arith.constant dense<0.000000e+00> : vector<16x64xf32>
    %165 = tpu.matmul %162, %164, %cst_104 {dimension_numbers = #tpu.dot_dimension_numbers<[1], [0], [0], [1], [0, 0, 1, 1], [], []>} : vector<16x32xbf16>, vector<32x64xbf16>, vector<16x64xf32> -> vector<16x64xf32>
    %166 = arith.addf %160, %165 : vector<16x64xf32>
    %167 = vector.extract_strided_slice %135 {offsets = [80, 0], sizes = [16, 32], strides = [1, 1]} : vector<144x32xf32> to vector<16x32xf32>
    %168 = arith.truncf %167 : vector<16x32xf32> to vector<16x32xbf16>
    %c5_105 = arith.constant 5 : index
    %c0_106 = arith.constant 0 : index
    %c0_107 = arith.constant 0 : index
    %169 = vector.load %arg9[%c5_105, %c0_106, %c0_107] : memref<9x32x64xbf16, #tpu.memory_space<vmem>>, vector<1x32x64xbf16>
    %170 = vector.shape_cast %169 : vector<1x32x64xbf16> to vector<32x64xbf16>
    %cst_108 = arith.constant dense<0.000000e+00> : vector<16x64xf32>
    %171 = tpu.matmul %168, %170, %cst_108 {dimension_numbers = #tpu.dot_dimension_numbers<[1], [0], [0], [1], [0, 0, 1, 1], [], []>} : vector<16x32xbf16>, vector<32x64xbf16>, vector<16x64xf32> -> vector<16x64xf32>
    %172 = arith.addf %166, %171 : vector<16x64xf32>
    %173 = vector.extract_strided_slice %135 {offsets = [96, 0], sizes = [16, 32], strides = [1, 1]} : vector<144x32xf32> to vector<16x32xf32>
    %174 = arith.truncf %173 : vector<16x32xf32> to vector<16x32xbf16>
    %c6_109 = arith.constant 6 : index
    %c0_110 = arith.constant 0 : index
    %c0_111 = arith.constant 0 : index
    %175 = vector.load %arg9[%c6_109, %c0_110, %c0_111] : memref<9x32x64xbf16, #tpu.memory_space<vmem>>, vector<1x32x64xbf16>
    %176 = vector.shape_cast %175 : vector<1x32x64xbf16> to vector<32x64xbf16>
    %cst_112 = arith.constant dense<0.000000e+00> : vector<16x64xf32>
    %177 = tpu.matmul %174, %176, %cst_112 {dimension_numbers = #tpu.dot_dimension_numbers<[1], [0], [0], [1], [0, 0, 1, 1], [], []>} : vector<16x32xbf16>, vector<32x64xbf16>, vector<16x64xf32> -> vector<16x64xf32>
    %178 = arith.addf %172, %177 : vector<16x64xf32>
    %179 = vector.extract_strided_slice %135 {offsets = [112, 0], sizes = [16, 32], strides = [1, 1]} : vector<144x32xf32> to vector<16x32xf32>
    %180 = arith.truncf %179 : vector<16x32xf32> to vector<16x32xbf16>
    %c7_113 = arith.constant 7 : index
    %c0_114 = arith.constant 0 : index
    %c0_115 = arith.constant 0 : index
    %181 = vector.load %arg9[%c7_113, %c0_114, %c0_115] : memref<9x32x64xbf16, #tpu.memory_space<vmem>>, vector<1x32x64xbf16>
    %182 = vector.shape_cast %181 : vector<1x32x64xbf16> to vector<32x64xbf16>
    %cst_116 = arith.constant dense<0.000000e+00> : vector<16x64xf32>
    %183 = tpu.matmul %180, %182, %cst_116 {dimension_numbers = #tpu.dot_dimension_numbers<[1], [0], [0], [1], [0, 0, 1, 1], [], []>} : vector<16x32xbf16>, vector<32x64xbf16>, vector<16x64xf32> -> vector<16x64xf32>
    %184 = arith.addf %178, %183 : vector<16x64xf32>
    %185 = vector.extract_strided_slice %135 {offsets = [128, 0], sizes = [16, 32], strides = [1, 1]} : vector<144x32xf32> to vector<16x32xf32>
    %186 = arith.truncf %185 : vector<16x32xf32> to vector<16x32xbf16>
    %c8_117 = arith.constant 8 : index
    %c0_118 = arith.constant 0 : index
    %c0_119 = arith.constant 0 : index
    %187 = vector.load %arg9[%c8_117, %c0_118, %c0_119] : memref<9x32x64xbf16, #tpu.memory_space<vmem>>, vector<1x32x64xbf16>
    %188 = vector.shape_cast %187 : vector<1x32x64xbf16> to vector<32x64xbf16>
    %cst_120 = arith.constant dense<0.000000e+00> : vector<16x64xf32>
    %189 = tpu.matmul %186, %188, %cst_120 {dimension_numbers = #tpu.dot_dimension_numbers<[1], [0], [0], [1], [0, 0, 1, 1], [], []>} : vector<16x32xbf16>, vector<32x64xbf16>, vector<16x64xf32> -> vector<16x64xf32>
    %190 = arith.addf %184, %189 : vector<16x64xf32>
    %c0_121 = arith.constant 0 : index
    %c0_122 = arith.constant 0 : index
    %191 = vector.load %arg10[%c0_121, %c0_122] : memref<1x64xf32, #tpu.memory_space<vmem>>, vector<1x64xf32>
    %192 = vector.broadcast %191 : vector<1x64xf32> to vector<16x64xf32>
    %193 = arith.addf %190, %192 : vector<16x64xf32>
    %cst_123 = arith.constant 0.000000e+00 : f32
    %194 = vector.broadcast %cst_123 : f32 to vector<16x64xf32>
    %195 = arith.cmpf oge, %193, %194 : vector<16x64xf32>
    %cst_124 = arith.constant 2.000000e-01 : f32
    %196 = vector.broadcast %cst_124 : f32 to vector<16x64xf32>
    %197 = arith.mulf %196, %193 : vector<16x64xf32>
    %198 = arith.select %195, %193, %197 : vector<16x64xi1>, vector<16x64xf32>
    %199 = arith.truncf %198 : vector<16x64xf32> to vector<16x64xbf16>
    %c0_125 = arith.constant 0 : index
    %c0_126 = arith.constant 0 : index
    %200 = vector.load %arg11[%c0_125, %c0_126] : memref<144x16xbf16, #tpu.memory_space<vmem>>, vector<144x16xbf16>
    %cst_127 = arith.constant dense<0.000000e+00> : vector<144x64xf32>
    %201 = tpu.matmul %200, %199, %cst_127 {dimension_numbers = #tpu.dot_dimension_numbers<[1], [0], [0], [1], [0, 0, 1, 1], [], []>} : vector<144x16xbf16>, vector<16x64xbf16>, vector<144x64xf32> -> vector<144x64xf32>
    %cst_128 = arith.constant 0.000000e+00 : f32
    %202 = vector.broadcast %cst_128 : f32 to vector<16x64xf32>
    %203 = vector.extract_strided_slice %201 {offsets = [0, 0], sizes = [16, 64], strides = [1, 1]} : vector<144x64xf32> to vector<16x64xf32>
    %204 = arith.truncf %203 : vector<16x64xf32> to vector<16x64xbf16>
    %c0_129 = arith.constant 0 : index
    %c0_130 = arith.constant 0 : index
    %c0_131 = arith.constant 0 : index
    %205 = vector.load %arg12[%c0_129, %c0_130, %c0_131] : memref<9x64x64xbf16, #tpu.memory_space<vmem>>, vector<1x64x64xbf16>
    %206 = vector.shape_cast %205 : vector<1x64x64xbf16> to vector<64x64xbf16>
    %cst_132 = arith.constant dense<0.000000e+00> : vector<16x64xf32>
    %207 = tpu.matmul %204, %206, %cst_132 {dimension_numbers = #tpu.dot_dimension_numbers<[1], [0], [0], [1], [0, 0, 1, 1], [], []>} : vector<16x64xbf16>, vector<64x64xbf16>, vector<16x64xf32> -> vector<16x64xf32>
    %208 = arith.addf %202, %207 : vector<16x64xf32>
    %209 = vector.extract_strided_slice %201 {offsets = [16, 0], sizes = [16, 64], strides = [1, 1]} : vector<144x64xf32> to vector<16x64xf32>
    %210 = arith.truncf %209 : vector<16x64xf32> to vector<16x64xbf16>
    %c1_133 = arith.constant 1 : index
    %c0_134 = arith.constant 0 : index
    %c0_135 = arith.constant 0 : index
    %211 = vector.load %arg12[%c1_133, %c0_134, %c0_135] : memref<9x64x64xbf16, #tpu.memory_space<vmem>>, vector<1x64x64xbf16>
    %212 = vector.shape_cast %211 : vector<1x64x64xbf16> to vector<64x64xbf16>
    %cst_136 = arith.constant dense<0.000000e+00> : vector<16x64xf32>
    %213 = tpu.matmul %210, %212, %cst_136 {dimension_numbers = #tpu.dot_dimension_numbers<[1], [0], [0], [1], [0, 0, 1, 1], [], []>} : vector<16x64xbf16>, vector<64x64xbf16>, vector<16x64xf32> -> vector<16x64xf32>
    %214 = arith.addf %208, %213 : vector<16x64xf32>
    %215 = vector.extract_strided_slice %201 {offsets = [32, 0], sizes = [16, 64], strides = [1, 1]} : vector<144x64xf32> to vector<16x64xf32>
    %216 = arith.truncf %215 : vector<16x64xf32> to vector<16x64xbf16>
    %c2_137 = arith.constant 2 : index
    %c0_138 = arith.constant 0 : index
    %c0_139 = arith.constant 0 : index
    %217 = vector.load %arg12[%c2_137, %c0_138, %c0_139] : memref<9x64x64xbf16, #tpu.memory_space<vmem>>, vector<1x64x64xbf16>
    %218 = vector.shape_cast %217 : vector<1x64x64xbf16> to vector<64x64xbf16>
    %cst_140 = arith.constant dense<0.000000e+00> : vector<16x64xf32>
    %219 = tpu.matmul %216, %218, %cst_140 {dimension_numbers = #tpu.dot_dimension_numbers<[1], [0], [0], [1], [0, 0, 1, 1], [], []>} : vector<16x64xbf16>, vector<64x64xbf16>, vector<16x64xf32> -> vector<16x64xf32>
    %220 = arith.addf %214, %219 : vector<16x64xf32>
    %221 = vector.extract_strided_slice %201 {offsets = [48, 0], sizes = [16, 64], strides = [1, 1]} : vector<144x64xf32> to vector<16x64xf32>
    %222 = arith.truncf %221 : vector<16x64xf32> to vector<16x64xbf16>
    %c3_141 = arith.constant 3 : index
    %c0_142 = arith.constant 0 : index
    %c0_143 = arith.constant 0 : index
    %223 = vector.load %arg12[%c3_141, %c0_142, %c0_143] : memref<9x64x64xbf16, #tpu.memory_space<vmem>>, vector<1x64x64xbf16>
    %224 = vector.shape_cast %223 : vector<1x64x64xbf16> to vector<64x64xbf16>
    %cst_144 = arith.constant dense<0.000000e+00> : vector<16x64xf32>
    %225 = tpu.matmul %222, %224, %cst_144 {dimension_numbers = #tpu.dot_dimension_numbers<[1], [0], [0], [1], [0, 0, 1, 1], [], []>} : vector<16x64xbf16>, vector<64x64xbf16>, vector<16x64xf32> -> vector<16x64xf32>
    %226 = arith.addf %220, %225 : vector<16x64xf32>
    %227 = vector.extract_strided_slice %201 {offsets = [64, 0], sizes = [16, 64], strides = [1, 1]} : vector<144x64xf32> to vector<16x64xf32>
    %228 = arith.truncf %227 : vector<16x64xf32> to vector<16x64xbf16>
    %c4_145 = arith.constant 4 : index
    %c0_146 = arith.constant 0 : index
    %c0_147 = arith.constant 0 : index
    %229 = vector.load %arg12[%c4_145, %c0_146, %c0_147] : memref<9x64x64xbf16, #tpu.memory_space<vmem>>, vector<1x64x64xbf16>
    %230 = vector.shape_cast %229 : vector<1x64x64xbf16> to vector<64x64xbf16>
    %cst_148 = arith.constant dense<0.000000e+00> : vector<16x64xf32>
    %231 = tpu.matmul %228, %230, %cst_148 {dimension_numbers = #tpu.dot_dimension_numbers<[1], [0], [0], [1], [0, 0, 1, 1], [], []>} : vector<16x64xbf16>, vector<64x64xbf16>, vector<16x64xf32> -> vector<16x64xf32>
    %232 = arith.addf %226, %231 : vector<16x64xf32>
    %233 = vector.extract_strided_slice %201 {offsets = [80, 0], sizes = [16, 64], strides = [1, 1]} : vector<144x64xf32> to vector<16x64xf32>
    %234 = arith.truncf %233 : vector<16x64xf32> to vector<16x64xbf16>
    %c5_149 = arith.constant 5 : index
    %c0_150 = arith.constant 0 : index
    %c0_151 = arith.constant 0 : index
    %235 = vector.load %arg12[%c5_149, %c0_150, %c0_151] : memref<9x64x64xbf16, #tpu.memory_space<vmem>>, vector<1x64x64xbf16>
    %236 = vector.shape_cast %235 : vector<1x64x64xbf16> to vector<64x64xbf16>
    %cst_152 = arith.constant dense<0.000000e+00> : vector<16x64xf32>
    %237 = tpu.matmul %234, %236, %cst_152 {dimension_numbers = #tpu.dot_dimension_numbers<[1], [0], [0], [1], [0, 0, 1, 1], [], []>} : vector<16x64xbf16>, vector<64x64xbf16>, vector<16x64xf32> -> vector<16x64xf32>
    %238 = arith.addf %232, %237 : vector<16x64xf32>
    %239 = vector.extract_strided_slice %201 {offsets = [96, 0], sizes = [16, 64], strides = [1, 1]} : vector<144x64xf32> to vector<16x64xf32>
    %240 = arith.truncf %239 : vector<16x64xf32> to vector<16x64xbf16>
    %c6_153 = arith.constant 6 : index
    %c0_154 = arith.constant 0 : index
    %c0_155 = arith.constant 0 : index
    %241 = vector.load %arg12[%c6_153, %c0_154, %c0_155] : memref<9x64x64xbf16, #tpu.memory_space<vmem>>, vector<1x64x64xbf16>
    %242 = vector.shape_cast %241 : vector<1x64x64xbf16> to vector<64x64xbf16>
    %cst_156 = arith.constant dense<0.000000e+00> : vector<16x64xf32>
    %243 = tpu.matmul %240, %242, %cst_156 {dimension_numbers = #tpu.dot_dimension_numbers<[1], [0], [0], [1], [0, 0, 1, 1], [], []>} : vector<16x64xbf16>, vector<64x64xbf16>, vector<16x64xf32> -> vector<16x64xf32>
    %244 = arith.addf %238, %243 : vector<16x64xf32>
    %245 = vector.extract_strided_slice %201 {offsets = [112, 0], sizes = [16, 64], strides = [1, 1]} : vector<144x64xf32> to vector<16x64xf32>
    %246 = arith.truncf %245 : vector<16x64xf32> to vector<16x64xbf16>
    %c7_157 = arith.constant 7 : index
    %c0_158 = arith.constant 0 : index
    %c0_159 = arith.constant 0 : index
    %247 = vector.load %arg12[%c7_157, %c0_158, %c0_159] : memref<9x64x64xbf16, #tpu.memory_space<vmem>>, vector<1x64x64xbf16>
    %248 = vector.shape_cast %247 : vector<1x64x64xbf16> to vector<64x64xbf16>
    %cst_160 = arith.constant dense<0.000000e+00> : vector<16x64xf32>
    %249 = tpu.matmul %246, %248, %cst_160 {dimension_numbers = #tpu.dot_dimension_numbers<[1], [0], [0], [1], [0, 0, 1, 1], [], []>} : vector<16x64xbf16>, vector<64x64xbf16>, vector<16x64xf32> -> vector<16x64xf32>
    %250 = arith.addf %244, %249 : vector<16x64xf32>
    %251 = vector.extract_strided_slice %201 {offsets = [128, 0], sizes = [16, 64], strides = [1, 1]} : vector<144x64xf32> to vector<16x64xf32>
    %252 = arith.truncf %251 : vector<16x64xf32> to vector<16x64xbf16>
    %c8_161 = arith.constant 8 : index
    %c0_162 = arith.constant 0 : index
    %c0_163 = arith.constant 0 : index
    %253 = vector.load %arg12[%c8_161, %c0_162, %c0_163] : memref<9x64x64xbf16, #tpu.memory_space<vmem>>, vector<1x64x64xbf16>
    %254 = vector.shape_cast %253 : vector<1x64x64xbf16> to vector<64x64xbf16>
    %cst_164 = arith.constant dense<0.000000e+00> : vector<16x64xf32>
    %255 = tpu.matmul %252, %254, %cst_164 {dimension_numbers = #tpu.dot_dimension_numbers<[1], [0], [0], [1], [0, 0, 1, 1], [], []>} : vector<16x64xbf16>, vector<64x64xbf16>, vector<16x64xf32> -> vector<16x64xf32>
    %256 = arith.addf %250, %255 : vector<16x64xf32>
    %c0_165 = arith.constant 0 : index
    %c0_166 = arith.constant 0 : index
    %257 = vector.load %arg13[%c0_165, %c0_166] : memref<1x64xf32, #tpu.memory_space<vmem>>, vector<1x64xf32>
    %258 = vector.broadcast %257 : vector<1x64xf32> to vector<16x64xf32>
    %259 = arith.addf %256, %258 : vector<16x64xf32>
    %cst_167 = arith.constant 0.000000e+00 : f32
    %260 = vector.broadcast %cst_167 : f32 to vector<16x64xf32>
    %261 = arith.cmpf oge, %259, %260 : vector<16x64xf32>
    %cst_168 = arith.constant 2.000000e-01 : f32
    %262 = vector.broadcast %cst_168 : f32 to vector<16x64xf32>
    %263 = arith.mulf %262, %259 : vector<16x64xf32>
    %264 = arith.select %261, %259, %263 : vector<16x64xi1>, vector<16x64xf32>
    %265 = arith.truncf %264 : vector<16x64xf32> to vector<16x64xbf16>
    %c0_169 = arith.constant 0 : index
    %c0_170 = arith.constant 0 : index
    %266 = vector.load %arg14[%c0_169, %c0_170] : memref<72x16xbf16, #tpu.memory_space<vmem>>, vector<72x16xbf16>
    %cst_171 = arith.constant dense<0.000000e+00> : vector<72x64xf32>
    %267 = tpu.matmul %266, %265, %cst_171 {dimension_numbers = #tpu.dot_dimension_numbers<[1], [0], [0], [1], [0, 0, 1, 1], [], []>} : vector<72x16xbf16>, vector<16x64xbf16>, vector<72x64xf32> -> vector<72x64xf32>
    %cst_172 = arith.constant 0.000000e+00 : f32
    %268 = vector.broadcast %cst_172 : f32 to vector<8x128xf32>
    %269 = vector.extract_strided_slice %267 {offsets = [0, 0], sizes = [8, 64], strides = [1, 1]} : vector<72x64xf32> to vector<8x64xf32>
    %270 = arith.truncf %269 : vector<8x64xf32> to vector<8x64xbf16>
    %c0_173 = arith.constant 0 : index
    %c0_174 = arith.constant 0 : index
    %c0_175 = arith.constant 0 : index
    %271 = vector.load %arg15[%c0_173, %c0_174, %c0_175] : memref<9x64x128xbf16, #tpu.memory_space<vmem>>, vector<1x64x128xbf16>
    %272 = vector.shape_cast %271 : vector<1x64x128xbf16> to vector<64x128xbf16>
    %cst_176 = arith.constant dense<0.000000e+00> : vector<8x128xf32>
    %273 = tpu.matmul %270, %272, %cst_176 {dimension_numbers = #tpu.dot_dimension_numbers<[1], [0], [0], [1], [0, 0, 1, 1], [], []>} : vector<8x64xbf16>, vector<64x128xbf16>, vector<8x128xf32> -> vector<8x128xf32>
    %274 = arith.addf %268, %273 : vector<8x128xf32>
    %275 = vector.extract_strided_slice %267 {offsets = [8, 0], sizes = [8, 64], strides = [1, 1]} : vector<72x64xf32> to vector<8x64xf32>
    %276 = arith.truncf %275 : vector<8x64xf32> to vector<8x64xbf16>
    %c1_177 = arith.constant 1 : index
    %c0_178 = arith.constant 0 : index
    %c0_179 = arith.constant 0 : index
    %277 = vector.load %arg15[%c1_177, %c0_178, %c0_179] : memref<9x64x128xbf16, #tpu.memory_space<vmem>>, vector<1x64x128xbf16>
    %278 = vector.shape_cast %277 : vector<1x64x128xbf16> to vector<64x128xbf16>
    %cst_180 = arith.constant dense<0.000000e+00> : vector<8x128xf32>
    %279 = tpu.matmul %276, %278, %cst_180 {dimension_numbers = #tpu.dot_dimension_numbers<[1], [0], [0], [1], [0, 0, 1, 1], [], []>} : vector<8x64xbf16>, vector<64x128xbf16>, vector<8x128xf32> -> vector<8x128xf32>
    %280 = arith.addf %274, %279 : vector<8x128xf32>
    %281 = vector.extract_strided_slice %267 {offsets = [16, 0], sizes = [8, 64], strides = [1, 1]} : vector<72x64xf32> to vector<8x64xf32>
    %282 = arith.truncf %281 : vector<8x64xf32> to vector<8x64xbf16>
    %c2_181 = arith.constant 2 : index
    %c0_182 = arith.constant 0 : index
    %c0_183 = arith.constant 0 : index
    %283 = vector.load %arg15[%c2_181, %c0_182, %c0_183] : memref<9x64x128xbf16, #tpu.memory_space<vmem>>, vector<1x64x128xbf16>
    %284 = vector.shape_cast %283 : vector<1x64x128xbf16> to vector<64x128xbf16>
    %cst_184 = arith.constant dense<0.000000e+00> : vector<8x128xf32>
    %285 = tpu.matmul %282, %284, %cst_184 {dimension_numbers = #tpu.dot_dimension_numbers<[1], [0], [0], [1], [0, 0, 1, 1], [], []>} : vector<8x64xbf16>, vector<64x128xbf16>, vector<8x128xf32> -> vector<8x128xf32>
    %286 = arith.addf %280, %285 : vector<8x128xf32>
    %287 = vector.extract_strided_slice %267 {offsets = [24, 0], sizes = [8, 64], strides = [1, 1]} : vector<72x64xf32> to vector<8x64xf32>
    %288 = arith.truncf %287 : vector<8x64xf32> to vector<8x64xbf16>
    %c3_185 = arith.constant 3 : index
    %c0_186 = arith.constant 0 : index
    %c0_187 = arith.constant 0 : index
    %289 = vector.load %arg15[%c3_185, %c0_186, %c0_187] : memref<9x64x128xbf16, #tpu.memory_space<vmem>>, vector<1x64x128xbf16>
    %290 = vector.shape_cast %289 : vector<1x64x128xbf16> to vector<64x128xbf16>
    %cst_188 = arith.constant dense<0.000000e+00> : vector<8x128xf32>
    %291 = tpu.matmul %288, %290, %cst_188 {dimension_numbers = #tpu.dot_dimension_numbers<[1], [0], [0], [1], [0, 0, 1, 1], [], []>} : vector<8x64xbf16>, vector<64x128xbf16>, vector<8x128xf32> -> vector<8x128xf32>
    %292 = arith.addf %286, %291 : vector<8x128xf32>
    %293 = vector.extract_strided_slice %267 {offsets = [32, 0], sizes = [8, 64], strides = [1, 1]} : vector<72x64xf32> to vector<8x64xf32>
    %294 = arith.truncf %293 : vector<8x64xf32> to vector<8x64xbf16>
    %c4_189 = arith.constant 4 : index
    %c0_190 = arith.constant 0 : index
    %c0_191 = arith.constant 0 : index
    %295 = vector.load %arg15[%c4_189, %c0_190, %c0_191] : memref<9x64x128xbf16, #tpu.memory_space<vmem>>, vector<1x64x128xbf16>
    %296 = vector.shape_cast %295 : vector<1x64x128xbf16> to vector<64x128xbf16>
    %cst_192 = arith.constant dense<0.000000e+00> : vector<8x128xf32>
    %297 = tpu.matmul %294, %296, %cst_192 {dimension_numbers = #tpu.dot_dimension_numbers<[1], [0], [0], [1], [0, 0, 1, 1], [], []>} : vector<8x64xbf16>, vector<64x128xbf16>, vector<8x128xf32> -> vector<8x128xf32>
    %298 = arith.addf %292, %297 : vector<8x128xf32>
    %299 = vector.extract_strided_slice %267 {offsets = [40, 0], sizes = [8, 64], strides = [1, 1]} : vector<72x64xf32> to vector<8x64xf32>
    %300 = arith.truncf %299 : vector<8x64xf32> to vector<8x64xbf16>
    %c5_193 = arith.constant 5 : index
    %c0_194 = arith.constant 0 : index
    %c0_195 = arith.constant 0 : index
    %301 = vector.load %arg15[%c5_193, %c0_194, %c0_195] : memref<9x64x128xbf16, #tpu.memory_space<vmem>>, vector<1x64x128xbf16>
    %302 = vector.shape_cast %301 : vector<1x64x128xbf16> to vector<64x128xbf16>
    %cst_196 = arith.constant dense<0.000000e+00> : vector<8x128xf32>
    %303 = tpu.matmul %300, %302, %cst_196 {dimension_numbers = #tpu.dot_dimension_numbers<[1], [0], [0], [1], [0, 0, 1, 1], [], []>} : vector<8x64xbf16>, vector<64x128xbf16>, vector<8x128xf32> -> vector<8x128xf32>
    %304 = arith.addf %298, %303 : vector<8x128xf32>
    %305 = vector.extract_strided_slice %267 {offsets = [48, 0], sizes = [8, 64], strides = [1, 1]} : vector<72x64xf32> to vector<8x64xf32>
    %306 = arith.truncf %305 : vector<8x64xf32> to vector<8x64xbf16>
    %c6_197 = arith.constant 6 : index
    %c0_198 = arith.constant 0 : index
    %c0_199 = arith.constant 0 : index
    %307 = vector.load %arg15[%c6_197, %c0_198, %c0_199] : memref<9x64x128xbf16, #tpu.memory_space<vmem>>, vector<1x64x128xbf16>
    %308 = vector.shape_cast %307 : vector<1x64x128xbf16> to vector<64x128xbf16>
    %cst_200 = arith.constant dense<0.000000e+00> : vector<8x128xf32>
    %309 = tpu.matmul %306, %308, %cst_200 {dimension_numbers = #tpu.dot_dimension_numbers<[1], [0], [0], [1], [0, 0, 1, 1], [], []>} : vector<8x64xbf16>, vector<64x128xbf16>, vector<8x128xf32> -> vector<8x128xf32>
    %310 = arith.addf %304, %309 : vector<8x128xf32>
    %311 = vector.extract_strided_slice %267 {offsets = [56, 0], sizes = [8, 64], strides = [1, 1]} : vector<72x64xf32> to vector<8x64xf32>
    %312 = arith.truncf %311 : vector<8x64xf32> to vector<8x64xbf16>
    %c7_201 = arith.constant 7 : index
    %c0_202 = arith.constant 0 : index
    %c0_203 = arith.constant 0 : index
    %313 = vector.load %arg15[%c7_201, %c0_202, %c0_203] : memref<9x64x128xbf16, #tpu.memory_space<vmem>>, vector<1x64x128xbf16>
    %314 = vector.shape_cast %313 : vector<1x64x128xbf16> to vector<64x128xbf16>
    %cst_204 = arith.constant dense<0.000000e+00> : vector<8x128xf32>
    %315 = tpu.matmul %312, %314, %cst_204 {dimension_numbers = #tpu.dot_dimension_numbers<[1], [0], [0], [1], [0, 0, 1, 1], [], []>} : vector<8x64xbf16>, vector<64x128xbf16>, vector<8x128xf32> -> vector<8x128xf32>
    %316 = arith.addf %310, %315 : vector<8x128xf32>
    %317 = vector.extract_strided_slice %267 {offsets = [64, 0], sizes = [8, 64], strides = [1, 1]} : vector<72x64xf32> to vector<8x64xf32>
    %318 = arith.truncf %317 : vector<8x64xf32> to vector<8x64xbf16>
    %c8_205 = arith.constant 8 : index
    %c0_206 = arith.constant 0 : index
    %c0_207 = arith.constant 0 : index
    %319 = vector.load %arg15[%c8_205, %c0_206, %c0_207] : memref<9x64x128xbf16, #tpu.memory_space<vmem>>, vector<1x64x128xbf16>
    %320 = vector.shape_cast %319 : vector<1x64x128xbf16> to vector<64x128xbf16>
    %cst_208 = arith.constant dense<0.000000e+00> : vector<8x128xf32>
    %321 = tpu.matmul %318, %320, %cst_208 {dimension_numbers = #tpu.dot_dimension_numbers<[1], [0], [0], [1], [0, 0, 1, 1], [], []>} : vector<8x64xbf16>, vector<64x128xbf16>, vector<8x128xf32> -> vector<8x128xf32>
    %322 = arith.addf %316, %321 : vector<8x128xf32>
    %c0_209 = arith.constant 0 : index
    %c0_210 = arith.constant 0 : index
    %323 = vector.load %arg16[%c0_209, %c0_210] : memref<1x128xf32, #tpu.memory_space<vmem>>, vector<1x128xf32>
    %324 = vector.broadcast %323 : vector<1x128xf32> to vector<8x128xf32>
    %325 = arith.addf %322, %324 : vector<8x128xf32>
    %cst_211 = arith.constant 0.000000e+00 : f32
    %326 = vector.broadcast %cst_211 : f32 to vector<8x128xf32>
    %327 = arith.cmpf oge, %325, %326 : vector<8x128xf32>
    %cst_212 = arith.constant 2.000000e-01 : f32
    %328 = vector.broadcast %cst_212 : f32 to vector<8x128xf32>
    %329 = arith.mulf %328, %325 : vector<8x128xf32>
    %330 = arith.select %327, %325, %329 : vector<8x128xi1>, vector<8x128xf32>
    %331 = arith.truncf %330 : vector<8x128xf32> to vector<8x128xbf16>
    %c0_213 = arith.constant 0 : index
    %c0_214 = arith.constant 0 : index
    %332 = vector.load %arg17[%c0_213, %c0_214] : memref<72x8xbf16, #tpu.memory_space<vmem>>, vector<72x8xbf16>
    %cst_215 = arith.constant dense<0.000000e+00> : vector<72x128xf32>
    %333 = tpu.matmul %332, %331, %cst_215 {dimension_numbers = #tpu.dot_dimension_numbers<[1], [0], [0], [1], [0, 0, 1, 1], [], []>} : vector<72x8xbf16>, vector<8x128xbf16>, vector<72x128xf32> -> vector<72x128xf32>
    %cst_216 = arith.constant 0.000000e+00 : f32
    %334 = vector.broadcast %cst_216 : f32 to vector<8x128xf32>
    %335 = vector.extract_strided_slice %333 {offsets = [0, 0], sizes = [8, 128], strides = [1, 1]} : vector<72x128xf32> to vector<8x128xf32>
    %336 = arith.truncf %335 : vector<8x128xf32> to vector<8x128xbf16>
    %c0_217 = arith.constant 0 : index
    %c0_218 = arith.constant 0 : index
    %c0_219 = arith.constant 0 : index
    %337 = vector.load %arg18[%c0_217, %c0_218, %c0_219] : memref<9x128x128xbf16, #tpu.memory_space<vmem>>, vector<1x128x128xbf16>
    %338 = vector.shape_cast %337 : vector<1x128x128xbf16> to vector<128x128xbf16>
    %cst_220 = arith.constant dense<0.000000e+00> : vector<8x128xf32>
    %339 = tpu.matmul %336, %338, %cst_220 {dimension_numbers = #tpu.dot_dimension_numbers<[1], [0], [0], [1], [0, 0, 1, 1], [], []>} : vector<8x128xbf16>, vector<128x128xbf16>, vector<8x128xf32> -> vector<8x128xf32>
    %340 = arith.addf %334, %339 : vector<8x128xf32>
    %341 = vector.extract_strided_slice %333 {offsets = [8, 0], sizes = [8, 128], strides = [1, 1]} : vector<72x128xf32> to vector<8x128xf32>
    %342 = arith.truncf %341 : vector<8x128xf32> to vector<8x128xbf16>
    %c1_221 = arith.constant 1 : index
    %c0_222 = arith.constant 0 : index
    %c0_223 = arith.constant 0 : index
    %343 = vector.load %arg18[%c1_221, %c0_222, %c0_223] : memref<9x128x128xbf16, #tpu.memory_space<vmem>>, vector<1x128x128xbf16>
    %344 = vector.shape_cast %343 : vector<1x128x128xbf16> to vector<128x128xbf16>
    %cst_224 = arith.constant dense<0.000000e+00> : vector<8x128xf32>
    %345 = tpu.matmul %342, %344, %cst_224 {dimension_numbers = #tpu.dot_dimension_numbers<[1], [0], [0], [1], [0, 0, 1, 1], [], []>} : vector<8x128xbf16>, vector<128x128xbf16>, vector<8x128xf32> -> vector<8x128xf32>
    %346 = arith.addf %340, %345 : vector<8x128xf32>
    %347 = vector.extract_strided_slice %333 {offsets = [16, 0], sizes = [8, 128], strides = [1, 1]} : vector<72x128xf32> to vector<8x128xf32>
    %348 = arith.truncf %347 : vector<8x128xf32> to vector<8x128xbf16>
    %c2_225 = arith.constant 2 : index
    %c0_226 = arith.constant 0 : index
    %c0_227 = arith.constant 0 : index
    %349 = vector.load %arg18[%c2_225, %c0_226, %c0_227] : memref<9x128x128xbf16, #tpu.memory_space<vmem>>, vector<1x128x128xbf16>
    %350 = vector.shape_cast %349 : vector<1x128x128xbf16> to vector<128x128xbf16>
    %cst_228 = arith.constant dense<0.000000e+00> : vector<8x128xf32>
    %351 = tpu.matmul %348, %350, %cst_228 {dimension_numbers = #tpu.dot_dimension_numbers<[1], [0], [0], [1], [0, 0, 1, 1], [], []>} : vector<8x128xbf16>, vector<128x128xbf16>, vector<8x128xf32> -> vector<8x128xf32>
    %352 = arith.addf %346, %351 : vector<8x128xf32>
    %353 = vector.extract_strided_slice %333 {offsets = [24, 0], sizes = [8, 128], strides = [1, 1]} : vector<72x128xf32> to vector<8x128xf32>
    %354 = arith.truncf %353 : vector<8x128xf32> to vector<8x128xbf16>
    %c3_229 = arith.constant 3 : index
    %c0_230 = arith.constant 0 : index
    %c0_231 = arith.constant 0 : index
    %355 = vector.load %arg18[%c3_229, %c0_230, %c0_231] : memref<9x128x128xbf16, #tpu.memory_space<vmem>>, vector<1x128x128xbf16>
    %356 = vector.shape_cast %355 : vector<1x128x128xbf16> to vector<128x128xbf16>
    %cst_232 = arith.constant dense<0.000000e+00> : vector<8x128xf32>
    %357 = tpu.matmul %354, %356, %cst_232 {dimension_numbers = #tpu.dot_dimension_numbers<[1], [0], [0], [1], [0, 0, 1, 1], [], []>} : vector<8x128xbf16>, vector<128x128xbf16>, vector<8x128xf32> -> vector<8x128xf32>
    %358 = arith.addf %352, %357 : vector<8x128xf32>
    %359 = vector.extract_strided_slice %333 {offsets = [32, 0], sizes = [8, 128], strides = [1, 1]} : vector<72x128xf32> to vector<8x128xf32>
    %360 = arith.truncf %359 : vector<8x128xf32> to vector<8x128xbf16>
    %c4_233 = arith.constant 4 : index
    %c0_234 = arith.constant 0 : index
    %c0_235 = arith.constant 0 : index
    %361 = vector.load %arg18[%c4_233, %c0_234, %c0_235] : memref<9x128x128xbf16, #tpu.memory_space<vmem>>, vector<1x128x128xbf16>
    %362 = vector.shape_cast %361 : vector<1x128x128xbf16> to vector<128x128xbf16>
    %cst_236 = arith.constant dense<0.000000e+00> : vector<8x128xf32>
    %363 = tpu.matmul %360, %362, %cst_236 {dimension_numbers = #tpu.dot_dimension_numbers<[1], [0], [0], [1], [0, 0, 1, 1], [], []>} : vector<8x128xbf16>, vector<128x128xbf16>, vector<8x128xf32> -> vector<8x128xf32>
    %364 = arith.addf %358, %363 : vector<8x128xf32>
    %365 = vector.extract_strided_slice %333 {offsets = [40, 0], sizes = [8, 128], strides = [1, 1]} : vector<72x128xf32> to vector<8x128xf32>
    %366 = arith.truncf %365 : vector<8x128xf32> to vector<8x128xbf16>
    %c5_237 = arith.constant 5 : index
    %c0_238 = arith.constant 0 : index
    %c0_239 = arith.constant 0 : index
    %367 = vector.load %arg18[%c5_237, %c0_238, %c0_239] : memref<9x128x128xbf16, #tpu.memory_space<vmem>>, vector<1x128x128xbf16>
    %368 = vector.shape_cast %367 : vector<1x128x128xbf16> to vector<128x128xbf16>
    %cst_240 = arith.constant dense<0.000000e+00> : vector<8x128xf32>
    %369 = tpu.matmul %366, %368, %cst_240 {dimension_numbers = #tpu.dot_dimension_numbers<[1], [0], [0], [1], [0, 0, 1, 1], [], []>} : vector<8x128xbf16>, vector<128x128xbf16>, vector<8x128xf32> -> vector<8x128xf32>
    %370 = arith.addf %364, %369 : vector<8x128xf32>
    %371 = vector.extract_strided_slice %333 {offsets = [48, 0], sizes = [8, 128], strides = [1, 1]} : vector<72x128xf32> to vector<8x128xf32>
    %372 = arith.truncf %371 : vector<8x128xf32> to vector<8x128xbf16>
    %c6_241 = arith.constant 6 : index
    %c0_242 = arith.constant 0 : index
    %c0_243 = arith.constant 0 : index
    %373 = vector.load %arg18[%c6_241, %c0_242, %c0_243] : memref<9x128x128xbf16, #tpu.memory_space<vmem>>, vector<1x128x128xbf16>
    %374 = vector.shape_cast %373 : vector<1x128x128xbf16> to vector<128x128xbf16>
    %cst_244 = arith.constant dense<0.000000e+00> : vector<8x128xf32>
    %375 = tpu.matmul %372, %374, %cst_244 {dimension_numbers = #tpu.dot_dimension_numbers<[1], [0], [0], [1], [0, 0, 1, 1], [], []>} : vector<8x128xbf16>, vector<128x128xbf16>, vector<8x128xf32> -> vector<8x128xf32>
    %376 = arith.addf %370, %375 : vector<8x128xf32>
    %377 = vector.extract_strided_slice %333 {offsets = [56, 0], sizes = [8, 128], strides = [1, 1]} : vector<72x128xf32> to vector<8x128xf32>
    %378 = arith.truncf %377 : vector<8x128xf32> to vector<8x128xbf16>
    %c7_245 = arith.constant 7 : index
    %c0_246 = arith.constant 0 : index
    %c0_247 = arith.constant 0 : index
    %379 = vector.load %arg18[%c7_245, %c0_246, %c0_247] : memref<9x128x128xbf16, #tpu.memory_space<vmem>>, vector<1x128x128xbf16>
    %380 = vector.shape_cast %379 : vector<1x128x128xbf16> to vector<128x128xbf16>
    %cst_248 = arith.constant dense<0.000000e+00> : vector<8x128xf32>
    %381 = tpu.matmul %378, %380, %cst_248 {dimension_numbers = #tpu.dot_dimension_numbers<[1], [0], [0], [1], [0, 0, 1, 1], [], []>} : vector<8x128xbf16>, vector<128x128xbf16>, vector<8x128xf32> -> vector<8x128xf32>
    %382 = arith.addf %376, %381 : vector<8x128xf32>
    %383 = vector.extract_strided_slice %333 {offsets = [64, 0], sizes = [8, 128], strides = [1, 1]} : vector<72x128xf32> to vector<8x128xf32>
    %384 = arith.truncf %383 : vector<8x128xf32> to vector<8x128xbf16>
    %c8_249 = arith.constant 8 : index
    %c0_250 = arith.constant 0 : index
    %c0_251 = arith.constant 0 : index
    %385 = vector.load %arg18[%c8_249, %c0_250, %c0_251] : memref<9x128x128xbf16, #tpu.memory_space<vmem>>, vector<1x128x128xbf16>
    %386 = vector.shape_cast %385 : vector<1x128x128xbf16> to vector<128x128xbf16>
    %cst_252 = arith.constant dense<0.000000e+00> : vector<8x128xf32>
    %387 = tpu.matmul %384, %386, %cst_252 {dimension_numbers = #tpu.dot_dimension_numbers<[1], [0], [0], [1], [0, 0, 1, 1], [], []>} : vector<8x128xbf16>, vector<128x128xbf16>, vector<8x128xf32> -> vector<8x128xf32>
    %388 = arith.addf %382, %387 : vector<8x128xf32>
    %c0_253 = arith.constant 0 : index
    %c0_254 = arith.constant 0 : index
    %389 = vector.load %arg19[%c0_253, %c0_254] : memref<1x128xf32, #tpu.memory_space<vmem>>, vector<1x128xf32>
    %390 = vector.broadcast %389 : vector<1x128xf32> to vector<8x128xf32>
    %391 = arith.addf %388, %390 : vector<8x128xf32>
    %cst_255 = arith.constant 0.000000e+00 : f32
    %392 = vector.broadcast %cst_255 : f32 to vector<8x128xf32>
    %393 = arith.cmpf oge, %391, %392 : vector<8x128xf32>
    %cst_256 = arith.constant 2.000000e-01 : f32
    %394 = vector.broadcast %cst_256 : f32 to vector<8x128xf32>
    %395 = arith.mulf %394, %391 : vector<8x128xf32>
    %396 = arith.select %393, %391, %395 : vector<8x128xi1>, vector<8x128xf32>
    %397 = vector.extract_strided_slice %396 {offsets = [0, 0], sizes = [4, 128], strides = [1, 1]} : vector<8x128xf32> to vector<4x128xf32>
    %c0_257 = arith.constant 0 : index
    %c0_258 = arith.constant 0 : index
    %398 = vector.load %arg20[%c0_257, %c0_258] : memref<1x128xf32, #tpu.memory_space<vmem>>, vector<1x128xf32>
    %399 = vector.broadcast %398 : vector<1x128xf32> to vector<4x128xf32>
    %400 = arith.mulf %397, %399 : vector<4x128xf32>
    %cst_259 = arith.constant dense<0.000000e+00> : vector<4xf32>
    %401 = vector.multi_reduction <add>, %400, %cst_259 [1] : vector<4x128xf32> to vector<4xf32>
    %402 = vector.shape_cast %401 : vector<4xf32> to vector<4x1xf32>
    %c0_260 = arith.constant 0 : index
    %c0_261 = arith.constant 0 : index
    %403 = vector.load %arg21[%c0_260, %c0_261] : memref<1x1xf32, #tpu.memory_space<vmem>>, vector<1x1xf32>
    %404 = vector.broadcast %403 : vector<1x1xf32> to vector<4x1xf32>
    %405 = arith.addf %402, %404 : vector<4x1xf32>
    %c0_262 = arith.constant 0 : index
    %c0_263 = arith.constant 0 : index
    %c0_264 = arith.constant 0 : index
    %406 = vector.load %arg22[%c0_262, %c0_263, %c0_264] : memref<1x4x1xf32, #tpu.memory_space<vmem>>, vector<1x4x1xf32>
    %407 = vector.shape_cast %406 : vector<1x4x1xf32> to vector<4x1xf32>
    %408 = vector.shape_cast %405 : vector<4x1xf32> to vector<1x4x1xf32>
    tpu.vector_store %arg22[%c0_262, %c0_263, %c0_264], %408 {strides = array<i32>} : memref<1x4x1xf32, #tpu.memory_space<vmem>>, vector<1x4x1xf32>,
    return
  }
  func.func @transform_0(%arg0: i32) -> (i32, i32, i32) {
    %c0_i32 = arith.constant 0 : i32
    %c0_i32_0 = arith.constant 0 : i32
    %c0_i32_1 = arith.constant 0 : i32
    return %arg0, %c0_i32, %c0_i32_0 : i32, i32, i32
  }
  func.func @transform_1(%arg0: i32) -> (i32, i32) {
    %c0_i32 = arith.constant 0 : i32
    %c0_i32_0 = arith.constant 0 : i32
    %c0_i32_1 = arith.constant 0 : i32
    return %c0_i32, %c0_i32_0 : i32, i32
  }
  func.func @transform_2(%arg0: i32) -> (i32, i32, i32) {
    %c0_i32 = arith.constant 0 : i32
    %c0_i32_0 = arith.constant 0 : i32
    %c0_i32_1 = arith.constant 0 : i32
    %c0_i32_2 = arith.constant 0 : i32
    return %c0_i32, %c0_i32_0, %c0_i32_1 : i32, i32, i32
  }
  func.func @transform_3(%arg0: i32) -> (i32, i32) {
    %c0_i32 = arith.constant 0 : i32
    %c0_i32_0 = arith.constant 0 : i32
    %c0_i32_1 = arith.constant 0 : i32
    return %c0_i32, %c0_i32_0 : i32, i32
  }
  func.func @transform_4(%arg0: i32) -> (i32, i32) {
    %c0_i32 = arith.constant 0 : i32
    %c0_i32_0 = arith.constant 0 : i32
    %c0_i32_1 = arith.constant 0 : i32
    return %c0_i32, %c0_i32_0 : i32, i32
  }
  func.func @transform_5(%arg0: i32) -> (i32, i32, i32) {
    %c0_i32 = arith.constant 0 : i32
    %c0_i32_0 = arith.constant 0 : i32
    %c0_i32_1 = arith.constant 0 : i32
    %c0_i32_2 = arith.constant 0 : i32
    return %c0_i32, %c0_i32_0, %c0_i32_1 : i32, i32, i32
  }
  func.func @transform_6(%arg0: i32) -> (i32, i32) {
    %c0_i32 = arith.constant 0 : i32
    %c0_i32_0 = arith.constant 0 : i32
    %c0_i32_1 = arith.constant 0 : i32
    return %c0_i32, %c0_i32_0 : i32, i32
  }
  func.func @transform_7(%arg0: i32) -> (i32, i32) {
    %c0_i32 = arith.constant 0 : i32
    %c0_i32_0 = arith.constant 0 : i32
    %c0_i32_1 = arith.constant 0 : i32
    return %c0_i32, %c0_i32_0 : i32, i32
  }
  func.func @transform_8(%arg0: i32) -> (i32, i32, i32) {
    %c0_i32 = arith.constant 0 : i32
    %c0_i32_0 = arith.constant 0 : i32
    %c0_i32_1 = arith.constant 0 : i32
    %c0_i32_2 = arith.constant 0 : i32
    return %c0_i32, %c0_i32_0, %c0_i32_1 : i32, i32, i32
  }
  func.func @transform_9(%arg0: i32) -> (i32, i32) {
    %c0_i32 = arith.constant 0 : i32
    %c0_i32_0 = arith.constant 0 : i32
    %c0_i32_1 = arith.constant 0 : i32
    return %c0_i32, %c0_i32_0 : i32, i32
  }
  func.func @transform_10(%arg0: i32) -> (i32, i32) {
    %c0_i32 = arith.constant 0 : i32
    %c0_i32_0 = arith.constant 0 : i32
    %c0_i32_1 = arith.constant 0 : i32
    return %c0_i32, %c0_i32_0 : i32, i32
  }
  func.func @transform_11(%arg0: i32) -> (i32, i32, i32) {
    %c0_i32 = arith.constant 0 : i32
    %c0_i32_0 = arith.constant 0 : i32
    %c0_i32_1 = arith.constant 0 : i32
    %c0_i32_2 = arith.constant 0 : i32
    return %c0_i32, %c0_i32_0, %c0_i32_1 : i32, i32, i32
  }
  func.func @transform_12(%arg0: i32) -> (i32, i32) {
    %c0_i32 = arith.constant 0 : i32
    %c0_i32_0 = arith.constant 0 : i32
    %c0_i32_1 = arith.constant 0 : i32
    return %c0_i32, %c0_i32_0 : i32, i32
  }
  func.func @transform_13(%arg0: i32) -> (i32, i32) {
    %c0_i32 = arith.constant 0 : i32
    %c0_i32_0 = arith.constant 0 : i32
    %c0_i32_1 = arith.constant 0 : i32
    return %c0_i32, %c0_i32_0 : i32, i32
  }
  func.func @transform_14(%arg0: i32) -> (i32, i32, i32) {
    %c0_i32 = arith.constant 0 : i32
    %c0_i32_0 = arith.constant 0 : i32
    %c0_i32_1 = arith.constant 0 : i32
    %c0_i32_2 = arith.constant 0 : i32
    return %c0_i32, %c0_i32_0, %c0_i32_1 : i32, i32, i32
  }
  func.func @transform_15(%arg0: i32) -> (i32, i32) {
    %c0_i32 = arith.constant 0 : i32
    %c0_i32_0 = arith.constant 0 : i32
    %c0_i32_1 = arith.constant 0 : i32
    return %c0_i32, %c0_i32_0 : i32, i32
  }
  func.func @transform_16(%arg0: i32) -> (i32, i32) {
    %c0_i32 = arith.constant 0 : i32
    %c0_i32_0 = arith.constant 0 : i32
    %c0_i32_1 = arith.constant 0 : i32
    return %c0_i32, %c0_i32_0 : i32, i32
  }
  func.func @transform_17(%arg0: i32) -> (i32, i32, i32) {
    %c0_i32 = arith.constant 0 : i32
    %c0_i32_0 = arith.constant 0 : i32
    %c0_i32_1 = arith.constant 0 : i32
    %c0_i32_2 = arith.constant 0 : i32
    return %c0_i32, %c0_i32_0, %c0_i32_1 : i32, i32, i32
  }
  func.func @transform_18(%arg0: i32) -> (i32, i32) {
    %c0_i32 = arith.constant 0 : i32
    %c0_i32_0 = arith.constant 0 : i32
    %c0_i32_1 = arith.constant 0 : i32
    return %c0_i32, %c0_i32_0 : i32, i32
  }
  func.func @transform_19(%arg0: i32) -> (i32, i32) {
    %c0_i32 = arith.constant 0 : i32
    %c0_i32_0 = arith.constant 0 : i32
    %c0_i32_1 = arith.constant 0 : i32
    return %c0_i32, %c0_i32_0 : i32, i32
  }
  func.func @transform_20(%arg0: i32) -> (i32, i32) {
    %c0_i32 = arith.constant 0 : i32
    %c0_i32_0 = arith.constant 0 : i32
    %c0_i32_1 = arith.constant 0 : i32
    return %c0_i32, %c0_i32_0 : i32, i32
  }
  func.func @transform_21(%arg0: i32) -> (i32, i32, i32) {
    %c0_i32 = arith.constant 0 : i32
    %c0_i32_0 = arith.constant 0 : i32
    %c0_i32_1 = arith.constant 0 : i32
    return %arg0, %c0_i32, %c0_i32_0 : i32, i32, i32
  }
}

</mosaic_0001>

<bundles_post_ra>
// kernel: discriminator_forward.1
= control target key start
LH: loop header
LB: loop body
LE: loop exit
PB: predicated region body
PF: predicated region fallthrough
CT: control target
= control target key end

     0   :  { %s9445_s0 = inlined_call_operand.vmem [shape: bf16[2,256,8], index: 0, kind: input, shape index: {}]   ;;  %s9446_s1 = inlined_call_operand.hbm [shape: bf16[576,256], index: 1, kind: input, shape index: {}]   ;;  %s9447_s2 = inlined_call_operand.vmem [shape: bf16[9,8,32], index: 2, kind: input, shape index: {}]   ;;  %s9448_s3 = inlined_call_operand.vmem [shape: f32[1,32], index: 3, kind: input, shape index: {}]   ;;  %s9449_s4 = inlined_call_operand.hbm [shape: bf16[576,64], index: 4, kind: input, shape index: {}]   ;;  %s9450_s5 = inlined_call_operand.vmem [shape: bf16[9,32,32], index: 5, kind: input, shape index: {}]   ;;  %s9451_s6 = inlined_call_operand.vmem [shape: f32[1,32], index: 6, kind: input, shape index: {}]   ;;  %s9452_s7 = inlined_call_operand.vmem [shape: bf16[144,64], index: 7, kind: input, shape index: {}]   ;;  %s9453_s8 = inlined_call_operand.hbm [shape: bf16[9,32,64], index: 8, kind: input, shape index: {}]   ;;  %s9454_s9 = inlined_call_operand.vmem [shape: f32[1,64], index: 9, kind: input, shape index: {}]   ;;  %s9455_s10 = inlined_call_operand.hbm [shape: bf16[144,16], index: 10, kind: input, shape index: {}]   ;;  %s9456_s11 = inlined_call_operand.hbm [shape: bf16[9,64,64], index: 11, kind: input, shape index: {}]   ;;  %s9457_s12 = inlined_call_operand.vmem [shape: f32[1,64], index: 12, kind: input, shape index: {}]   ;;  %s9458_s13 = inlined_call_operand.hbm [shape: bf16[72,16], index: 13, kind: input, shape index: {}]   ;;  %s9459_s14 = inlined_call_operand.hbm [shape: bf16[9,64,128], index: 14, kind: input, shape index: {}]   ;;  %s9460_s15 = inlined_call_operand.vmem [shape: f32[1,128], index: 15, kind: input, shape index: {}]   ;;  %s9461_s16 = inlined_call_operand.hbm [shape: bf16[72,8], index: 16, kind: input, shape index: {}]   ;;  %s9462_s17 = inlined_call_operand.vmem [shape: bf16[9,128,128], index: 17, kind: input, shape index: {}]   ;;  %s9463_s18 = inlined_call_operand.vmem [shape: f32[1,128], index: 18, kind: input, shape index: {}]   ;;  %s9464_s19 = inlined_call_operand.vmem [shape: f32[1,128], index: 19, kind: input, shape index: {}]   ;;  %s9465_s20 = inlined_call_operand.<no memory space> [shape: f32[1,1], index: 20, kind: input, shape index: {}]   ;;  %s9466_s21 = inlined_call_operand.vmem [shape: f32[2,4,1], index: 21, kind: output, shape index: {}]  }
   0x1   :  { %9470 = sst [smem:[#allocation22_spill]] %s9445_s0  ;;  %v26_v0 = vstv %s9465_s20 }
   0x2   :  { %9471 = sst [smem:[#allocation23_spill]] %s9446_s1  ;;  %27 = vst [vmem:[#allocation2] sm:$0x1] %v26_v0 }
   0x3   :  { %9472 = sst [smem:[#allocation24_spill]] %s9447_s2 }
   0x4   :  { %9473 = sst [smem:[#allocation25_spill]] %s9448_s3 }
   0x5   :  { %9474 = sst [smem:[#allocation26_spill]] %s9449_s4 }
   0x6   :  { %9475 = sst [smem:[#allocation27_spill]] %s9450_s5 }
   0x7   :  { %9476 = sst [smem:[#allocation28_spill]] %s9455_s10 }
   0x8   :  { %9477 = sst [smem:[#allocation29_spill]] %s9458_s13 }
   0x9   :  { %9478 = sst [smem:[#allocation30_spill]] %s9466_s21 }
   0xa   :  { %28 = vsyncpa [#allocation4], 0 }
   0xb   :  { %29 = vsyncpa [#allocation6], 0 }
   0xc   :  { %30 = vsyncpa [#allocation9], 0 }
   0xd   :  { %31 = vsyncpa [#allocation12], 0 }
   0xe   :  { %32 = vsyncpa [#allocation15], 0  ;;  %s8597_s26 = smov 0  }
   0xf LB: > { %9479 = sst [smem:[#allocation21_spill]] %s8470_s26  ;;  %s8606_s29 = sadd.s32 4294967295, %s8470_s26   ;;  %s8470_s26 = sphi %s8597_s26, %s38_s26  }
  0x10   : > { %s9480_s28 = sld [smem:[#allocation26_spill]]  ;;  %p6097_p0 = scmp.ge.s32.totalorder %s8470_s26, 1 }
  0x11   : > { %p515_p1 = scmp.lt.s32.totalorder %s8470_s26, 3  ;;  %p8160_p2 = scmp.eq.s32.totalorder %s8606_s29, 0 }
  0x12   : > { %s8472_s4 = smov [#allocation5]   ;;  %s9482_s10 = sld [smem:[#allocation28_spill]] }
  0x13   : > { %p8611_p3 = pnand %p6097_p0, %p515_p1  ;;  %s548_s30 = sshll.u32 %s8472_s4, 4  ;;  %s549_s30 = int_to_ptr.vmem [resolvable:$true] %s548_s30 }
  0x14   : > { %s8473_s24 = smov [#allocation8]   ;;  %s9484_s13 = sld [smem:[#allocation29_spill]] }
  0x15   : > { %p8135_p4 = pneg %p8611_p3  ;;  %s588_s2 = sshll.u32 %s8473_s24, 4  ;;  %s589_s2 = int_to_ptr.vmem [resolvable:$true] %s588_s2 }
  0x16   : > { %s546_s20 = sshll.u32 %s9480_s28, 4  ;;  %s8474_s28 = smov 64   ;;  %s547_s20 = int_to_ptr.hbm [resolvable:$true] %s546_s20 }
  0x17   : > { %p8622_p5 = pnand %p8160_p2, %p8135_p4  ;;  %s8475_s4 = smov 4  }
  0x18   : > { %s586_s23 = sshll.u32 %s9482_s10, 4  ;;  %s8476_s5 = smov [#allocation11]   ;;  %s587_s23 = int_to_ptr.hbm [resolvable:$true] %s586_s23 }
  0x19   : > { %8141 = dma.hbm_to_vmem [thread:$0]  (!%p8622_p5), %s547_s20, 4608, %s549_s30, [#allocation6], %s8474_s28, %s8474_s28, %s8475_s4  }
  0x1a   : > { %s617_s3 = sshll.u32 %s9484_s13, 4  ;;  %s619_s22 = sshll.u32 %s8476_s5, 4  ;;  %s618_s3 = int_to_ptr.hbm [resolvable:$true] %s617_s3  ;;  %s620_s22 = int_to_ptr.vmem [resolvable:$true] %s619_s22 }
  0x1b   : > { %8147 = dma.hbm_to_vmem [thread:$0]  (!%p8622_p5), %s587_s23, 1152, %s589_s2, [#allocation9], %s8474_s28, %s8474_s28, %s8475_s4  }
  0x1c   : > { %s9485_s27 = sld [smem:[#allocation23_spill]]  ;;  %s8477_s20 = smov [#allocation3]  }
  0x1d   : > { %8153 = dma.hbm_to_vmem [thread:$0]  (!%p8622_p5), %s618_s3, 576, %s620_s22, [#allocation12], %s8474_s28, %s8474_s28, %s8475_s4  }
  0x1e   : > { %s528_s30 = sshll.u32 %s8477_s20, 4  ;;  %s569_s2 = sshll.u32 %s9453_s8, 4  ;;  %s529_s30 = int_to_ptr.vmem [resolvable:$true] %s528_s30  ;;  %s570_s2 = int_to_ptr.hbm [resolvable:$true] %s569_s2 }
  0x1f   : > { %s8478_s5 = smov 128   ;;  %s8479_s26 = smov 8  }
  0x20   : > { %s8480_s24 = smov [#allocation7]   ;;  %s600_s3 = sshll.u32 %s9456_s11, 4  ;;  %s601_s3 = int_to_ptr.hbm [resolvable:$true] %s600_s3 }
  0x21   : > { %s571_s25 = sshll.u32 %s8480_s24, 4  ;;  %s8482_s21 = smov [#allocation13]   ;;  %s572_s25 = int_to_ptr.vmem [resolvable:$true] %s571_s25 }
  0x22   : > { %s526_s10 = sshll.u32 %s9485_s27, 4  ;;  %s8483_s24 = smov [#allocation14]   ;;  %s527_s10 = int_to_ptr.hbm [resolvable:$true] %s526_s10 }
  0x23   : > { %8138 = dma.hbm_to_vmem [thread:$0]  (!%p8622_p5), %s527_s10, 9216, %s529_s30, [#allocation4], %s8478_s5, %s8478_s5, %s8479_s26  }
  0x24   : > { %8144 = dma.hbm_to_vmem [thread:$0]  (!%p8622_p5), %s570_s2, 2304, %s572_s25, [#allocation6], %s8474_s28, %s8474_s28, %s8475_s4  }
  0x25   : > { %s631_s10 = sshll.u32 %s9459_s14, 4  ;;  %s8481_s26 = smov [#allocation10]   ;;  %s632_s10 = int_to_ptr.hbm [resolvable:$true] %s631_s10 }
  0x26   : > { %s602_s20 = sshll.u32 %s8481_s26, 4  ;;  %s633_s30 = sshll.u32 %s8482_s21, 4  ;;  %s603_s20 = int_to_ptr.vmem [resolvable:$true] %s602_s20  ;;  %s634_s30 = int_to_ptr.vmem [resolvable:$true] %s633_s30 }
  0x27   : > { %8150 = dma.hbm_to_vmem [thread:$0]  (!%p8622_p5), %s601_s3, 4608, %s603_s20, [#allocation9], %s8474_s28, %s8474_s28, %s8475_s4  }
  0x28   : > { %s648_s2 = sshll.u32 %s9461_s16, 4  ;;  %s650_s25 = sshll.u32 %s8483_s24, 4  ;;  %s649_s2 = int_to_ptr.hbm [resolvable:$true] %s648_s2  ;;  %s651_s25 = int_to_ptr.vmem [resolvable:$true] %s650_s25 }
  0x29   : > { %8156 = dma.hbm_to_vmem [thread:$0]  (!%p8622_p5), %s632_s10, 4608, %s634_s30, [#allocation12], %s8474_s28, %s8474_s28, %s8475_s4  }
  0x2a   : > { %8159 = dma.hbm_to_vmem [thread:$0]  (!%p8622_p5), %s649_s2, 576, %s651_s25, [#allocation15], %s8474_s28, %s8474_s28, %s8475_s4  }
  0x2b   : > { %686 = sbr.rel (%p8611_p3) target bundleno = 3449 (0xd79), region = 104 }
  0x30   : > { %8449 = dma.done.wait (%p8160_p2), [#allocation4], 9216  }
  0x31   : > { %8451 = vsyncadd (%p8160_p2), [#allocation4], 4294958080 }
  0x32   : > { %8453 = dma.done.wait (%p8160_p2), [#allocation6], 6912  }
  0x33   : > { %8455 = vsyncadd (%p8160_p2), [#allocation6], 4294960384 }
  0x34   : > { %8457 = dma.done.wait (%p8160_p2), [#allocation9], 5760  }
  0x35   : > { %8459 = vsyncadd (%p8160_p2), [#allocation9], 4294961536 }
  0x36   : > { %8461 = dma.done.wait (%p8160_p2), [#allocation12], 5184  }
  0x37   : > { %8463 = vsyncadd (%p8160_p2), [#allocation12], 4294962112 }
  0x38   : > { %8465 = dma.done.wait (%p8160_p2), [#allocation15], 576  }
  0x39   : > { %8467 = vsyncadd (%p8160_p2), [#allocation15], 4294966720  ;;  %p781_p6 = scmp.lt.s32.totalorder %s8606_s29, 1  ;;  %s9486_s4 = sld [smem:[#allocation22_spill]]  ;;  %v6121_v17 = vld [vmem:[#allocation3] sm:$0xf] }
  0x3a   : > { %v7790_v18 = vld [vmem:[#allocation3 + $0x4] sm:$0xf0]  ;;  %v7789_v19 = vld [vmem:[#allocation3 + $0x4] sm:$0xf]  ;;  %v6123_v20 = vld [vmem:[#allocation3 + $0x8] sm:$0xf0] }
  0x3b   : > { %s9493_s29 = smov (!%p781_p6, %s8606_s29), 1  ;;  %v6122_v21 = vor.u32 %v7790_v18, %v6121_v17  ;;  %v6126_v22 = vor.u32 %v7789_v19, %v6123_v20  ;;  %v6129_v23 = vld [vmem:[#allocation3 + $0x10] sm:$0xf]  ;;  %v7792_v24 = vld [vmem:[#allocation3 + $0x14] sm:$0xf0]  ;;  %s9487_s22 = sld [smem:[#allocation24_spill]] }
  0x3c   : > { %s7772_s0 = sshll.u32 %s9493_s29, 7  ;;  %v7791_v25 = vld [vmem:[#allocation3 + $0x14] sm:$0xf]  ;;  %v6131_v26 = vld [vmem:[#allocation3 + $0x18] sm:$0xf0]  ;;  %v6130_v27 = vor.u32 %v7792_v24, %v6129_v23  ;;  %vm1753_vm0 = vcmask 1043456  }
  0x3d   : > { %v6134_v28 = vor.u32 %v7791_v25, %v6131_v26  ;;  %v6137_v29 = vld [vmem:[#allocation3 + $0x20] sm:$0xf]  ;;  %v7794_v30 = vld [vmem:[#allocation3 + $0x24] sm:$0xf0]  ;;  %v7793_v31 = vld [vmem:[#allocation3 + $0x24] sm:$0xf] }
  0x3e   : > { %v6139_v32 = vld [vmem:[#allocation3 + $0x28] sm:$0xf0]  ;;  %v6138_v33 = vor.u32 %v7794_v30, %v6137_v29  ;;  %v6145_v35 = vld [vmem:[#allocation3 + $0x30] sm:$0xf]  ;;  %v7796_v36 = vld [vmem:[#allocation3 + $0x34] sm:$0xf0] }
  0x3f   : > { %s785_s27 = scalar_lea.vmem %s9486_s4, %s7772_s0  ;;  %v6142_v34 = vor.u32 %v7793_v31, %v6139_v32  ;;  %v7795_v37 = vld [vmem:[#allocation3 + $0x34] sm:$0xf]  ;;  %v6147_v38 = vld [vmem:[#allocation3 + $0x38] sm:$0xf0]  ;;  %v6146_v39 = vor.u32 %v7796_v36, %v6145_v35  ;;  %v6153_v41 = vld [vmem:[#allocation3 + $0x40] sm:$0xf] }
  0x40   : > { %v7780_v1 = vld [vmem:[%s785_s27 + $0x38] sm:$0xff]  ;;  %v7779_v3 = vld [vmem:[%s785_s27 + $0x30] sm:$0xff]  ;;  %v7778_v5 = vld [vmem:[%s785_s27 + $0x28] sm:$0xff]  ;;  %v6150_v40 = vor.u32 %v7795_v37, %v6147_v38  ;;  %vm1740_vm1 = vcmask 64512   ;;  %s9488_s26 = sld [smem:[#allocation25_spill]]  ;;  %vm2528_vm10 = vcmask 523264  }
  0x41   : > { %v7788_v2 = vld [vmem:[%s785_s27 + $0x78] sm:$0xff]  ;;  %1351 = vmatpush.bf16.msra.mxu0 %v7780_v1  ;;  %v7787_v4 = vld [vmem:[%s785_s27 + $0x70] sm:$0xff]  ;;  %v7786_v6 = vld [vmem:[%s785_s27 + $0x68] sm:$0xff]  ;;  %s9489_s30 = sld [smem:[#allocation27_spill]]  ;;  %vm2855_vm11 = vcmask 261120   ;;  %s6118_s23 = sshll.u32 %s9493_s29, 2 }
  0x42   : > { %1540 = vmatpush.bf16.msra.mxu1 %v7788_v2  ;;  %v7777_v7 = vld [vmem:[%s785_s27 + $0x20] sm:$0xff]  ;;  %v7776_v9 = vld [vmem:[%s785_s27 + $0x18] sm:$0xff]  ;;  %v7775_v11 = vld [vmem:[%s785_s27 + $0x10] sm:$0xff]  ;;  %s9490_s24 = sld [smem:[#allocation30_spill]] }
  0x43   : > { %v7785_v8 = vld [vmem:[%s785_s27 + $0x60] sm:$0xff]  ;;  %v7784_v10 = vld [vmem:[%s785_s27 + $0x58] sm:$0xff]  ;;  %v7783_v12 = vld [vmem:[%s785_s27 + $0x50] sm:$0xff] }
  0x44   : > { %v7774_v13 = vld [vmem:[%s785_s27 + $0x8] sm:$0xff]  ;;  %v7773_v15 = vld [vmem:[%s785_s27] sm:$0xff]  ;;  %v6161_v47 = vld [vmem:[#allocation3 + $0x50] sm:$0xf] }
  0x45   : > { %1352 = vmatpush.bf16.msra.mxu0 %v7779_v3  ;;  %v7782_v14 = vld [vmem:[%s785_s27 + $0x48] sm:$0xff]  ;;  %v7781_v16 = vld [vmem:[%s785_s27 + $0x40] sm:$0xff]  ;;  %v7800_v48 = vld [vmem:[#allocation3 + $0x54] sm:$0xf0] }
  0x46   : > { %1541 = vmatpush.bf16.msra.mxu1 %v7787_v4  ;;  %v7798_v42 = vld [vmem:[#allocation3 + $0x44] sm:$0xf0]  ;;  %v7797_v43 = vld [vmem:[#allocation3 + $0x44] sm:$0xf]  ;;  %v6155_v44 = vld [vmem:[#allocation3 + $0x48] sm:$0xf0]  ;;  %v6162_v51 = vor.u32 %v7800_v48, %v6161_v47 }
  0x47   : > { %v6154_v45 = vor.u32 %v7798_v42, %v6153_v41  ;;  %v6158_v46 = vor.u32 %v7797_v43, %v6155_v44  ;;  %v7799_v49 = vld [vmem:[#allocation3 + $0x54] sm:$0xf]  ;;  %v6163_v50 = vld [vmem:[#allocation3 + $0x58] sm:$0xf0]  ;;  %v6169_v53 = vld [vmem:[#allocation3 + $0x60] sm:$0xf] }
  0x48   : > { %v6166_v52 = vor.u32 %v7799_v49, %v6163_v50  ;;  %v7802_v54 = vld [vmem:[#allocation3 + $0x64] sm:$0xf0]  ;;  %v7801_v55 = vld [vmem:[#allocation3 + $0x64] sm:$0xf]  ;;  %v6171_v56 = vld [vmem:[#allocation3 + $0x68] sm:$0xf0]  ;;  %s789_s25 = scalar_lea.vmem %s9490_s24, %s6118_s23 }
  0x49   : > { %1353 = vmatpush.bf16.msra.mxu0 %v7778_v5  ;;  %v6170_v57 = vor.u32 %v7802_v54, %v6169_v53  ;;  %v6174_v58 = vor.u32 %v7801_v55, %v6171_v56  ;;  %v1733_v59 = vld [vmem:[%s9487_s22] sm:$0xf]  ;;  %v6177_v61 = vld [vmem:[#allocation3 + $0x70] sm:$0xf]  ;;  %v7804_v62 = vld [vmem:[#allocation3 + $0x74] sm:$0xf0] }
  0x4a   : > { %1542 = vmatpush.bf16.msra.mxu1 %v7786_v6  ;;  %v1799_v60 = vsel %vm1753_vm0, %v1733_v59, 0  ;;  %v7803_v63 = vld [vmem:[#allocation3 + $0x74] sm:$0xf]  ;;  %v6179_v0 = vld [vmem:[#allocation3 + $0x78] sm:$0xf0]  ;;  %v6178_v1 = vor.u32 %v7804_v62, %v6177_v61 }
  0x4b   : > { %1808 = vmatpush.bf16.msra.mxu3 %v1799_v60  ;;  %v6182_v2 = vor.u32 %v7803_v63, %v6179_v0  ;;  %v6185_v3 = vld [vmem:[#allocation3 + $0x80] sm:$0xf]  ;;  %v7806_v4 = vld [vmem:[#allocation3 + $0x84] sm:$0xf0]  ;;  %v7805_v5 = vld [vmem:[#allocation3 + $0x84] sm:$0xf] }
  0x4c   : > { %v6187_v6 = vld [vmem:[#allocation3 + $0x88] sm:$0xf0]  ;;  %v7808_v17 = vld [vmem:[#allocation3 + $0x94] sm:$0xf0]  ;;  %v7807_v18 = vld [vmem:[#allocation3 + $0x94] sm:$0xf] }
  0x4d   : > { %1354 = vmatpush.bf16.msra.mxu0 %v7777_v7  ;;  %v6186_v7 = vor.u32 %v7806_v4, %v6185_v3  ;;  %v6195_v19 = vld [vmem:[#allocation3 + $0x98] sm:$0xf0]  ;;  %v6201_v29 = vld [vmem:[#allocation3 + $0xa0] sm:$0xf]  ;;  %v7810_v30 = vld [vmem:[#allocation3 + $0xa4] sm:$0xf0] }
  0x4e   : > { %1543 = vmatpush.bf16.msra.mxu1 %v7785_v8  ;;  %v6190_v8 = vor.u32 %v7805_v5, %v6187_v6  ;;  %v7809_v31 = vld [vmem:[#allocation3 + $0xa4] sm:$0xf]  ;;  %v6203_v32 = vld [vmem:[#allocation3 + $0xa8] sm:$0xf0]  ;;  %v6209_v44 = vld [vmem:[#allocation3 + $0xb0] sm:$0xf] }
  0x4f   : > { %v6211_v47 = vld [vmem:[#allocation3 + $0xb8] sm:$0xf0]  ;;  %v7813_v59 = vld [vmem:[#allocation3 + $0xc4] sm:$0xf]  ;;  %v6219_v60 = vld [vmem:[#allocation3 + $0xc8] sm:$0xf0] }
  0x50   : > { %v6222_v62 = vor.u32 %v7813_v59, %v6219_v60  ;;  %v6225_v6 = vld [vmem:[#allocation3 + $0xd0] sm:$0xf] }
  0x51   : > { %1355 = vmatpush.bf16.msra.mxu0 %v7776_v9  ;;  %v6257_v60 = vld [vmem:[#allocation3 + $0x110] sm:$0xf] }
  0x52   : > { %1544 = vmatpush.bf16.msra.mxu1 %v7784_v10 }
  0x55   : > { %1356 = vmatpush.bf16.msra.mxu0 %v7775_v11 }
  0x56   : > { %1545 = vmatpush.bf16.msra.mxu1 %v7783_v12 }
  0x59   : > { %1357 = vmatpush.bf16.msra.mxu0 %v7774_v13 }
  0x5a   : > { %1546 = vmatpush.bf16.msra.mxu1 %v7782_v14 }
  0x5d   : > { %1358 = vmatpush.bf16.msra.mxu0 %v7773_v15 }
  0x5e   : > { %1547 = vmatpush.bf16.msra.mxu1 %v7781_v16  ;;  %v6193_v16 = vld [vmem:[#allocation3 + $0x90] sm:$0xf] }
  0x5f   : > { %v6194_v20 = vor.u32 %v7808_v17, %v6193_v16 }
  0x60   : > { %1359 = vmatmul.bf16.vlgmr.msra.gmra.mxu0 %v6122_v21  ;;  %v6198_v21 = vor.u32 %v7807_v18, %v6195_v19  ;;  %v6233_v19 = vld [vmem:[#allocation3 + $0xe0] sm:$0xf] }
  0x61   : > { %1548 = vmatmul.bf16.vlgmr.msra.gmra.mxu1 %v6126_v22 }
  0x70   : > { %1364 = vmatmul.bf16.gmra.mxu0 %v6130_v27 }
  0x71   : > { %1553 = vmatmul.bf16.gmra.mxu1 %v6134_v28 }
  0x80   : > { %1369 = vmatmul.bf16.gmra.mxu0 %v6138_v33  ;;  %v6202_v33 = vor.u32 %v7810_v30, %v6201_v29  ;;  %v6480_v29 = vld [vmem:[%s9487_s22 + $0x8] sm:$0xf] }
  0x81   : > { %1558 = vmatmul.bf16.gmra.mxu1 %v6142_v34  ;;  %v6206_v34 = vor.u32 %v7809_v31, %v6203_v32  ;;  %v1849_v32 = vsel %vm1753_vm0, %v6480_v29, 0 }
  0x90   : > { %1374 = vmatmul.bf16.gmra.mxu0 %v6146_v39  ;;  %v6471_v39 = vld [vmem:[%s9487_s22 + $0x4] sm:$0xf] }
  0x91   : > { %1563 = vmatmul.bf16.gmra.mxu1 %v6150_v40  ;;  %v1755_v42 = vsel %vm1753_vm0, %v6471_v39, 0 }
  0x92   : > { %1764 = vmatpush.bf16.msra.mxu2 %v1755_v42 }
  0x96   : > { %1858 = vmatpush.bf16.msrb.mxu2 %v1849_v32 }
  0xa0   : > { %1379 = vmatmul.bf16.gmra.mxu0 %v6154_v45  ;;  %v7812_v45 = vld [vmem:[#allocation3 + $0xb4] sm:$0xf0] }
  0xa1   : > { %1568 = vmatmul.bf16.gmra.mxu1 %v6158_v46  ;;  %v7811_v46 = vld [vmem:[#allocation3 + $0xb4] sm:$0xf]  ;;  %v6210_v48 = vor.u32 %v7812_v45, %v6209_v44 }
  0xa2   : > { %v6214_v49 = vor.u32 %v7811_v46, %v6211_v47  ;;  %v6249_v47 = vld [vmem:[#allocation3 + $0x100] sm:$0xf] }
  0xb0   : > { %1384 = vmatmul.bf16.gmra.mxu0 %v6162_v51 }
  0xb1   : > { %1573 = vmatmul.bf16.gmra.mxu1 %v6166_v52 }
  0xc0   : > { %1389 = vmatmul.bf16.gmra.mxu0 %v6170_v57  ;;  %v6217_v57 = vld [vmem:[#allocation3 + $0xc0] sm:$0xf] }
  0xc1   : > { %1578 = vmatmul.bf16.gmra.mxu1 %v6174_v58  ;;  %v7814_v58 = vld [vmem:[#allocation3 + $0xc4] sm:$0xf0] }
  0xc2   : > { %v6218_v61 = vor.u32 %v7814_v58, %v6217_v57 }
  0xd0   : > { %1394 = vmatmul.bf16.gmra.mxu0 %v6178_v1 }
  0xd1   : > { %1583 = vmatmul.bf16.gmra.mxu1 %v6182_v2 }
  0xdd   : > { %v1360_v9 = vpop.f32.mrf.mxu0 }
  0xde   : > { %v1549_v10 = vpop.f32.mrf.mxu1 }
  0xdf   : > { %v1550_v13 = vadd.f32 %v1549_v10, %v1360_v9  ;;  %v6227_v9 = vld [vmem:[#allocation3 + $0xd8] sm:$0xf0] }
  0xe0   : > { %1399 = vmatmul.bf16.gmra.mxu0 %v6186_v7  ;;  %v7816_v7 = vld [vmem:[#allocation3 + $0xd4] sm:$0xf0] }
  0xe1   : > { %1588 = vmatmul.bf16.gmra.mxu1 %v6190_v8  ;;  %v7815_v8 = vld [vmem:[#allocation3 + $0xd4] sm:$0xf]  ;;  %v6226_v10 = vor.u32 %v7816_v7, %v6225_v6 }
  0xe5   : > { %v1362_v11 = vpop.f32.mrf.mxu0 }
  0xe6   : > { %v1551_v12 = vpop.f32.mrf.mxu1 }
  0xe7   : > { %v1552_v14 = vadd.f32 %v1551_v12, %v1362_v11  ;;  %v6230_v11 = vor.u32 %v7815_v8, %v6227_v9  ;;  %v6265_v9 = vld [vmem:[#allocation3 + $0x120] sm:$0xf] }
  0xe9   : > { %v1729_v15 = vpack.c.bf16 %v1552_v14, %v1550_v13 }
  0xeb   : > { %6476 = vmatmul.msk.bf16.vlgmr.msra.gmra.mxu3 %vm1740_vm1, %v1729_v15 }
  0xed   : > { %v1365_v22 = vpop.f32.mrf.mxu0 }
  0xee   : > { %v1554_v23 = vpop.f32.mrf.mxu1 }
  0xef   : > { %v1555_v26 = vadd.f32 %v1554_v23, %v1365_v22  ;;  %v6235_v22 = vld [vmem:[#allocation3 + $0xe8] sm:$0xf0] }
  0xf0   : > { %1404 = vmatmul.bf16.gmra.mxu0 %v6194_v20  ;;  %v7818_v20 = vld [vmem:[#allocation3 + $0xe4] sm:$0xf0] }
  0xf1   : > { %1593 = vmatmul.bf16.gmra.mxu1 %v6198_v21  ;;  %v7817_v21 = vld [vmem:[#allocation3 + $0xe4] sm:$0xf]  ;;  %v6234_v23 = vor.u32 %v7818_v20, %v6233_v19 }
  0xf5   : > { %v1367_v24 = vpop.f32.mrf.mxu0 }
  0xf6   : > { %v1556_v25 = vpop.f32.mrf.mxu1 }
  0xf7   : > { %v1557_v27 = vadd.f32 %v1556_v25, %v1367_v24  ;;  %v6238_v24 = vor.u32 %v7817_v21, %v6235_v22  ;;  %v6485_v21 = vld [vmem:[%s9487_s22 + $0xc] sm:$0xf] }
  0xf8   : > { %v1907_v22 = vsel %vm1753_vm0, %v6485_v21, 0  ;;  %v6490_v21 = vld [vmem:[%s9487_s22 + $0x10] sm:$0xf] }
  0xf9   : > { %v1730_v28 = vpack.c.bf16 %v1557_v27, %v1555_v26  ;;  %1916 = vmatpush.bf16.msrb.mxu3 %v1907_v22  ;;  %v1965_v22 = vsel %vm1753_vm0, %v6490_v21, 0 }
  0xfb   : > { %6477 = vmatmul.msk.bf16.gmra.mxu3 %vm1740_vm1, %v1730_v28 }
  0xfd   : > { %v1370_v35 = vpop.f32.mrf.mxu0 }
  0xfe   : > { %v1559_v36 = vpop.f32.mrf.mxu1 }
  0xff   : > { %v1560_v40 = vadd.f32 %v1559_v36, %v1370_v35  ;;  %v7820_v35 = vld [vmem:[#allocation3 + $0xf4] sm:$0xf0]  ;;  %v7819_v36 = vld [vmem:[#allocation3 + $0xf4] sm:$0xf] }
 0x100   : > { %1409 = vmatmul.bf16.gmra.mxu0 %v6202_v33 }
 0x101   : > { %1598 = vmatmul.bf16.gmra.mxu1 %v6206_v34  ;;  %v6241_v34 = vld [vmem:[#allocation3 + $0xf0] sm:$0xf] }
 0x105   : > { %v1372_v37 = vpop.f32.mrf.mxu0 }
 0x106   : > { %v1561_v38 = vpop.f32.mrf.mxu1 }
 0x107   : > { %v1562_v41 = vadd.f32 %v1561_v38, %v1372_v37  ;;  %v6243_v37 = vld [vmem:[#allocation3 + $0xf8] sm:$0xf0]  ;;  %v6242_v38 = vor.u32 %v7820_v35, %v6241_v34 }
 0x108   : > { %v6246_v39 = vor.u32 %v7819_v36, %v6243_v37  ;;  %v6281_v37 = vld [vmem:[#allocation3 + $0x140] sm:$0xf] }
 0x109   : > { %v1731_v43 = vpack.c.bf16 %v1562_v41, %v1560_v40 }
 0x10b   : > { %6478 = vmatmul.msk.bf16.gmra.mxu3 %vm1740_vm1, %v1731_v43 }
 0x10d   : > { %v1375_v50 = vpop.f32.mrf.mxu0 }
 0x10e   : > { %v1564_v51 = vpop.f32.mrf.mxu1 }
 0x10f   : > { %v1565_v54 = vadd.f32 %v1564_v51, %v1375_v50  ;;  %v6251_v50 = vld [vmem:[#allocation3 + $0x108] sm:$0xf0] }
 0x110   : > { %1414 = vmatmul.bf16.gmra.mxu0 %v6210_v48  ;;  %v7822_v48 = vld [vmem:[#allocation3 + $0x104] sm:$0xf0] }
 0x111   : > { %1603 = vmatmul.bf16.gmra.mxu1 %v6214_v49  ;;  %v7821_v49 = vld [vmem:[#allocation3 + $0x104] sm:$0xf]  ;;  %v6250_v51 = vor.u32 %v7822_v48, %v6249_v47 }
 0x115   : > { %v1377_v52 = vpop.f32.mrf.mxu0 }
 0x116   : > { %v1566_v53 = vpop.f32.mrf.mxu1 }
 0x117   : > { %v1567_v55 = vadd.f32 %v1566_v53, %v1377_v52  ;;  %v6254_v52 = vor.u32 %v7821_v49, %v6251_v50 }
 0x119   : > { %v1732_v56 = vpack.c.bf16 %v1567_v55, %v1565_v54 }
 0x11b   : > { %6479 = vmatmul.msk.bf16.gmra.mxu3 %vm1740_vm1, %v1732_v56 }
 0x11d   : > { %v1380_v63 = vpop.f32.mrf.mxu0 }
 0x11e   : > { %v1569_v0 = vpop.f32.mrf.mxu1 }
 0x11f   : > { %v1570_v3 = vadd.f32 %v1569_v0, %v1380_v63  ;;  %v6259_v63 = vld [vmem:[#allocation3 + $0x118] sm:$0xf0] }
 0x120   : > { %1419 = vmatmul.bf16.gmra.mxu0 %v6218_v61  ;;  %v7824_v61 = vld [vmem:[#allocation3 + $0x114] sm:$0xf0] }
 0x121   : > { %1608 = vmatmul.bf16.gmra.mxu1 %v6222_v62  ;;  %v7823_v62 = vld [vmem:[#allocation3 + $0x114] sm:$0xf]  ;;  %v6258_v0 = vor.u32 %v7824_v61, %v6257_v60 }
 0x125   : > { %v1382_v1 = vpop.f32.mrf.mxu0 }
 0x126   : > { %v1571_v2 = vpop.f32.mrf.mxu1 }
 0x127   : > { %v1572_v4 = vadd.f32 %v1571_v2, %v1382_v1  ;;  %v6262_v1 = vor.u32 %v7823_v62, %v6259_v63 }
 0x129   : > { %v1734_v5 = vpack.c.bf16 %v1572_v4, %v1570_v3 }
 0x12b   : > { %6472 = vmatmul.msk.bf16.vlgmr.msra.gmra.mxu2 %vm1740_vm1, %v1734_v5 }
 0x12c   : > { %1974 = vmatpush.bf16.msra.mxu2 %v1965_v22 }
 0x12d   : > { %v1385_v12 = vpop.f32.mrf.mxu0 }
 0x12e   : > { %v1574_v13 = vpop.f32.mrf.mxu1 }
 0x12f   : > { %v1575_v16 = vadd.f32 %v1574_v13, %v1385_v12  ;;  %v6267_v12 = vld [vmem:[#allocation3 + $0x128] sm:$0xf0] }
 0x130   : > { %1424 = vmatmul.bf16.gmra.mxu0 %v6226_v10  ;;  %v7826_v10 = vld [vmem:[#allocation3 + $0x124] sm:$0xf0] }
 0x131   : > { %1613 = vmatmul.bf16.gmra.mxu1 %v6230_v11  ;;  %v7825_v11 = vld [vmem:[#allocation3 + $0x124] sm:$0xf]  ;;  %v6266_v13 = vor.u32 %v7826_v10, %v6265_v9 }
 0x135   : > { %v1387_v14 = vpop.f32.mrf.mxu0 }
 0x136   : > { %v1576_v15 = vpop.f32.mrf.mxu1 }
 0x137   : > { %v1577_v17 = vadd.f32 %v1576_v15, %v1387_v14  ;;  %v6270_v14 = vor.u32 %v7825_v11, %v6267_v12 }
 0x139   : > { %v1735_v18 = vpack.c.bf16 %v1577_v17, %v1575_v16 }
 0x13b   : > { %6473 = vmatmul.msk.bf16.gmra.mxu2 %vm1740_vm1, %v1735_v18 }
 0x13d   : > { %v1390_v25 = vpop.f32.mrf.mxu0 }
 0x13e   : > { %v1579_v26 = vpop.f32.mrf.mxu1 }
 0x13f   : > { %v1580_v30 = vadd.f32 %v1579_v26, %v1390_v25  ;;  %v7828_v25 = vld [vmem:[#allocation3 + $0x134] sm:$0xf0]  ;;  %v7827_v26 = vld [vmem:[#allocation3 + $0x134] sm:$0xf] }
 0x140   : > { %1429 = vmatmul.bf16.gmra.mxu0 %v6234_v23 }
 0x141   : > { %1618 = vmatmul.bf16.gmra.mxu1 %v6238_v24  ;;  %v6273_v24 = vld [vmem:[#allocation3 + $0x130] sm:$0xf] }
 0x145   : > { %v1392_v27 = vpop.f32.mrf.mxu0 }
 0x146   : > { %v1581_v28 = vpop.f32.mrf.mxu1 }
 0x147   : > { %v1582_v31 = vadd.f32 %v1581_v28, %v1392_v27  ;;  %v6275_v27 = vld [vmem:[#allocation3 + $0x138] sm:$0xf0]  ;;  %v6274_v28 = vor.u32 %v7828_v25, %v6273_v24  ;;  %v6305_v24 = vld [vmem:[#allocation3 + $0x170] sm:$0xf]  ;;  %v7836_v25 = vld [vmem:[#allocation3 + $0x174] sm:$0xf0] }
 0x148   : > { %v6278_v29 = vor.u32 %v7827_v26, %v6275_v27  ;;  %v7835_v26 = vld [vmem:[#allocation3 + $0x174] sm:$0xf]  ;;  %v6307_v27 = vld [vmem:[#allocation3 + $0x178] sm:$0xf0] }
 0x149   : > { %v1736_v33 = vpack.c.bf16 %v1582_v31, %v1580_v30 }
 0x14b   : > { %6474 = vmatmul.msk.bf16.gmra.mxu2 %vm1740_vm1, %v1736_v33 }
 0x14d   : > { %v1395_v40 = vpop.f32.mrf.mxu0 }
 0x14e   : > { %v1584_v41 = vpop.f32.mrf.mxu1 }
 0x14f   : > { %v1585_v44 = vadd.f32 %v1584_v41, %v1395_v40  ;;  %v6283_v40 = vld [vmem:[#allocation3 + $0x148] sm:$0xf0] }
 0x150   : > { %1434 = vmatmul.bf16.gmra.mxu0 %v6242_v38  ;;  %v7830_v38 = vld [vmem:[#allocation3 + $0x144] sm:$0xf0] }
 0x151   : > { %1623 = vmatmul.bf16.gmra.mxu1 %v6246_v39  ;;  %v7829_v39 = vld [vmem:[#allocation3 + $0x144] sm:$0xf]  ;;  %v6282_v41 = vor.u32 %v7830_v38, %v6281_v37 }
 0x155   : > { %v1397_v42 = vpop.f32.mrf.mxu0 }
 0x156   : > { %v1586_v43 = vpop.f32.mrf.mxu1 }
 0x157   : > { %v1587_v45 = vadd.f32 %v1586_v43, %v1397_v42  ;;  %v6286_v42 = vor.u32 %v7829_v39, %v6283_v40 }
 0x159   : > { %v1737_v46 = vpack.c.bf16 %v1587_v45, %v1585_v44 }
 0x15b   : > { %6475 = vmatmul.msk.bf16.gmra.mxu2 %vm1740_vm1, %v1737_v46 }
 0x15d   : > { %v1400_v53 = vpop.f32.mrf.mxu0 }
 0x15e   : > { %v1589_v54 = vpop.f32.mrf.mxu1 }
 0x15f   : > { %v1590_v57 = vadd.f32 %v1589_v54, %v1400_v53  ;;  %v7831_v53 = vld [vmem:[#allocation3 + $0x154] sm:$0xf]  ;;  %v6291_v54 = vld [vmem:[#allocation3 + $0x158] sm:$0xf0] }
 0x160   : > { %1439 = vmatmul.bf16.gmra.mxu0 %v6250_v51  ;;  %v6289_v51 = vld [vmem:[#allocation3 + $0x150] sm:$0xf] }
 0x161   : > { %1628 = vmatmul.bf16.gmra.mxu1 %v6254_v52  ;;  %v7832_v52 = vld [vmem:[#allocation3 + $0x154] sm:$0xf0] }
 0x165   : > { %v1402_v55 = vpop.f32.mrf.mxu0 }
 0x166   : > { %v1591_v56 = vpop.f32.mrf.mxu1 }
 0x167   : > { %v1592_v58 = vadd.f32 %v1591_v56, %v1402_v55  ;;  %v6290_v56 = vor.u32 %v7832_v52, %v6289_v51 }
 0x169   : > { %v1830_v59 = vpack.c.bf16 %v1592_v58, %v1590_v57  ;;  %v6294_v57 = vor.u32 %v7831_v53, %v6291_v54 }
 0x16b   : > { %6481 = vmatmul.msk.bf16.vlgmr.msrb.gmra.mxu2 %vm1740_vm1, %v1830_v59 }
 0x16d   : > { %v1405_v2 = vpop.f32.mrf.mxu0 }
 0x16e   : > { %v1594_v3 = vpop.f32.mrf.mxu1  ;;  %v1810_v45 = vpop.f32.mrf.mxu3 }
 0x16f   : > { %v1595_v6 = vadd.f32 %v1594_v3, %v1405_v2 }
 0x170   : > { %1444 = vmatmul.bf16.gmra.mxu0 %v6258_v0 }
 0x171   : > { %1633 = vmatmul.bf16.gmra.mxu1 %v6262_v1 }
 0x175   : > { %v1407_v4 = vpop.f32.mrf.mxu0 }
 0x176   : > { %v1596_v5 = vpop.f32.mrf.mxu1  ;;  %v8740_v55 = vpop.f32.mrf.mxu3 }
 0x177   : > { %v1597_v7 = vadd.f32 %v1596_v5, %v1407_v4  ;;  %v6297_v5 = vld [vmem:[#allocation3 + $0x160] sm:$0xf] }
 0x179   : > { %v1831_v8 = vpack.c.bf16 %v1597_v7, %v1595_v6  ;;  %v7834_v6 = vld [vmem:[#allocation3 + $0x164] sm:$0xf0]  ;;  %v7833_v7 = vld [vmem:[#allocation3 + $0x164] sm:$0xf] }
 0x17a   : > { %v6298_v9 = vor.u32 %v7834_v6, %v6297_v5 }
 0x17b   : > { %6482 = vmatmul.msk.bf16.gmra.mxu2 %vm1740_vm1, %v1831_v8  ;;  %v6299_v8 = vld [vmem:[#allocation3 + $0x168] sm:$0xf0] }
 0x17c   : > { %v6302_v10 = vor.u32 %v7833_v7, %v6299_v8 }
 0x17d   : > { %v1410_v15 = vpop.f32.mrf.mxu0 }
 0x17e   : > { %v1599_v16 = vpop.f32.mrf.mxu1  ;;  %v1815_v0 = vpop.f32.mrf.mxu3 }
 0x17f   : > { %v1600_v19 = vadd.f32 %v1599_v16, %v1410_v15 }
 0x180   : > { %1449 = vmatmul.bf16.gmra.mxu0 %v6266_v13 }
 0x181   : > { %1638 = vmatmul.bf16.gmra.mxu1 %v6270_v14 }
 0x185   : > { %v1412_v17 = vpop.f32.mrf.mxu0 }
 0x186   : > { %v1601_v18 = vpop.f32.mrf.mxu1  ;;  %v8749_v15 = vpop.f32.mrf.mxu3 }
 0x187   : > { %v1602_v20 = vadd.f32 %v1601_v18, %v1412_v17 }
 0x189   : > { %v1832_v23 = vpack.c.bf16 %v1602_v20, %v1600_v19 }
 0x18b   : > { %6483 = vmatmul.msk.bf16.gmra.mxu2 %vm1740_vm1, %v1832_v23 }
 0x18d   : > { %v1415_v30 = vpop.f32.mrf.mxu0 }
 0x18e   : > { %v1604_v31 = vpop.f32.mrf.mxu1 }
 0x18f   : > { %v1605_v34 = vadd.f32 %v1604_v31, %v1415_v30  ;;  %v6310_v30 = vor.u32 %v7835_v26, %v6307_v27 }
 0x190   : > { %1454 = vmatmul.bf16.gmra.mxu0 %v6274_v28  ;;  %v1820_v28 = vpop.f32.mrf.mxu3 }
 0x191   : > { %1643 = vmatmul.bf16.gmra.mxu1 %v6278_v29  ;;  %v6306_v29 = vor.u32 %v7836_v25, %v6305_v24 }
 0x195   : > { %v1417_v32 = vpop.f32.mrf.mxu0 }
 0x196   : > { %v1606_v33 = vpop.f32.mrf.mxu1 }
 0x197   : > { %v1607_v35 = vadd.f32 %v1606_v33, %v1417_v32 }
 0x199   : > { %v1833_v36 = vpack.c.bf16 %v1607_v35, %v1605_v34  ;;  %v8760_v35 = vpop.f32.mrf.mxu3 }
 0x19b   : > { %6484 = vmatmul.msk.bf16.gmra.mxu2 %vm1740_vm1, %v1833_v36 }
 0x19d   : > { %v1420_v43 = vpop.f32.mrf.mxu0 }
 0x19e   : > { %v1609_v44 = vpop.f32.mrf.mxu1 }
 0x19f   : > { %v1610_v48 = vadd.f32 %v1609_v44, %v1420_v43  ;;  %v7838_v43 = vld [vmem:[#allocation3 + $0x184] sm:$0xf0]  ;;  %v7837_v44 = vld [vmem:[#allocation3 + $0x184] sm:$0xf] }
 0x1a0   : > { %1459 = vmatmul.bf16.gmra.mxu0 %v6282_v41 }
 0x1a1   : > { %1648 = vmatmul.bf16.gmra.mxu1 %v6286_v42  ;;  %v6313_v42 = vld [vmem:[#allocation3 + $0x180] sm:$0xf] }
 0x1a5   : > { %v1422_v46 = vpop.f32.mrf.mxu0 }
 0x1a6   : > { %v1611_v47 = vpop.f32.mrf.mxu1 }
 0x1a7   : > { %v1612_v49 = vadd.f32 %v1611_v47, %v1422_v46  ;;  %v6314_v46 = vor.u32 %v7838_v43, %v6313_v42 }
 0x1a9   : > { %v1888_v50 = vpack.c.bf16 %v1612_v49, %v1610_v48 }
 0x1ab   : > { %6486 = vmatmul.msk.bf16.vlgmr.msrb.gmra.mxu3 %vm1740_vm1, %v1888_v50  ;;  %v1825_v50 = vpop.f32.mrf.mxu3 }
 0x1ad   : > { %v1425_v58 = vpop.f32.mrf.mxu0 }
 0x1ae   : > { %v1614_v59 = vpop.f32.mrf.mxu1  ;;  %v1766_v60 = vpop.f32.mrf.mxu2 }
 0x1af   : > { %v8742_v61 = vadd.f32 %v1810_v45, %v1766_v60  ;;  %v1615_v1 = vadd.f32 %v1614_v59, %v1425_v58  ;;  %v6315_v45 = vld [vmem:[#allocation3 + $0x188] sm:$0xf0]  ;;  %v6321_v60 = vld [vmem:[#allocation3 + $0x190] sm:$0xf] }
 0x1b0   : > { %1464 = vmatmul.bf16.gmra.mxu0 %v6290_v56  ;;  %v6318_v47 = vor.u32 %v7837_v44, %v6315_v45 }
 0x1b1   : > { %1653 = vmatmul.bf16.gmra.mxu1 %v6294_v57 }
 0x1b5   : > { %v1427_v62 = vpop.f32.mrf.mxu0 }
 0x1b6   : > { %v1616_v63 = vpop.f32.mrf.mxu1  ;;  %v8744_v3 = vpop.f32.mrf.mxu2 }
 0x1b7   : > { %v1617_v2 = vadd.f32 %v1616_v63, %v1427_v62  ;;  %v7840_v62 = vld [vmem:[#allocation3 + $0x194] sm:$0xf0]  ;;  %v7839_v63 = vld [vmem:[#allocation3 + $0x194] sm:$0xf] }
 0x1b9   : > { %v1889_v4 = vpack.c.bf16 %v1617_v2, %v1615_v1  ;;  %v6322_v1 = vor.u32 %v7840_v62, %v6321_v60 }
 0x1bb   : > { %6487 = vmatmul.msk.bf16.gmra.mxu3 %vm1740_vm1, %v1889_v4 }
 0x1bd   : > { %v1430_v11 = vpop.f32.mrf.mxu0 }
 0x1be   : > { %v1619_v12 = vpop.f32.mrf.mxu1  ;;  %v1771_v13 = vpop.f32.mrf.mxu2 }
 0x1bf   : > { %v8747_v14 = vadd.f32 %v1815_v0, %v1771_v13  ;;  %v1620_v18 = vadd.f32 %v1619_v12, %v1430_v11  ;;  %v6323_v0 = vld [vmem:[#allocation3 + $0x198] sm:$0xf0] }
 0x1c0   : > { %1469 = vmatmul.bf16.gmra.mxu0 %v6298_v9  ;;  %v6326_v2 = vor.u32 %v7839_v63, %v6323_v0 }
 0x1c1   : > { %1658 = vmatmul.bf16.gmra.mxu1 %v6302_v10 }
 0x1c5   : > { %v1432_v16 = vpop.f32.mrf.mxu0 }
 0x1c6   : > { %v1621_v17 = vpop.f32.mrf.mxu1  ;;  %v8751_v20 = vpop.f32.mrf.mxu2 }
 0x1c7   : > { %v1622_v19 = vadd.f32 %v1621_v17, %v1432_v16  ;;  %v6329_v16 = vld [vmem:[#allocation3 + $0x1a0] sm:$0xf]  ;;  %v7842_v17 = vld [vmem:[#allocation3 + $0x1a4] sm:$0xf0] }
 0x1c8   : > { %v6330_v21 = vor.u32 %v7842_v17, %v6329_v16 }
 0x1c9   : > { %v1890_v23 = vpack.c.bf16 %v1622_v19, %v1620_v18  ;;  %v7841_v18 = vld [vmem:[#allocation3 + $0x1a4] sm:$0xf]  ;;  %v6331_v19 = vld [vmem:[#allocation3 + $0x1a8] sm:$0xf0] }
 0x1ca   : > { %v6334_v22 = vor.u32 %v7841_v18, %v6331_v19 }
 0x1cb   : > { %6488 = vmatmul.msk.bf16.gmra.mxu3 %vm1740_vm1, %v1890_v23 }
 0x1cd   : > { %v1435_v31 = vpop.f32.mrf.mxu0 }
 0x1ce   : > { %v1624_v32 = vpop.f32.mrf.mxu1  ;;  %v1776_v33 = vpop.f32.mrf.mxu2 }
 0x1cf   : > { %v8758_v34 = vadd.f32 %v1820_v28, %v1776_v33  ;;  %v1625_v38 = vadd.f32 %v1624_v32, %v1435_v31  ;;  %v6495_v31 = vld [vmem:[%s9487_s22 + $0x14] sm:$0xf] }
 0x1d0   : > { %1474 = vmatmul.bf16.gmra.mxu0 %v6306_v29  ;;  %v2023_v32 = vsel %vm1753_vm0, %v6495_v31, 0  ;;  %v7849_v31 = vld [vmem:[#allocation3 + $0x1e4] sm:$0xf] }
 0x1d1   : > { %1663 = vmatmul.bf16.gmra.mxu1 %v6310_v30  ;;  %2032 = vmatpush.bf16.msra.mxu3 %v2023_v32  ;;  %v6363_v32 = vld [vmem:[#allocation3 + $0x1e8] sm:$0xf0] }
 0x1d5   : > { %v1437_v36 = vpop.f32.mrf.mxu0 }
 0x1d6   : > { %v1626_v37 = vpop.f32.mrf.mxu1  ;;  %v8762_v40 = vpop.f32.mrf.mxu2 }
 0x1d7   : > { %v1627_v39 = vadd.f32 %v1626_v37, %v1437_v36  ;;  %v6337_v36 = vld [vmem:[#allocation3 + $0x1b0] sm:$0xf]  ;;  %v7844_v37 = vld [vmem:[#allocation3 + $0x1b4] sm:$0xf0] }
 0x1d9   : > { %v1891_v41 = vpack.c.bf16 %v1627_v39, %v1625_v38  ;;  %v6339_v38 = vld [vmem:[#allocation3 + $0x1b8] sm:$0xf0]  ;;  %v6338_v39 = vor.u32 %v7844_v37, %v6337_v36  ;;  %v6366_v36 = vor.u32 %v7849_v31, %v6363_v32  ;;  %v7855_v31 = vld [vmem:[#allocation3 + $0x214] sm:$0xf] }
 0x1da   : > { %v6387_v32 = vld [vmem:[#allocation3 + $0x218] sm:$0xf0] }
 0x1db   : > { %6489 = vmatmul.msk.bf16.gmra.mxu3 %vm1740_vm1, %v1891_v41 }
 0x1dd   : > { %v1440_v48 = vpop.f32.mrf.mxu0 }
 0x1de   : > { %v1629_v49 = vpop.f32.mrf.mxu1  ;;  %v1781_v51 = vpop.f32.mrf.mxu2 }
 0x1df   : > { %v8765_v52 = vadd.f32 %v1825_v50, %v1781_v51  ;;  %v1630_v56 = vadd.f32 %v1629_v49, %v1440_v48 }
 0x1e0   : > { %1479 = vmatmul.bf16.gmra.mxu0 %v6314_v46 }
 0x1e1   : > { %1668 = vmatmul.bf16.gmra.mxu1 %v6318_v47 }
 0x1e5   : > { %v1442_v53 = vpop.f32.mrf.mxu0 }
 0x1e6   : > { %v1631_v54 = vpop.f32.mrf.mxu1  ;;  %v8767_v58 = vpop.f32.mrf.mxu2 }
 0x1e7   : > { %v1632_v57 = vadd.f32 %v1631_v54, %v1442_v53  ;;  %v6345_v53 = vld [vmem:[#allocation3 + $0x1c0] sm:$0xf]  ;;  %v7846_v54 = vld [vmem:[#allocation3 + $0x1c4] sm:$0xf0] }
 0x1e9   : > { %v1946_v59 = vpack.c.bf16 %v1632_v57, %v1630_v56  ;;  %v7845_v56 = vld [vmem:[#allocation3 + $0x1c4] sm:$0xf]  ;;  %v6347_v57 = vld [vmem:[#allocation3 + $0x1c8] sm:$0xf0] }
 0x1ea   : > { %v6350_v60 = vor.u32 %v7845_v56, %v6347_v57 }
 0x1eb   : > { %6491 = vmatmul.msk.bf16.vlgmr.msra.gmra.mxu2 %vm1740_vm1, %v1946_v59  ;;  %v6346_v59 = vor.u32 %v7846_v54, %v6345_v53  ;;  %v6371_v53 = vld [vmem:[#allocation3 + $0x1f8] sm:$0xf0] }
 0x1ed   : > { %v1445_v4 = vpop.f32.mrf.mxu0 }
 0x1ee   : > { %v1634_v5 = vpop.f32.mrf.mxu1  ;;  %v1860_v6 = vpop.f32.mrf.mxu2 }
 0x1ef   : > { %v8771_v7 = vadd.f32 %v1860_v6, %v8742_v61  ;;  %v1635_v10 = vadd.f32 %v1634_v5, %v1445_v4  ;;  %v8795_v4 = vpop.f32.mrf.mxu3 }
 0x1f0   : > { %1484 = vmatmul.bf16.gmra.mxu0 %v6322_v1 }
 0x1f1   : > { %1673 = vmatmul.bf16.gmra.mxu1 %v6326_v2 }
 0x1f5   : > { %v1447_v8 = vpop.f32.mrf.mxu0 }
 0x1f6   : > { %v1636_v9 = vpop.f32.mrf.mxu1  ;;  %v8773_v12 = vpop.f32.mrf.mxu2 }
 0x1f7   : > { %v1637_v11 = vadd.f32 %v1636_v9, %v1447_v8  ;;  %v6353_v9 = vld [vmem:[#allocation3 + $0x1d0] sm:$0xf] }
 0x1f9   : > { %v1947_v13 = vpack.c.bf16 %v1637_v11, %v1635_v10  ;;  %v7848_v10 = vld [vmem:[#allocation3 + $0x1d4] sm:$0xf0]  ;;  %v7847_v11 = vld [vmem:[#allocation3 + $0x1d4] sm:$0xf] }
 0x1fa   : > { %v6354_v16 = vor.u32 %v7848_v10, %v6353_v9  ;;  %v7854_v9 = vld [vmem:[#allocation3 + $0x204] sm:$0xf0]  ;;  %v7853_v10 = vld [vmem:[#allocation3 + $0x204] sm:$0xf] }
 0x1fb   : > { %6492 = vmatmul.msk.bf16.gmra.mxu2 %vm1740_vm1, %v1947_v13  ;;  %v6355_v13 = vld [vmem:[#allocation3 + $0x1d8] sm:$0xf0] }
 0x1fc   : > { %v6358_v17 = vor.u32 %v7847_v11, %v6355_v13  ;;  %v6379_v11 = vld [vmem:[#allocation3 + $0x208] sm:$0xf0] }
 0x1fd   : > { %v1450_v23 = vpop.f32.mrf.mxu0 }
 0x1fe   : > { %v1639_v61 = vpop.f32.mrf.mxu1  ;;  %v1865_v24 = vpop.f32.mrf.mxu2 }
 0x1ff   : > { %v8777_v25 = vadd.f32 %v1865_v24, %v8747_v14  ;;  %v1640_v28 = vadd.f32 %v1639_v61, %v1450_v23  ;;  %v7843_v14 = vld [vmem:[#allocation3 + $0x1b4] sm:$0xf] }
 0x200   : > { %1489 = vmatmul.bf16.gmra.mxu0 %v6330_v21  ;;  %v6342_v41 = vor.u32 %v7843_v14, %v6339_v38 }
 0x201   : > { %1678 = vmatmul.bf16.gmra.mxu1 %v6334_v22 }
 0x205   : > { %v1452_v26 = vpop.f32.mrf.mxu0 }
 0x206   : > { %v1641_v27 = vpop.f32.mrf.mxu1  ;;  %v8779_v30 = vpop.f32.mrf.mxu2 }
 0x207   : > { %v1642_v29 = vadd.f32 %v1641_v27, %v1452_v26 }
 0x209   : > { %v1948_v33 = vpack.c.bf16 %v1642_v29, %v1640_v28  ;;  %v6361_v28 = vld [vmem:[#allocation3 + $0x1e0] sm:$0xf]  ;;  %v7850_v29 = vld [vmem:[#allocation3 + $0x1e4] sm:$0xf0] }
 0x20b   : > { %6493 = vmatmul.msk.bf16.gmra.mxu2 %vm1740_vm1, %v1948_v33  ;;  %v6362_v33 = vor.u32 %v7850_v29, %v6361_v28  ;;  %v6385_v28 = vld [vmem:[#allocation3 + $0x210] sm:$0xf]  ;;  %v7856_v29 = vld [vmem:[#allocation3 + $0x214] sm:$0xf0] }
 0x20d   : > { %v1455_v42 = vpop.f32.mrf.mxu0 }
 0x20e   : > { %v1644_v43 = vpop.f32.mrf.mxu1  ;;  %v1870_v44 = vpop.f32.mrf.mxu2 }
 0x20f   : > { %v8787_v45 = vadd.f32 %v1870_v44, %v8758_v34  ;;  %v1645_v48 = vadd.f32 %v1644_v43, %v1455_v42 }
 0x210   : > { %1494 = vmatmul.bf16.gmra.mxu0 %v6338_v39 }
 0x211   : > { %1683 = vmatmul.bf16.gmra.mxu1 %v6342_v41 }
 0x215   : > { %v1457_v46 = vpop.f32.mrf.mxu0 }
 0x216   : > { %v1646_v47 = vpop.f32.mrf.mxu1  ;;  %v8789_v50 = vpop.f32.mrf.mxu2 }
 0x217   : > { %v1647_v49 = vadd.f32 %v1646_v47, %v1457_v46  ;;  %v6500_v46 = vld [vmem:[%s9487_s22 + $0x18] sm:$0xf] }
 0x218   : > { %v2081_v47 = vsel %vm1753_vm0, %v6500_v46, 0 }
 0x219   : > { %v1949_v51 = vpack.c.bf16 %v1647_v49, %v1645_v48  ;;  %v6369_v49 = vld [vmem:[#allocation3 + $0x1f0] sm:$0xf]  ;;  %2090 = vmatpush.bf16.msrb.mxu2 %v2081_v47 }
 0x21b   : > { %6494 = vmatmul.msk.bf16.gmra.mxu2 %vm1740_vm1, %v1949_v51  ;;  %v7852_v51 = vld [vmem:[#allocation3 + $0x1f4] sm:$0xf0] }
 0x21c   : > { %v6370_v54 = vor.u32 %v7852_v51, %v6369_v49  ;;  %v7858_v49 = vld [vmem:[#allocation3 + $0x224] sm:$0xf0]  ;;  %v7857_v51 = vld [vmem:[#allocation3 + $0x224] sm:$0xf] }
 0x21d   : > { %v1460_v62 = vpop.f32.mrf.mxu0 }
 0x21e   : > { %v1649_v34 = vpop.f32.mrf.mxu1  ;;  %v1875_v63 = vpop.f32.mrf.mxu2 }
 0x21f   : > { %v8793_v0 = vadd.f32 %v1875_v63, %v8765_v52  ;;  %v1650_v5 = vadd.f32 %v1649_v34, %v1460_v62 }
 0x220   : > { %1499 = vmatmul.bf16.gmra.mxu0 %v6346_v59 }
 0x221   : > { %1688 = vmatmul.bf16.gmra.mxu1 %v6350_v60 }
 0x225   : > { %v1462_v1 = vpop.f32.mrf.mxu0 }
 0x226   : > { %v1651_v2 = vpop.f32.mrf.mxu1 }
 0x227   : > { %v1652_v6 = vadd.f32 %v1651_v2, %v1462_v1 }
 0x229   : > { %v2004_v8 = vpack.c.bf16 %v1652_v6, %v1650_v5 }
 0x22b   : > { %6496 = vmatmul.msk.bf16.vlgmr.msra.gmra.mxu3 %vm1740_vm1, %v2004_v8  ;;  %v6377_v8 = vld [vmem:[#allocation3 + $0x200] sm:$0xf] }
 0x22c   : > { %v6378_v13 = vor.u32 %v7854_v9, %v6377_v8 }
 0x22d   : > { %v1465_v18 = vpop.f32.mrf.mxu0 }
 0x22e   : > { %v1654_v52 = vpop.f32.mrf.mxu1  ;;  %v1918_v19 = vpop.f32.mrf.mxu3 }
 0x22f   : > { %v8799_v21 = vadd.f32 %v1918_v19, %v8771_v7  ;;  %v1655_v61 = vadd.f32 %v1654_v52, %v1465_v18 }
 0x230   : > { %1504 = vmatmul.bf16.gmra.mxu0 %v6354_v16  ;;  %v6382_v16 = vor.u32 %v7853_v10, %v6379_v11  ;;  %v6401_v10 = vld [vmem:[#allocation3 + $0x230] sm:$0xf]  ;;  %v7860_v11 = vld [vmem:[#allocation3 + $0x234] sm:$0xf0] }
 0x231   : > { %1693 = vmatmul.bf16.gmra.mxu1 %v6358_v17 }
 0x235   : > { %v1467_v22 = vpop.f32.mrf.mxu0 }
 0x236   : > { %v1656_v23 = vpop.f32.mrf.mxu1  ;;  %v8801_v26 = vpop.f32.mrf.mxu3 }
 0x237   : > { %v1657_v24 = vadd.f32 %v1656_v23, %v1467_v22  ;;  %v8823_v23 = vpop.f32.mrf.mxu2 }
 0x239   : > { %v2005_v27 = vpack.c.bf16 %v1657_v24, %v1655_v61 }
 0x23b   : > { %6497 = vmatmul.msk.bf16.gmra.mxu3 %vm1740_vm1, %v2005_v27 }
 0x23d   : > { %v1470_v37 = vpop.f32.mrf.mxu0 }
 0x23e   : > { %v1659_v7 = vpop.f32.mrf.mxu1  ;;  %v1923_v14 = vpop.f32.mrf.mxu3 }
 0x23f   : > { %v8805_v38 = vadd.f32 %v1923_v14, %v8777_v25  ;;  %v1660_v42 = vadd.f32 %v1659_v7, %v1470_v37  ;;  %v7851_v25 = vld [vmem:[#allocation3 + $0x1f4] sm:$0xf] }
 0x240   : > { %1509 = vmatmul.bf16.gmra.mxu0 %v6362_v33  ;;  %v6374_v56 = vor.u32 %v7851_v25, %v6371_v53  ;;  %v6386_v33 = vor.u32 %v7856_v29, %v6385_v28  ;;  %v6395_v25 = vld [vmem:[#allocation3 + $0x228] sm:$0xf0] }
 0x241   : > { %1698 = vmatmul.bf16.gmra.mxu1 %v6366_v36  ;;  %v6390_v36 = vor.u32 %v7855_v31, %v6387_v32 }
 0x245   : > { %v1472_v39 = vpop.f32.mrf.mxu0 }
 0x246   : > { %v1661_v41 = vpop.f32.mrf.mxu1  ;;  %v8807_v44 = vpop.f32.mrf.mxu3 }
 0x247   : > { %v1662_v43 = vadd.f32 %v1661_v41, %v1472_v39 }
 0x249   : > { %v2006_v48 = vpack.c.bf16 %v1662_v43, %v1660_v42 }
 0x24b   : > { %6498 = vmatmul.msk.bf16.gmra.mxu3 %vm1740_vm1, %v2006_v48  ;;  %v6393_v48 = vld [vmem:[#allocation3 + $0x220] sm:$0xf] }
 0x24c   : > { %v6394_v53 = vor.u32 %v7858_v49, %v6393_v48 }
 0x24d   : > { %v1475_v57 = vpop.f32.mrf.mxu0 }
 0x24e   : > { %v1664_v59 = vpop.f32.mrf.mxu1  ;;  %v1928_v60 = vpop.f32.mrf.mxu3 }
 0x24f   : > { %v8815_v62 = vadd.f32 %v1928_v60, %v8787_v45  ;;  %v1665_v1 = vadd.f32 %v1664_v59, %v1475_v57 }
 0x250   : > { %1514 = vmatmul.bf16.gmra.mxu0 %v6370_v54  ;;  %v6398_v54 = vor.u32 %v7857_v51, %v6395_v25 }
 0x251   : > { %1703 = vmatmul.bf16.gmra.mxu1 %v6374_v56 }
 0x255   : > { %v1477_v34 = vpop.f32.mrf.mxu0 }
 0x256   : > { %v1666_v63 = vpop.f32.mrf.mxu1  ;;  %v8817_v5 = vpop.f32.mrf.mxu3 }
 0x257   : > { %v1667_v2 = vadd.f32 %v1666_v63, %v1477_v34 }
 0x259   : > { %v2007_v6 = vpack.c.bf16 %v1667_v2, %v1665_v1 }
 0x25b   : > { %6499 = vmatmul.msk.bf16.gmra.mxu3 %vm1740_vm1, %v2007_v6  ;;  %v6505_v6 = vld [vmem:[%s9487_s22 + $0x1c] sm:$0xf] }
 0x25c   : > { %v2139_v8 = vsel %vm1753_vm0, %v6505_v6, 0 }
 0x25d   : > { %v1480_v17 = vpop.f32.mrf.mxu0  ;;  %2148 = vmatpush.bf16.msrb.mxu3 %v2139_v8 }
 0x25e   : > { %v1669_v45 = vpop.f32.mrf.mxu1  ;;  %v1933_v18 = vpop.f32.mrf.mxu3 }
 0x25f   : > { %v8821_v52 = vadd.f32 %v1933_v18, %v8793_v0  ;;  %v1670_v61 = vadd.f32 %v1669_v45, %v1480_v17 }
 0x260   : > { %1519 = vmatmul.bf16.gmra.mxu0 %v6378_v13  ;;  %v7859_v13 = vld [vmem:[#allocation3 + $0x234] sm:$0xf] }
 0x261   : > { %1708 = vmatmul.bf16.gmra.mxu1 %v6382_v16  ;;  %v6402_v16 = vor.u32 %v7860_v11, %v6401_v10 }
 0x265   : > { %v1482_v19 = vpop.f32.mrf.mxu0 }
 0x266   : > { %v1671_v22 = vpop.f32.mrf.mxu1 }
 0x267   : > { %v1672_v24 = vadd.f32 %v1671_v22, %v1482_v19 }
 0x269   : > { %v2062_v27 = vpack.c.bf16 %v1672_v24, %v1670_v61 }
 0x26b   : > { %6501 = vmatmul.msk.bf16.vlgmr.msrb.gmra.mxu2 %vm1740_vm1, %v2062_v27 }
 0x26d   : > { %v1485_v37 = vpop.f32.mrf.mxu0 }
 0x26e   : > { %v1674_v0 = vpop.f32.mrf.mxu1  ;;  %v1976_v7 = vpop.f32.mrf.mxu2 }
 0x26f   : > { %v8827_v14 = vadd.f32 %v1976_v7, %v8799_v21  ;;  %v1675_v42 = vadd.f32 %v1674_v0, %v1485_v37 }
 0x270   : > { %1524 = vmatmul.bf16.gmra.mxu0 %v6386_v33 }
 0x271   : > { %1713 = vmatmul.bf16.gmra.mxu1 %v6390_v36 }
 0x275   : > { %v1487_v39 = vpop.f32.mrf.mxu0 }
 0x276   : > { %v1676_v41 = vpop.f32.mrf.mxu1  ;;  %v8829_v46 = vpop.f32.mrf.mxu2 }
 0x277   : > { %v1677_v43 = vadd.f32 %v1676_v41, %v1487_v39  ;;  %v8845_v39 = vpop.f32.mrf.mxu3 }
 0x279   : > { %v2063_v47 = vpack.c.bf16 %v1677_v43, %v1675_v42 }
 0x27b   : > { %6502 = vmatmul.msk.bf16.gmra.mxu2 %vm1740_vm1, %v2063_v47 }
 0x27d   : > { %v1490_v56 = vpop.f32.mrf.mxu0 }
 0x27e   : > { %v1679_v21 = vpop.f32.mrf.mxu1  ;;  %v1981_v57 = vpop.f32.mrf.mxu2 }
 0x27f   : > { %v1998_v59 = vadd.f32 %v1981_v57, %v8805_v38  ;;  %v1680_v63 = vadd.f32 %v1679_v21, %v1490_v56  ;;  %v6403_v38 = vld [vmem:[#allocation3 + $0x238] sm:$0xf0] }
 0x280   : > { %1529 = vmatmul.bf16.gmra.mxu0 %v6394_v53  ;;  %v6406_v17 = vor.u32 %v7859_v13, %v6403_v38 }
 0x281   : > { %1718 = vmatmul.bf16.gmra.mxu1 %v6398_v54 }
 0x285   : > { %v1492_v60 = vpop.f32.mrf.mxu0 }
 0x286   : > { %v1681_v34 = vpop.f32.mrf.mxu1  ;;  %v8833_v2 = vpop.f32.mrf.mxu2 }
 0x287   : > { %v1682_v1 = vadd.f32 %v1681_v34, %v1492_v60 }
 0x289   : > { %v2064_v9 = vpack.c.bf16 %v1682_v1, %v1680_v63 }
 0x28b   : > { %6503 = vmatmul.msk.bf16.gmra.mxu2 %vm1740_vm1, %v2064_v9 }
 0x28d   : > { %v1495_v45 = vpop.f32.mrf.mxu0 }
 0x28e   : > { %v1684_v18 = vpop.f32.mrf.mxu1  ;;  %v1986_v19 = vpop.f32.mrf.mxu2 }
 0x28f   : > { %v2000_v22 = vadd.f32 %v1986_v19, %v8815_v62  ;;  %v1685_v27 = vadd.f32 %v1684_v18, %v1495_v45 }
 0x290   : > { %1534 = vmatmul.bf16.gmra.mxu0 %v6402_v16 }
 0x291   : > { %1723 = vmatmul.bf16.gmra.mxu1 %v6406_v17 }
 0x295   : > { %v1497_v61 = vpop.f32.mrf.mxu0 }
 0x296   : > { %v1686_v24 = vpop.f32.mrf.mxu1  ;;  %v8841_v29 = vpop.f32.mrf.mxu2 }
 0x297   : > { %v1687_v28 = vadd.f32 %v1686_v24, %v1497_v61 }
 0x299   : > { %v2065_v31 = vpack.c.bf16 %v1687_v28, %v1685_v27 }
 0x29b   : > { %6504 = vmatmul.msk.bf16.gmra.mxu2 %vm1740_vm1, %v2065_v31 }
 0x29d   : > { %v1500_v32 = vpop.f32.mrf.mxu0 }
 0x29e   : > { %v1689_v33 = vpop.f32.mrf.mxu1  ;;  %v1991_v36 = vpop.f32.mrf.mxu2 }
 0x29f   : > { %v2002_v37 = vadd.f32 %v1991_v36, %v8821_v52  ;;  %v1690_v62 = vadd.f32 %v1689_v33, %v1500_v32 }
 0x2a5   : > { %v1502_v0 = vpop.f32.mrf.mxu0 }
 0x2a6   : > { %v1691_v7 = vpop.f32.mrf.mxu1 }
 0x2a7   : > { %v1692_v41 = vadd.f32 %v1691_v7, %v1502_v0  ;;  %v8862_v0 = vpop.f32.mrf.mxu2 }
 0x2a9   : > { %v2120_v42 = vpack.c.bf16 %v1692_v41, %v1690_v62 }
 0x2ab   : > { %6506 = vmatmul.msk.bf16.vlgmr.msrb.gmra.mxu3 %vm1740_vm1, %v2120_v42 }
 0x2ad   : > { %v1505_v43 = vpop.f32.mrf.mxu0 }
 0x2ae   : > { %v1694_v47 = vpop.f32.mrf.mxu1  ;;  %v2034_v48 = vpop.f32.mrf.mxu3 }
 0x2af   : > { %v2054_v49 = vadd.f32 %v2034_v48, %v8827_v14  ;;  %v1695_v53 = vadd.f32 %v1694_v47, %v1505_v43  ;;  %v6510_v14 = vld [vmem:[%s9487_s22 + $0x20] sm:$0xf] }
 0x2b0   : > { %v2197_v10 = vsel %vm1753_vm0, %v6510_v14, 0 }
 0x2b1   : > { %2206 = vmatpush.bf16.msra.mxu2 %v2197_v10 }
 0x2b5   : > { %v1507_v51 = vpop.f32.mrf.mxu0 }
 0x2b6   : > { %v1696_v25 = vpop.f32.mrf.mxu1  ;;  %v8849_v56 = vpop.f32.mrf.mxu3 }
 0x2b7   : > { %v1697_v54 = vadd.f32 %v1696_v25, %v1507_v51 }
 0x2b9   : > { %v2121_v52 = vpack.c.bf16 %v1697_v54, %v1695_v53 }
 0x2bb   : > { %6507 = vmatmul.msk.bf16.gmra.mxu3 %vm1740_vm1, %v2121_v52 }
 0x2bd   : > { %v1510_v21 = vpop.f32.mrf.mxu0 }
 0x2be   : > { %v1699_v57 = vpop.f32.mrf.mxu1  ;;  %v2039_v60 = vpop.f32.mrf.mxu3 }
 0x2bf   : > { %v2056_v34 = vadd.f32 %v2039_v60, %v1998_v59  ;;  %v1700_v6 = vadd.f32 %v1699_v57, %v1510_v21 }
 0x2c5   : > { %v1512_v63 = vpop.f32.mrf.mxu0 }
 0x2c6   : > { %v1701_v1 = vpop.f32.mrf.mxu1  ;;  %v8852_v9 = vpop.f32.mrf.mxu3 }
 0x2c7   : > { %v1702_v8 = vadd.f32 %v1701_v1, %v1512_v63 }
 0x2c9   : > { %v2122_v11 = vpack.c.bf16 %v1702_v8, %v1700_v6 }
 0x2cb   : > { %6508 = vmatmul.msk.bf16.gmra.mxu3 %vm1740_vm1, %v2122_v11 }
 0x2cd   : > { %v1515_v13 = vpop.f32.mrf.mxu0 }
 0x2ce   : > { %v1704_v38 = vpop.f32.mrf.mxu1  ;;  %v2044_v16 = vpop.f32.mrf.mxu3 }
 0x2cf   : > { %v2058_v59 = vadd.f32 %v2044_v16, %v2000_v22  ;;  %v1705_v18 = vadd.f32 %v1704_v38, %v1515_v13 }
 0x2d5   : > { %v1517_v17 = vpop.f32.mrf.mxu0 }
 0x2d6   : > { %v1706_v45 = vpop.f32.mrf.mxu1  ;;  %v8859_v61 = vpop.f32.mrf.mxu3 }
 0x2d7   : > { %v1707_v19 = vadd.f32 %v1706_v45, %v1517_v17 }
 0x2d9   : > { %v2123_v24 = vpack.c.bf16 %v1707_v19, %v1705_v18 }
 0x2db   : > { %6509 = vmatmul.msk.bf16.gmra.mxu3 %vm1740_vm1, %v2123_v24 }
 0x2dd   : > { %v1520_v27 = vpop.f32.mrf.mxu0 }
 0x2de   : > { %v1709_v28 = vpop.f32.mrf.mxu1  ;;  %v2049_v31 = vpop.f32.mrf.mxu3 }
 0x2df   : > { %v2060_v32 = vadd.f32 %v2049_v31, %v2002_v37  ;;  %v1710_v7 = vadd.f32 %v1709_v28, %v1520_v27 }
 0x2e5   : > { %v1522_v33 = vpop.f32.mrf.mxu0 }
 0x2e6   : > { %v1711_v36 = vpop.f32.mrf.mxu1  ;;  %v2051_v28 = vpop.f32.mrf.mxu3 }
 0x2e7   : > { %v1712_v62 = vadd.f32 %v1711_v36, %v1522_v33 }
 0x2e9   : > { %v2178_v22 = vpack.c.bf16 %v1712_v62, %v1710_v7 }
 0x2eb   : > { %6511 = vmatmul.msk.bf16.vlgmr.msra.gmra.mxu2 %vm1740_vm1, %v2178_v22 }
 0x2ed   : > { %v1525_v41 = vpop.f32.mrf.mxu0 }
 0x2ee   : > { %v1714_v42 = vpop.f32.mrf.mxu1  ;;  %v2092_v43 = vpop.f32.mrf.mxu2 }
 0x2ef   : > { %v2112_v47 = vadd.f32 %v2092_v43, %v2054_v49  ;;  %v1715_v25 = vadd.f32 %v1714_v42, %v1525_v41 }
 0x2f5   : > { %v1527_v48 = vpop.f32.mrf.mxu0 }
 0x2f6   : > { %v1716_v51 = vpop.f32.mrf.mxu1  ;;  %v8865_v54 = vpop.f32.mrf.mxu2 }
 0x2f7   : > { %v1717_v53 = vadd.f32 %v1716_v51, %v1527_v48 }
 0x2f9   : > { %v2179_v37 = vpack.c.bf16 %v1717_v53, %v1715_v25 }
 0x2fb   : > { %6512 = vmatmul.msk.bf16.gmra.mxu2 %vm1740_vm1, %v2179_v37  ;;  %v1823_v37 = vadd.f32 %v8760_v35, %v8762_v40  ;;  %v1813_v35 = vadd.f32 %v8740_v55, %v8744_v3 }
 0x2fd   : > { %v1530_v52 = vpop.f32.mrf.mxu0 }
 0x2fe   : > { %v1719_v21 = vpop.f32.mrf.mxu1  ;;  %v2097_v57 = vpop.f32.mrf.mxu2 }
 0x2ff   : > { %v8868_v60 = vadd.f32 %v2097_v57, %v2056_v34  ;;  %v1720_v6 = vadd.f32 %v1719_v21, %v1530_v52  ;;  %v1885_v52 = vadd.f32 %v8789_v50, %v1823_v37  ;;  %v1818_v21 = vadd.f32 %v8749_v15, %v8751_v20 }
 0x300   : > { %v1828_v57 = vadd.f32 %v8795_v4, %v8767_v58  ;;  %v1881_v20 = vadd.f32 %v8773_v12, %v1813_v35  ;;  %v7863_v35 = vld [vmem:[#allocation5 + $0x10] sm:$0xff] }
 0x305   : > { %v1532_v63 = vpop.f32.mrf.mxu0 }
 0x306   : > { %v1721_v1 = vpop.f32.mrf.mxu1  ;;  %v2099_v14 = vpop.f32.mrf.mxu2 }
 0x307   : > { %v1722_v8 = vadd.f32 %v1721_v1, %v1532_v63  ;;  %v1943_v63 = vadd.f32 %v8817_v5, %v1885_v52  ;;  %v1883_v1 = vadd.f32 %v8779_v30, %v1818_v21 }
 0x309   : > { %v2180_v49 = vpack.c.bf16 %v1722_v8, %v1720_v6  ;;  %v1887_v6 = vadd.f32 %v8823_v23, %v1828_v57  ;;  %v2001_v8 = vadd.f32 %v8841_v29, %v1943_v63  ;;  %v1941_v40 = vadd.f32 %v8807_v44, %v1883_v1 }
 0x30a   : > { %v1939_v29 = vadd.f32 %v8801_v26, %v1881_v20  ;;  %v7867_v20 = vld [vmem:[#allocation5 + $0x30] sm:$0xff] }
 0x30b   : > { %6513 = vmatmul.msk.bf16.gmra.mxu2 %vm1740_vm1, %v2180_v49  ;;  %v1945_v50 = vadd.f32 %v8845_v39, %v1887_v6  ;;  %v2059_v15 = vadd.f32 %v8859_v61, %v2001_v8  ;;  %v1999_v4 = vadd.f32 %v8833_v2, %v1941_v40  ;;  %v8196_v2 = vld [vmem:[%s9488_s26] ss:$0 sm:$0xff]  ;;  %v7861_v8 = vld [vmem:[#allocation5] sm:$0xff] }
 0x30c   : > { %v1997_v39 = vadd.f32 %v8829_v46, %v1939_v29  ;;  %v7864_v40 = vld [vmem:[#allocation5 + $0x18] sm:$0xff] }
 0x30d   : > { %v1535_v10 = vpop.f32.mrf.mxu0  ;;  %v2003_v30 = vadd.f32 %v8862_v0, %v1945_v50  ;;  %v2057_v49 = vadd.f32 %v8852_v9, %v1999_v4  ;;  %v7865_v50 = vld [vmem:[#allocation5 + $0x20] sm:$0xff] }
 0x30e   : > { %v1724_v11 = vpop.f32.mrf.mxu1  ;;  %v2102_v13 = vpop.f32.mrf.mxu2  ;;  %v7869_v4 = vld [vmem:[#allocation5 + $0x40] sm:$0xff] }
 0x30f   : > { %v2116_v38 = vadd.f32 %v2102_v13, %v2058_v59  ;;  %v1725_v45 = vadd.f32 %v1724_v11, %v1535_v10  ;;  %v2061_v55 = vadd.f32 %v2051_v28, %v2003_v30  ;;  %v2115_v61 = vadd.f32 %v2099_v14, %v2057_v49  ;;  %v7908_v30 = vld [vmem:[%s9489_s30 + $0x58] sm:$0xff]  ;;  %v7870_v49 = vld [vmem:[#allocation5 + $0x48] sm:$0xff] }
 0x310   : > { %v2055_v13 = vadd.f32 %v8849_v56, %v1997_v39  ;;  %3199 = vmatpush.bf16.msrb.mxu0 %v7908_v30  ;;  %v7871_v39 = vld [vmem:[#allocation5 + $0x50] sm:$0xff] }
 0x315   : > { %v1537_v16 = vpop.f32.mrf.mxu0 }
 0x316   : > { %v1726_v17 = vpop.f32.mrf.mxu1  ;;  %v2104_v19 = vpop.f32.mrf.mxu2 }
 0x317   : > { %v1727_v18 = vadd.f32 %v1726_v17, %v1537_v16  ;;  %v2117_v5 = vadd.f32 %v2104_v19, %v2059_v15  ;;  %v7866_v15 = vld [vmem:[#allocation5 + $0x28] sm:$0xff] }
 0x319   : > { %v2181_v24 = vpack.c.bf16 %v1727_v18, %v1725_v45  ;;  %v2113_v45 = vadd.f32 %v8865_v54, %v2055_v13 }
 0x31b   : > { %6514 = vmatmul.msk.bf16.gmra.mxu2 %vm1740_vm1, %v2181_v24 }
 0x31e   : > { %v2107_v34 = vpop.f32.mrf.mxu2 }
 0x31f   : > { %v2118_v27 = vadd.f32 %v2107_v34, %v2060_v32 }
 0x326   : > { %v2109_v36 = vpop.f32.mrf.mxu2 }
 0x327   : > { %v2119_v11 = vadd.f32 %v2109_v36, %v2061_v55 }
 0x32e   : > { %v2150_v31 = vpop.f32.mrf.mxu3 }
 0x32f   : > { %v2170_v33 = vadd.f32 %v2150_v31, %v2112_v47 }
 0x336   : > { %v2152_v7 = vpop.f32.mrf.mxu3 }
 0x33e   : > { %v2155_v41 = vpop.f32.mrf.mxu3 }
 0x33f   : > { %v2172_v46 = vadd.f32 %v2155_v41, %v8868_v60 }
 0x346   : > { %v2157_v42 = vpop.f32.mrf.mxu3 }
 0x347   : > { %v2173_v16 = vadd.f32 %v2157_v42, %v2115_v61  ;;  %v7900_v61 = vld [vmem:[%s9489_s30 + $0x18] sm:$0xff] }
 0x348   : > { %2874 = vmatpush.bf16.msrb.mxu2 %v7900_v61 }
 0x34e   : > { %v2160_v48 = vpop.f32.mrf.mxu3 }
 0x34f   : > { %v2174_v12 = vadd.f32 %v2160_v48, %v2116_v38  ;;  %v2171_v38 = vadd.f32 %v2152_v7, %v2113_v45 }
 0x356   : > { %v2162_v25 = vpop.f32.mrf.mxu3 }
 0x357   : > { %v2175_v3 = vadd.f32 %v2162_v25, %v2117_v5 }
 0x35e   : > { %v2165_v47 = vpop.f32.mrf.mxu3 }
 0x35f   : > { %v2176_v23 = vadd.f32 %v2165_v47, %v2118_v27 }
 0x366   : > { %v2167_v10 = vpop.f32.mrf.mxu3 }
 0x367   : > { %v2177_v26 = vadd.f32 %v2167_v10, %v2119_v11  ;;  %v7899_v11 = vld [vmem:[%s9489_s30 + $0x10] sm:$0xff] }
 0x368   : > { %2875 = vmatpush.bf16.msrb.mxu2 %v7899_v11 }
 0x36e   : > { %v2208_v62 = vpop.f32.mrf.mxu2 }
 0x36f   : > { %v8872_v22 = vadd.f32 %v2208_v62, %v2170_v33 }
 0x376   : > { %v2210_v59 = vpop.f32.mrf.mxu2 }
 0x377   : > { %v2229_v33 = vadd.f32 %v2210_v59, %v2171_v38 }
 0x379   : > { %v2241_v41 = vadd.f32 %v8196_v2, %v2229_v33 }
 0x37b   : > { %vm2249_vm8 = vcmp.ge.f32.partialorder %v2241_v41, 0.0 }
 0x37e   : > { %v2213_v43 = vpop.f32.mrf.mxu2 }
 0x37f   : > { %v2230_v34 = vadd.f32 %v2213_v43, %v2172_v46  ;;  %v2240_v43 = vadd.f32 %v8196_v2, %v8872_v22  ;;  %v7862_v22 = vld [vmem:[#allocation5 + $0x8] sm:$0xff] }
 0x381   : > { %v2242_v42 = vadd.f32 %v8196_v2, %v2230_v34  ;;  %v2256_v47 = vmul.f32 0.2, %v2240_v43  ;;  %vm2248_vm9 = vcmp.ge.f32.partialorder %v2240_v43, 0.0  ;;  %v7875_v34 = vld [vmem:[#allocation5 + $0x70] sm:$0xff] }
 0x383   : > { %v2258_v59 = vmul.f32 0.2, %v2242_v42  ;;  %vm2250_vm7 = vcmp.ge.f32.partialorder %v2242_v42, 0.0  ;;  %v2264_v1 = vsel %vm2248_vm9, %v2240_v43, %v2256_v47 }
 0x385   : > { %v2266_v21 = vsel %vm2250_vm7, %v2242_v42, %v2258_v59 }
 0x386   : > { %v2215_v51 = vpop.f32.mrf.mxu2 }
 0x387   : > { %v2231_v19 = vadd.f32 %v2215_v51, %v2173_v16  ;;  %v7910_v16 = vld [vmem:[%s9489_s30 + $0x68] sm:$0xff] }
 0x388   : > { %3269 = vmatpush.bf16.msrb.mxu1 %v7910_v16 }
 0x389   : > { %v2243_v56 = vadd.f32 %v8196_v2, %v2231_v19  ;;  %v7874_v19 = vld [vmem:[#allocation5 + $0x68] sm:$0xff] }
 0x38b   : > { %v2259_v51 = vmul.f32 0.2, %v2243_v56  ;;  %vm2251_vm6 = vcmp.ge.f32.partialorder %v2243_v56, 0.0 }
 0x38d   : > { %v2267_v52 = vsel %vm2251_vm6, %v2243_v56, %v2259_v51  ;;  %v7878_v51 = vld [vmem:[#allocation5 + $0x88] sm:$0xff] }
 0x38e   : > { %v2218_v53 = vpop.f32.mrf.mxu2  ;;  %v2273_v57 = vpack.c.bf16 %v2267_v52, %v2266_v21  ;;  %v7901_v52 = vld [vmem:[%s9489_s30 + $0x20] sm:$0xff] }
 0x38f   : > { %v2232_v17 = vadd.f32 %v2218_v53, %v2174_v12 }
 0x391   : > { %v2244_v27 = vadd.f32 %v8196_v2, %v2232_v17 }
 0x393   : > { %v2260_v54 = vmul.f32 0.2, %v2244_v27  ;;  %vm2252_vm5 = vcmp.ge.f32.partialorder %v2244_v27, 0.0 }
 0x395   : > { %v2268_v53 = vsel %vm2252_vm5, %v2244_v27, %v2260_v54 }
 0x396   : > { %v2220_v32 = vpop.f32.mrf.mxu2 }
 0x397   : > { %v2233_v0 = vadd.f32 %v2220_v32, %v2175_v3  ;;  %v2257_v32 = vmul.f32 0.2, %v2241_v41 }
 0x399   : > { %v2245_v14 = vadd.f32 %v8196_v2, %v2233_v0  ;;  %v2265_v63 = vsel %vm2249_vm8, %v2241_v41, %v2257_v32  ;;  %v7872_v0 = vld [vmem:[#allocation5 + $0x58] sm:$0xff]  ;;  %v7902_v32 = vld [vmem:[%s9489_s30 + $0x28] sm:$0xff]  ;;  %vm4028_vm8 = vcmask 130048  }
 0x39a   : > { %v2272_v6 = vpack.c.bf16 %v2265_v63, %v2264_v1 }
 0x39b   : > { %v2261_v36 = vmul.f32 0.2, %v2245_v14  ;;  %vm2253_vm4 = vcmp.ge.f32.partialorder %v2245_v14, 0.0 }
 0x39d   : > { %v2269_v7 = vsel %vm2253_vm4, %v2245_v14, %v2261_v36  ;;  %v7876_v36 = vld [vmem:[#allocation5 + $0x78] sm:$0xff] }
 0x39e   : > { %v2223_v58 = vpop.f32.mrf.mxu2  ;;  %v2274_v37 = vpack.c.bf16 %v2269_v7, %v2268_v53  ;;  %v7879_v53 = vld [vmem:[#allocation5 + $0x90] sm:$0xff] }
 0x39f   : > { %v2234_v44 = vadd.f32 %v2223_v58, %v2176_v23  ;;  %v7868_v58 = vld [vmem:[#allocation5 + $0x38] sm:$0xff] }
 0x3a1   : > { %v2246_v9 = vadd.f32 %v8196_v2, %v2234_v44 }
 0x3a3   : > { %v2262_v28 = vmul.f32 0.2, %v2246_v9  ;;  %vm2254_vm2 = vcmp.ge.f32.partialorder %v2246_v9, 0.0 }
 0x3a5   : > { %v2270_v48 = vsel %vm2254_vm2, %v2246_v9, %v2262_v28  ;;  %v7873_v9 = vld [vmem:[#allocation5 + $0x60] sm:$0xff] }
 0x3a6   : > { %v2225_v18 = vpop.f32.mrf.mxu2  ;;  %v7898_v28 = vld [vmem:[%s9489_s30 + $0x8] sm:$0xff] }
 0x3a7   : > { %v2235_v24 = vadd.f32 %v2225_v18, %v2177_v26  ;;  %2927 = vmatpush.bf16.msra.mxu2 %v7898_v28  ;;  %v7887_v28 = vld [vmem:[#allocation5 + $0xd0] sm:$0xff] }
 0x3a9   : > { %v2247_v31 = vadd.f32 %v8196_v2, %v2235_v24 }
 0x3ab   : > { %vm2255_vm3 = vcmp.ge.f32.partialorder %v2247_v31, 0.0  ;;  %v2263_v62 = vmul.f32 0.2, %v2247_v31 }
 0x3ad   : > { %v2271_v25 = vsel %vm2255_vm3, %v2247_v31, %v2263_v62  ;;  %v7897_v31 = vld [vmem:[%s9489_s30] sm:$0xff] }
 0x3ae   : > { %v2275_v60 = vpack.c.bf16 %v2271_v25, %v2270_v48  ;;  %2928 = vmatpush.bf16.msra.mxu2 %v7897_v31  ;;  %v7877_v48 = vld [vmem:[#allocation5 + $0x80] sm:$0xff]  ;;  %v7907_v31 = vld [vmem:[%s9489_s30 + $0x50] sm:$0xff] }
 0x3af   : > { %3200 = vmatpush.bf16.msrb.mxu0 %v7907_v31 }
 0x3b0   : > { %2641 = vmatpush.bf16.msra.mxu3 %v2275_v60 }
 0x3b4   : > { %2642 = vmatpush.bf16.msra.mxu3 %v2274_v37 }
 0x3b8   : > { %2643 = vmatpush.bf16.msra.mxu3 %v2273_v57  ;;  %v7880_v57 = vld [vmem:[#allocation5 + $0x98] sm:$0xff] }
 0x3bc   : > { %2644 = vmatpush.bf16.msra.mxu3 %v2272_v6 }
 0x3bf   : > { %6659 = vmatmul.msk.bf16.vlgmr.msra.gmra.mxu3 %vm2528_vm10, %v7861_v8  ;;  %v7881_v8 = vld [vmem:[#allocation5 + $0xa0] sm:$0xff] }
 0x3cf   : > { %6660 = vmatmul.msk.bf16.gmra.mxu3 %vm2528_vm10, %v7862_v22 }
 0x3df   : > { %6661 = vmatmul.msk.bf16.gmra.mxu3 %vm2528_vm10, %v7863_v35 }
 0x3ef   : > { %6662 = vmatmul.msk.bf16.gmra.mxu3 %vm2528_vm10, %v7864_v40 }
 0x3ff   : > { %6663 = vmatmul.msk.bf16.gmra.mxu3 %vm2528_vm10, %v7865_v50  ;;  %v7882_v50 = vld [vmem:[#allocation5 + $0xa8] sm:$0xff] }
 0x40f   : > { %6664 = vmatmul.msk.bf16.gmra.mxu3 %vm2528_vm10, %v7866_v15 }
 0x41f   : > { %6665 = vmatmul.msk.bf16.gmra.mxu3 %vm2528_vm10, %v7867_v20 }
 0x42f   : > { %6666 = vmatmul.msk.bf16.gmra.mxu3 %vm2528_vm10, %v7868_v58 }
 0x43f   : > { %6667 = vmatmul.msk.bf16.gmra.mxu3 %vm2528_vm10, %v7869_v4 }
 0x442   : > { %v2646_v5 = vpop.f32.mrf.mxu3 }
 0x44a   : > { %v2648_v23 = vpop.f32.mrf.mxu3 }
 0x44b   : > { %v2826_v29 = vpack.c.bf16 %v2648_v23, %v2646_v5  ;;  %v7883_v5 = vld [vmem:[#allocation5 + $0xb0] sm:$0xff] }
 0x44f   : > { %6668 = vmatmul.msk.bf16.gmra.mxu3 %vm2528_vm10, %v7870_v49  ;;  %v7904_v49 = vld [vmem:[%s9489_s30 + $0x38] sm:$0xff] }
 0x452   : > { %v2651_v55 = vpop.f32.mrf.mxu3 }
 0x45a   : > { %v2653_v3 = vpop.f32.mrf.mxu3 }
 0x45b   : > { %v2827_v44 = vpack.c.bf16 %v2653_v3, %v2651_v55  ;;  %v7903_v3 = vld [vmem:[%s9489_s30 + $0x30] sm:$0xff] }
 0x45f   : > { %6669 = vmatmul.msk.bf16.gmra.mxu3 %vm2528_vm10, %v7871_v39 }
 0x462   : > { %v8917_v10 = vpop.f32.mrf.mxu3 }
 0x46a   : > { %v2658_v12 = vpop.f32.mrf.mxu3 }
 0x46b   : > { %v2828_v2 = vpack.c.bf16 %v2658_v12, %v8917_v10  ;;  %v7884_v10 = vld [vmem:[#allocation5 + $0xb8] sm:$0xff] }
 0x46f   : > { %6670 = vmatmul.msk.bf16.gmra.mxu3 %vm2528_vm10, %v7872_v0 }
 0x472   : > { %v8927_v13 = vpop.f32.mrf.mxu3 }
 0x47a   : > { %v2663_v26 = vpop.f32.mrf.mxu3 }
 0x47b   : > { %v2829_v17 = vpack.c.bf16 %v2663_v26, %v8927_v13  ;;  %v7885_v13 = vld [vmem:[#allocation5 + $0xc0] sm:$0xff] }
 0x47f   : > { %6671 = vmatmul.msk.bf16.gmra.mxu3 %vm2528_vm10, %v7873_v9 }
 0x482   : > { %v2666_v45 = vpop.f32.mrf.mxu3 }
 0x48a   : > { %v2668_v18 = vpop.f32.mrf.mxu3 }
 0x48b   : > { %v2834_v46 = vpack.c.bf16 %v2668_v18, %v2666_v45  ;;  %v7886_v18 = vld [vmem:[#allocation5 + $0xc8] sm:$0xff] }
 0x48d   : > { %6707 = vmatmul.msk.bf16.vlgmr.msrb.gmra.mxu2 %vm2855_vm11, %v2834_v46 }
 0x48e   : > { %2989 = vmatpush.bf16.msrb.mxu2 %v7902_v32 }
 0x48f   : > { %6672 = vmatmul.msk.bf16.gmra.mxu3 %vm2528_vm10, %v7874_v19 }
 0x492   : > { %v2671_v14 = vpop.f32.mrf.mxu3  ;;  %2990 = vmatpush.bf16.msrb.mxu2 %v7901_v52  ;;  %v7889_v52 = vld [vmem:[#allocation5 + $0xe0] sm:$0xff] }
 0x49a   : > { %v2673_v24 = vpop.f32.mrf.mxu3 }
 0x49b   : > { %v2835_v38 = vpack.c.bf16 %v2673_v24, %v2671_v14 }
 0x49d   : > { %6708 = vmatmul.msk.bf16.gmra.mxu2 %vm2855_vm11, %v2835_v38 }
 0x49f   : > { %6673 = vmatmul.msk.bf16.gmra.mxu3 %vm2528_vm10, %v7875_v34 }
 0x4a2   : > { %v2676_v27 = vpop.f32.mrf.mxu3 }
 0x4aa   : > { %v2678_v33 = vpop.f32.mrf.mxu3 }
 0x4ab   : > { %v2836_v56 = vpack.c.bf16 %v2678_v33, %v2676_v27 }
 0x4ad   : > { %6709 = vmatmul.msk.bf16.gmra.mxu2 %vm2855_vm11, %v2836_v56 }
 0x4af   : > { %6674 = vmatmul.msk.bf16.gmra.mxu3 %vm2528_vm10, %v7876_v36 }
 0x4b2   : > { %v2681_v62 = vpop.f32.mrf.mxu3 }
 0x4ba   : > { %v2683_v42 = vpop.f32.mrf.mxu3 }
 0x4bb   : > { %v2837_v54 = vpack.c.bf16 %v2683_v42, %v2681_v62  ;;  %v7906_v62 = vld [vmem:[%s9489_s30 + $0x48] sm:$0xff] }
 0x4bd   : > { %6710 = vmatmul.msk.bf16.gmra.mxu2 %vm2855_vm11, %v2837_v54 }
 0x4bf   : > { %6675 = vmatmul.msk.bf16.gmra.mxu3 %vm2528_vm10, %v7877_v48  ;;  %v7905_v48 = vld [vmem:[%s9489_s30 + $0x40] sm:$0xff] }
 0x4c2   : > { %v2686_v25 = vpop.f32.mrf.mxu3 }
 0x4ca   : > { %v2688_v60 = vpop.f32.mrf.mxu3 }
 0x4cb   : > { %v2950_v41 = vpack.c.bf16 %v2688_v60, %v2686_v25 }
 0x4cd   : > { %6719 = vmatmul.msk.bf16.vlgmr.msra.gmra.mxu2 %vm2855_vm11, %v2826_v29 }
 0x4ce   : > { %3059 = vmatpush.bf16.msra.mxu2 %v7904_v49 }
 0x4cf   : > { %6676 = vmatmul.msk.bf16.gmra.mxu3 %vm2528_vm10, %v7878_v51 }
 0x4d2   : > { %v2691_v7 = vpop.f32.mrf.mxu3  ;;  %3060 = vmatpush.bf16.msra.mxu2 %v7903_v3 }
 0x4da   : > { %v2693_v43 = vpop.f32.mrf.mxu3 }
 0x4db   : > { %v2951_v59 = vpack.c.bf16 %v2693_v43, %v2691_v7 }
 0x4dd   : > { %6720 = vmatmul.msk.bf16.gmra.mxu2 %vm2855_vm11, %v2827_v44 }
 0x4df   : > { %6677 = vmatmul.msk.bf16.gmra.mxu3 %vm2528_vm10, %v7879_v53 }
 0x4e2   : > { %v2696_v37 = vpop.f32.mrf.mxu3 }
 0x4ea   : > { %v2698_v47 = vpop.f32.mrf.mxu3 }
 0x4eb   : > { %v2952_v21 = vpack.c.bf16 %v2698_v47, %v2696_v37 }
 0x4ed   : > { %6721 = vmatmul.msk.bf16.gmra.mxu2 %vm2855_vm11, %v2828_v2 }
 0x4ef   : > { %6678 = vmatmul.msk.bf16.gmra.mxu3 %vm2528_vm10, %v7880_v57 }
 0x4f2   : > { %v2701_v63 = vpop.f32.mrf.mxu3 }
 0x4fa   : > { %v2703_v1 = vpop.f32.mrf.mxu3 }
 0x4fb   : > { %v2953_v6 = vpack.c.bf16 %v2703_v1, %v2701_v63 }
 0x4fd   : > { %6722 = vmatmul.msk.bf16.gmra.mxu2 %vm2855_vm11, %v2829_v17 }
 0x4ff   : > { %6679 = vmatmul.msk.bf16.gmra.mxu3 %vm2528_vm10, %v7881_v8 }
 0x502   : > { %v2706_v22 = vpop.f32.mrf.mxu3 }
 0x50a   : > { %v2708_v35 = vpop.f32.mrf.mxu3 }
 0x50b   : > { %v3020_v40 = vpack.c.bf16 %v2708_v35, %v2706_v22  ;;  %v7890_v22 = vld [vmem:[#allocation5 + $0xe8] sm:$0xff] }
 0x50d   : > { %6735 = vmatmul.msk.bf16.vlgmr.msrb.gmra.mxu2 %vm2855_vm11, %v2950_v41  ;;  %v7888_v41 = vld [vmem:[#allocation5 + $0xd8] sm:$0xff] }
 0x50e   : > { %3129 = vmatpush.bf16.msrb.mxu2 %v7906_v62 }
 0x50f   : > { %6680 = vmatmul.msk.bf16.gmra.mxu3 %vm2528_vm10, %v7882_v50 }
 0x510   : > { %v2877_v15 = vpop.f32.mrf.mxu2 }
 0x512   : > { %v2711_v20 = vpop.f32.mrf.mxu3  ;;  %3130 = vmatpush.bf16.msrb.mxu2 %v7905_v48 }
 0x518   : > { %v2879_v58 = vpop.f32.mrf.mxu2 }
 0x51a   : > { %v2713_v4 = vpop.f32.mrf.mxu3 }
 0x51b   : > { %v3021_v30 = vpack.c.bf16 %v2713_v4, %v2711_v20 }
 0x51d   : > { %6736 = vmatmul.msk.bf16.gmra.mxu2 %vm2855_vm11, %v2951_v59 }
 0x51f   : > { %6681 = vmatmul.msk.bf16.gmra.mxu3 %vm2528_vm10, %v7883_v5 }
 0x520   : > { %v2882_v23 = vpop.f32.mrf.mxu2 }
 0x522   : > { %v2716_v29 = vpop.f32.mrf.mxu3 }
 0x528   : > { %v2884_v55 = vpop.f32.mrf.mxu2 }
 0x52a   : > { %v2718_v44 = vpop.f32.mrf.mxu3 }
 0x52b   : > { %v3022_v39 = vpack.c.bf16 %v2718_v44, %v2716_v29  ;;  %v7892_v44 = vld [vmem:[#allocation5 + $0xf8] sm:$0xff] }
 0x52d   : > { %6737 = vmatmul.msk.bf16.gmra.mxu2 %vm2855_vm11, %v2952_v21 }
 0x52f   : > { %6682 = vmatmul.msk.bf16.gmra.mxu3 %vm2528_vm10, %v7884_v10 }
 0x530   : > { %v2887_v61 = vpop.f32.mrf.mxu2 }
 0x532   : > { %v2721_v11 = vpop.f32.mrf.mxu3 }
 0x538   : > { %v2889_v12 = vpop.f32.mrf.mxu2 }
 0x53a   : > { %v2723_v2 = vpop.f32.mrf.mxu3 }
 0x53b   : > { %v3023_v0 = vpack.c.bf16 %v2723_v2, %v2721_v11 }
 0x53d   : > { %6738 = vmatmul.msk.bf16.gmra.mxu2 %vm2855_vm11, %v2953_v6 }
 0x53f   : > { %6683 = vmatmul.msk.bf16.gmra.mxu3 %vm2528_vm10, %v7885_v13 }
 0x540   : > { %v2892_v16 = vpop.f32.mrf.mxu2 }
 0x542   : > { %v2726_v26 = vpop.f32.mrf.mxu3 }
 0x548   : > { %v2894_v17 = vpop.f32.mrf.mxu2 }
 0x54a   : > { %v2728_v9 = vpop.f32.mrf.mxu3 }
 0x54b   : > { %v3090_v45 = vpack.c.bf16 %v2728_v9, %v2726_v26 }
 0x54d   : > { %6751 = vmatmul.msk.bf16.vlgmr.msra.gmra.mxu2 %vm2855_vm11, %v3020_v40 }
 0x54f   : > { %6684 = vmatmul.msk.bf16.gmra.mxu3 %vm2528_vm10, %v7886_v18  ;;  %v7894_v18 = vld [vmem:[#allocation5 + $0x108] sm:$0xff] }
 0x550   : > { %v2930_v46 = vpop.f32.mrf.mxu2 }
 0x551   : > { %v2931_v19 = vadd.f32 %v2930_v46, %v2877_v15  ;;  %v7909_v15 = vld [vmem:[%s9489_s30 + $0x60] sm:$0xff] }
 0x552   : > { %v2731_v14 = vpop.f32.mrf.mxu3  ;;  %3270 = vmatpush.bf16.msrb.mxu1 %v7909_v15 }
 0x558   : > { %v2932_v24 = vpop.f32.mrf.mxu2 }
 0x559   : > { %v8978_v38 = vadd.f32 %v2932_v24, %v2879_v58 }
 0x55a   : > { %v2733_v34 = vpop.f32.mrf.mxu3 }
 0x55b   : > { %v3091_v27 = vpack.c.bf16 %v2733_v34, %v2731_v14 }
 0x55d   : > { %6752 = vmatmul.msk.bf16.gmra.mxu2 %vm2855_vm11, %v3021_v30  ;;  %v7891_v30 = vld [vmem:[#allocation5 + $0xf0] sm:$0xff] }
 0x55f   : > { %6685 = vmatmul.msk.bf16.gmra.mxu3 %vm2528_vm10, %v7887_v28  ;;  %v7895_v28 = vld [vmem:[#allocation5 + $0x110] sm:$0xff] }
 0x560   : > { %v2935_v33 = vpop.f32.mrf.mxu2 }
 0x561   : > { %v2936_v56 = vadd.f32 %v2935_v33, %v2882_v23 }
 0x562   : > { %v2736_v36 = vpop.f32.mrf.mxu3 }
 0x568   : > { %v2937_v42 = vpop.f32.mrf.mxu2 }
 0x569   : > { %v8988_v54 = vadd.f32 %v2937_v42, %v2884_v55  ;;  %v7911_v42 = vld [vmem:[%s9489_s30 + $0x70] sm:$0xff] }
 0x56a   : > { %v2738_v25 = vpop.f32.mrf.mxu3 }
 0x56b   : > { %v3092_v60 = vpack.c.bf16 %v2738_v25, %v2736_v36  ;;  %v7912_v36 = vld [vmem:[%s9489_s30 + $0x78] sm:$0xff] }
 0x56c   : > { %3339 = vmatpush.bf16.msra.mxu2 %v7912_v36 }
 0x56d   : > { %6753 = vmatmul.msk.bf16.gmra.mxu2 %vm2855_vm11, %v3022_v39 }
 0x56f   : > { %6686 = vmatmul.msk.bf16.gmra.mxu3 %vm2528_vm10, %v7888_v41 }
 0x570   : > { %v2940_v51 = vpop.f32.mrf.mxu2  ;;  %3340 = vmatpush.bf16.msra.mxu2 %v7911_v42 }
 0x571   : > { %v2941_v7 = vadd.f32 %v2940_v51, %v2887_v61 }
 0x572   : > { %v2741_v43 = vpop.f32.mrf.mxu3 }
 0x578   : > { %v2942_v59 = vpop.f32.mrf.mxu2 }
 0x579   : > { %v8995_v53 = vadd.f32 %v2942_v59, %v2889_v12 }
 0x57a   : > { %v2743_v37 = vpop.f32.mrf.mxu3 }
 0x57b   : > { %v3093_v32 = vpack.c.bf16 %v2743_v37, %v2741_v43 }
 0x57d   : > { %6754 = vmatmul.msk.bf16.gmra.mxu2 %vm2855_vm11, %v3023_v0  ;;  %v7893_v0 = vld [vmem:[#allocation5 + $0x100] sm:$0xff] }
 0x57f   : > { %6687 = vmatmul.msk.bf16.gmra.mxu3 %vm2528_vm10, %v7889_v52 }
 0x580   : > { %v2945_v47 = vpop.f32.mrf.mxu2 }
 0x581   : > { %v2946_v21 = vadd.f32 %v2945_v47, %v2892_v16 }
 0x582   : > { %v2746_v57 = vpop.f32.mrf.mxu3 }
 0x588   : > { %v2947_v63 = vpop.f32.mrf.mxu2 }
 0x589   : > { %v8999_v1 = vadd.f32 %v2947_v63, %v2894_v17 }
 0x58a   : > { %v2748_v6 = vpop.f32.mrf.mxu3 }
 0x58b   : > { %v3160_v8 = vpack.c.bf16 %v2748_v6, %v2746_v57 }
 0x58d   : > { %6767 = vmatmul.msk.bf16.vlgmr.msrb.gmra.mxu2 %vm2855_vm11, %v3090_v45  ;;  %6783 = vmatmul.msk.bf16.vlgmr.msrb.gmra.mxu0 %vm2855_vm11, %v3160_v8 }
 0x58f   : > { %6688 = vmatmul.msk.bf16.gmra.mxu3 %vm2528_vm10, %v7890_v22 }
 0x590   : > { %v2992_v35 = vpop.f32.mrf.mxu2 }
 0x591   : > { %v3012_v40 = vadd.f32 %v2992_v35, %v2931_v19 }
 0x592   : > { %v2751_v50 = vpop.f32.mrf.mxu3 }
 0x598   : > { %v9007_v20 = vpop.f32.mrf.mxu2 }
 0x59a   : > { %v2753_v58 = vpop.f32.mrf.mxu3 }
 0x59b   : > { %v3161_v4 = vpack.c.bf16 %v2753_v58, %v2751_v50 }
 0x59d   : > { %6768 = vmatmul.msk.bf16.gmra.mxu2 %vm2855_vm11, %v3091_v27  ;;  %6784 = vmatmul.msk.bf16.gmra.mxu0 %vm2855_vm11, %v3161_v4 }
 0x59f   : > { %6689 = vmatmul.msk.bf16.gmra.mxu3 %vm2528_vm10, %v7891_v30 }
 0x5a0   : > { %v2997_v5 = vpop.f32.mrf.mxu2 }
 0x5a1   : > { %v3014_v23 = vadd.f32 %v2997_v5, %v2936_v56 }
 0x5a2   : > { %v2756_v29 = vpop.f32.mrf.mxu3 }
 0x5a8   : > { %v9012_v49 = vpop.f32.mrf.mxu2 }
 0x5aa   : > { %v2758_v55 = vpop.f32.mrf.mxu3 }
 0x5ab   : > { %v3162_v3 = vpack.c.bf16 %v2758_v55, %v2756_v29  ;;  %v7914_v55 = vld [vmem:[%s9489_s30 + $0x88] sm:$0xff] }
 0x5ac   : > { %3409 = vmatpush.bf16.msra.mxu0 %v7914_v55 }
 0x5ad   : > { %6769 = vmatmul.msk.bf16.gmra.mxu2 %vm2855_vm11, %v3092_v60  ;;  %6785 = vmatmul.msk.bf16.gmra.mxu0 %vm2855_vm11, %v3162_v3  ;;  %v7896_v60 = vld [vmem:[#allocation5 + $0x118] sm:$0xff] }
 0x5af   : > { %6690 = vmatmul.msk.bf16.gmra.mxu3 %vm2528_vm10, %v7892_v44 }
 0x5b0   : > { %v3002_v39 = vpop.f32.mrf.mxu2 }
 0x5b1   : > { %v3016_v10 = vadd.f32 %v3002_v39, %v2941_v7 }
 0x5b2   : > { %v2761_v61 = vpop.f32.mrf.mxu3 }
 0x5b8   : > { %v9017_v11 = vpop.f32.mrf.mxu2 }
 0x5ba   : > { %v2763_v12 = vpop.f32.mrf.mxu3 }
 0x5bb   : > { %v3163_v2 = vpack.c.bf16 %v2763_v12, %v2761_v61 }
 0x5bd   : > { %6770 = vmatmul.msk.bf16.gmra.mxu2 %vm2855_vm11, %v3093_v32  ;;  %6786 = vmatmul.msk.bf16.gmra.mxu0 %vm2855_vm11, %v3163_v2 }
 0x5bf   : > { %6691 = vmatmul.msk.bf16.gmra.mxu3 %vm2528_vm10, %v7893_v0 }
 0x5c0   : > { %v3007_v13 = vpop.f32.mrf.mxu2 }
 0x5c1   : > { %v3018_v16 = vadd.f32 %v3007_v13, %v2946_v21 }
 0x5c2   : > { %v2766_v26 = vpop.f32.mrf.mxu3 }
 0x5c8   : > { %v9022_v17 = vpop.f32.mrf.mxu2 }
 0x5ca   : > { %v2768_v9 = vpop.f32.mrf.mxu3 }
 0x5cb   : > { %v3230_v45 = vpack.c.bf16 %v2768_v9, %v2766_v26 }
 0x5cd   : > { %6799 = vmatmul.msk.bf16.vlgmr.msrb.gmra.mxu1 %vm2855_vm11, %v3230_v45 }
 0x5cf   : > { %6692 = vmatmul.msk.bf16.gmra.mxu3 %vm2528_vm10, %v7894_v18 }
 0x5d0   : > { %v3062_v46 = vpop.f32.mrf.mxu2 }
 0x5d1   : > { %v3082_v19 = vadd.f32 %v3062_v46, %v3012_v40 }
 0x5d2   : > { %v2771_v14 = vpop.f32.mrf.mxu3 }
 0x5d8   : > { %v9026_v24 = vpop.f32.mrf.mxu2 }
 0x5da   : > { %v2773_v34 = vpop.f32.mrf.mxu3 }
 0x5db   : > { %v3231_v27 = vpack.c.bf16 %v2773_v34, %v2771_v14 }
 0x5dd   : > { %6800 = vmatmul.msk.bf16.gmra.mxu1 %vm2855_vm11, %v3231_v27 }
 0x5df   : > { %6693 = vmatmul.msk.bf16.gmra.mxu3 %vm2528_vm10, %v7895_v28 }
 0x5e0   : > { %v3067_v31 = vpop.f32.mrf.mxu2 }
 0x5e1   : > { %v3084_v33 = vadd.f32 %v3067_v31, %v3014_v23 }
 0x5e2   : > { %v2776_v56 = vpop.f32.mrf.mxu3 }
 0x5e8   : > { %v9033_v62 = vpop.f32.mrf.mxu2 }
 0x5ea   : > { %v2778_v48 = vpop.f32.mrf.mxu3 }
 0x5eb   : > { %v3232_v25 = vpack.c.bf16 %v2778_v48, %v2776_v56 }
 0x5ed   : > { %6801 = vmatmul.msk.bf16.gmra.mxu1 %vm2855_vm11, %v3232_v25 }
 0x5ef   : > { %6694 = vmatmul.msk.bf16.gmra.mxu3 %vm2528_vm10, %v7896_v60 }
 0x5f0   : > { %v3072_v41 = vpop.f32.mrf.mxu2 }
 0x5f1   : > { %v3086_v51 = vadd.f32 %v3072_v41, %v3016_v10  ;;  %v7913_v10 = vld [vmem:[%s9489_s30 + $0x80] sm:$0xff] }
 0x5f2   : > { %v2781_v7 = vpop.f32.mrf.mxu3  ;;  %3410 = vmatpush.bf16.msra.mxu0 %v7913_v10 }
 0x5f8   : > { %v9040_v43 = vpop.f32.mrf.mxu2 }
 0x5fa   : > { %v2783_v59 = vpop.f32.mrf.mxu3 }
 0x5fb   : > { %v3233_v37 = vpack.c.bf16 %v2783_v59, %v2781_v7 }
 0x5fd   : > { %6802 = vmatmul.msk.bf16.gmra.mxu1 %vm2855_vm11, %v3233_v37 }
 0x600   : > { %v3077_v32 = vpop.f32.mrf.mxu2 }
 0x601   : > { %v3088_v52 = vadd.f32 %v3077_v32, %v3018_v16 }
 0x602   : > { %v2786_v47 = vpop.f32.mrf.mxu3 }
 0x608   : > { %v9043_v21 = vpop.f32.mrf.mxu2 }
 0x60a   : > { %v2788_v57 = vpop.f32.mrf.mxu3  ;;  %v3202_v63 = vpop.f32.mrf.mxu0 }
 0x60b   : > { %v3300_v6 = vpack.c.bf16 %v2788_v57, %v2786_v47 }
 0x60d   : > { %6815 = vmatmul.msk.bf16.vlgmr.msra.gmra.mxu2 %vm2855_vm11, %v3300_v6 }
 0x610   : > { %v3132_v8 = vpop.f32.mrf.mxu2 }
 0x611   : > { %v3152_v22 = vadd.f32 %v3132_v8, %v3082_v19  ;;  %v3013_v8 = vadd.f32 %v9007_v20, %v8978_v38 }
 0x612   : > { %v2791_v35 = vpop.f32.mrf.mxu3  ;;  %v9046_v40 = vpop.f32.mrf.mxu0 }
 0x613   : > { %v3222_v50 = vadd.f32 %v3202_v63, %v3152_v22  ;;  %v3083_v22 = vadd.f32 %v9026_v24, %v3013_v8  ;;  %v3015_v24 = vadd.f32 %v9012_v49, %v8988_v54 }
 0x618   : > { %v3134_v15 = vpop.f32.mrf.mxu2 }
 0x61a   : > { %v2793_v58 = vpop.f32.mrf.mxu3  ;;  %v3207_v4 = vpop.f32.mrf.mxu0 }
 0x61b   : > { %v3301_v30 = vpack.c.bf16 %v2793_v58, %v2791_v35  ;;  %v3153_v35 = vadd.f32 %v3134_v15, %v3083_v22 }
 0x61d   : > { %6816 = vmatmul.msk.bf16.gmra.mxu2 %vm2855_vm11, %v3301_v30 }
 0x620   : > { %v3137_v5 = vpop.f32.mrf.mxu2 }
 0x621   : > { %v3154_v23 = vadd.f32 %v3137_v5, %v3084_v33  ;;  %v3223_v5 = vadd.f32 %v9046_v40, %v3153_v35  ;;  %v3085_v40 = vadd.f32 %v9033_v62, %v3015_v24 }
 0x622   : > { %v2796_v29 = vpop.f32.mrf.mxu3  ;;  %v9054_v44 = vpop.f32.mrf.mxu0 }
 0x623   : > { %v9052_v3 = vadd.f32 %v3207_v4, %v3154_v23  ;;  %v9086_v23 = vld [vmem:[%s9451_s6] ss:$0 sm:$0xff] }
 0x628   : > { %v9056_v39 = vpop.f32.mrf.mxu2 }
 0x62a   : > { %v2798_v61 = vpop.f32.mrf.mxu3  ;;  %v3212_v2 = vpop.f32.mrf.mxu0 }
 0x62b   : > { %v3302_v12 = vpack.c.bf16 %v2798_v61, %v2796_v29 }
 0x62d   : > { %6817 = vmatmul.msk.bf16.gmra.mxu2 %vm2855_vm11, %v3302_v12 }
 0x630   : > { %v3142_v0 = vpop.f32.mrf.mxu2 }
 0x631   : > { %v3156_v13 = vadd.f32 %v3142_v0, %v3086_v51 }
 0x632   : > { %v2801_v16 = vpop.f32.mrf.mxu3  ;;  %v9064_v9 = vpop.f32.mrf.mxu0 }
 0x633   : > { %v9062_v26 = vadd.f32 %v3212_v2, %v3156_v13  ;;  %v3155_v13 = vadd.f32 %v9056_v39, %v3085_v40 }
 0x638   : > { %v9066_v45 = vpop.f32.mrf.mxu2 }
 0x63a   : > { %v2803_v18 = vpop.f32.mrf.mxu3  ;;  %v3217_v34 = vpop.f32.mrf.mxu0 }
 0x63b   : > { %v3303_v46 = vpack.c.bf16 %v2803_v18, %v2801_v16 }
 0x63d   : > { %6818 = vmatmul.msk.bf16.gmra.mxu2 %vm2855_vm11, %v3303_v46 }
 0x640   : > { %v3147_v19 = vpop.f32.mrf.mxu2 }
 0x641   : > { %v3158_v14 = vadd.f32 %v3147_v19, %v3088_v52 }
 0x642   : > { %v2806_v27 = vpop.f32.mrf.mxu3  ;;  %v9077_v63 = vpop.f32.mrf.mxu0 }
 0x643   : > { %v9069_v28 = vadd.f32 %v3217_v34, %v3158_v14  ;;  %v3225_v14 = vadd.f32 %v9054_v44, %v3155_v13 }
 0x648   : > { %v9075_v32 = vpop.f32.mrf.mxu2 }
 0x64a   : > { %v2808_v31 = vpop.f32.mrf.mxu3  ;;  %v3272_v33 = vpop.f32.mrf.mxu1 }
 0x64b   : > { %v3370_v56 = vpack.c.bf16 %v2808_v31, %v2806_v27  ;;  %v3292_v36 = vadd.f32 %v3272_v33, %v3222_v50 }
 0x64d   : > { %6831 = vmatmul.msk.bf16.vlgmr.msra.gmra.mxu0 %vm2855_vm11, %v3370_v56 }
 0x652   : > { %v2811_v42 = vpop.f32.mrf.mxu3  ;;  %v3274_v57 = vpop.f32.mrf.mxu1 }
 0x653   : > { %v3293_v29 = vadd.f32 %v3274_v57, %v3223_v5 }
 0x65a   : > { %v2813_v48 = vpop.f32.mrf.mxu3  ;;  %v3277_v50 = vpop.f32.mrf.mxu1 }
 0x65b   : > { %v3371_v25 = vpack.c.bf16 %v2813_v48, %v2811_v42  ;;  %v3294_v16 = vadd.f32 %v3277_v50, %v9052_v3 }
 0x65d   : > { %6832 = vmatmul.msk.bf16.gmra.mxu0 %vm2855_vm11, %v3371_v25 }
 0x662   : > { %v2816_v60 = vpop.f32.mrf.mxu3  ;;  %v3279_v20 = vpop.f32.mrf.mxu1 }
 0x663   : > { %v3295_v62 = vadd.f32 %v3279_v20, %v3225_v14  ;;  %v7917_v14 = vld [vmem:[%s9452_s7 + $0x10] sm:$0xff] }
 0x66a   : > { %v2818_v41 = vpop.f32.mrf.mxu3  ;;  %v3282_v27 = vpop.f32.mrf.mxu1 }
 0x66b   : > { %v3372_v51 = vpack.c.bf16 %v2818_v41, %v2816_v60 }
 0x66d   : > { %6833 = vmatmul.msk.bf16.gmra.mxu0 %vm2855_vm11, %v3372_v51  ;;  %v3296_v51 = vadd.f32 %v3282_v27, %v9062_v26  ;;  %v3019_v26 = vadd.f32 %v9022_v17, %v8999_v1  ;;  %v7925_v27 = vld [vmem:[#allocation7 + $0x8] sm:$0xff] }
 0x66e   : > { %3685 = vmatpush.bf16.msrb.mxu2 %v7925_v27 }
 0x672   : > { %v2821_v7 = vpop.f32.mrf.mxu3  ;;  %v3284_v44 = vpop.f32.mrf.mxu1 }
 0x67a   : > { %v2823_v59 = vpop.f32.mrf.mxu3  ;;  %v3287_v22 = vpop.f32.mrf.mxu1 }
 0x67b   : > { %v3373_v37 = vpack.c.bf16 %v2823_v59, %v2821_v7 }
 0x67d   : > { %6834 = vmatmul.msk.bf16.gmra.mxu0 %vm2855_vm11, %v3373_v37 }
 0x682   : > { %v3289_v24 = vpop.f32.mrf.mxu1 }
 0x690   : > { %v3342_v52 = vpop.f32.mrf.mxu2 }
 0x691   : > { %v3362_v47 = vadd.f32 %v3342_v52, %v3292_v36  ;;  %v3017_v36 = vadd.f32 %v9017_v11, %v8995_v53 }
 0x693   : > { %v3087_v25 = vadd.f32 %v9040_v43, %v3017_v36  ;;  %v7929_v36 = vld [vmem:[#allocation7 + $0x28] sm:$0xff] }
 0x694   : > { %3720 = vmatpush.bf16.msrb.mxu0 %v7929_v36 }
 0x695   : > { %v3157_v41 = vadd.f32 %v9066_v45, %v3087_v25 }
 0x697   : > { %v3227_v53 = vadd.f32 %v9064_v9, %v3157_v41  ;;  %v7930_v41 = vld [vmem:[#allocation7 + $0x30] sm:$0xff] }
 0x698   : > { %v3344_v6 = vpop.f32.mrf.mxu2 }
 0x699   : > { %v3363_v55 = vadd.f32 %v3344_v6, %v3293_v29  ;;  %v3297_v6 = vadd.f32 %v3284_v44, %v3227_v53  ;;  %v3298_v29 = vadd.f32 %v3287_v22, %v9069_v28  ;;  %v7931_v44 = vld [vmem:[#allocation7 + $0x38] sm:$0xff] }
 0x6a0   : > { %v3347_v30 = vpop.f32.mrf.mxu2 }
 0x6a1   : > { %v3364_v49 = vadd.f32 %v3347_v30, %v3294_v16  ;;  %v3089_v30 = vadd.f32 %v9043_v21, %v3019_v26 }
 0x6a3   : > { %v3159_v9 = vadd.f32 %v9075_v32, %v3089_v30  ;;  %v7939_v30 = vld [vmem:[#allocation7 + $0x78] sm:$0xff] }
 0x6a5   : > { %v3229_v1 = vadd.f32 %v9077_v63, %v3159_v9  ;;  %v7915_v63 = vld [vmem:[%s9452_s7] sm:$0xff] }
 0x6a8   : > { %v3349_v2 = vpop.f32.mrf.mxu2 }
 0x6a9   : > { %v3365_v33 = vadd.f32 %v3349_v2, %v3295_v62  ;;  %v7924_v62 = vld [vmem:[#allocation7] sm:$0xff] }
 0x6aa   : > { %3686 = vmatpush.bf16.msrb.mxu2 %v7924_v62 }
 0x6ae   : > { %3757 = vmatpush.bf16.msra.mxu2 %v7931_v44 }
 0x6b0   : > { %v3352_v31 = vpop.f32.mrf.mxu2 }
 0x6b1   : > { %v3366_v57 = vadd.f32 %v3352_v31, %v3296_v51  ;;  %v7922_v31 = vld [vmem:[%s9452_s7 + $0x38] sm:$0xff] }
 0x6b2   : > { %3758 = vmatpush.bf16.msra.mxu2 %v7930_v41 }
 0x6b8   : > { %v3354_v37 = vpop.f32.mrf.mxu2 }
 0x6b9   : > { %v3367_v8 = vadd.f32 %v3354_v37, %v3297_v6  ;;  %v7933_v37 = vld [vmem:[#allocation7 + $0x48] sm:$0xff]  ;;  %v7934_v6 = vld [vmem:[#allocation7 + $0x50] sm:$0xff] }
 0x6ca   : > { %v3412_v58 = vpop.f32.mrf.mxu0 }
 0x6cb   : > { %v3432_v4 = vadd.f32 %v3412_v58, %v3362_v47  ;;  %v3357_v58 = vpop.f32.mrf.mxu2 }
 0x6cc   : > { %v3368_v20 = vadd.f32 %v3357_v58, %v3298_v29 }
 0x6cd   : > { %v3444_v10 = vadd.f32 %v9086_v23, %v3432_v4 }
 0x6cf   : > { %v3460_v15 = vmul.f32 0.2, %v3444_v10  ;;  %vm3452_vm12 = vcmp.ge.f32.partialorder %v3444_v10, 0.0 }
 0x6d1   : > { %v9095_v18 = vsel %vm3452_vm12, %v3444_v10, %v3460_v15  ;;  %vm5961_vm12 = vcmask 3072  }
 0x6d2   : > { %v3414_v61 = vpop.f32.mrf.mxu0 }
 0x6d3   : > { %v3433_v38 = vadd.f32 %v3414_v61, %v3363_v55  ;;  %v3359_v15 = vpop.f32.mrf.mxu2 }
 0x6d5   : > { %v3445_v12 = vadd.f32 %v9086_v23, %v3433_v38 }
 0x6d7   : > { %v3461_v0 = vmul.f32 0.2, %v3445_v12  ;;  %vm3453_vm13 = vcmp.ge.f32.partialorder %v3445_v12, 0.0 }
 0x6d9   : > { %v9097_v46 = vsel %vm3453_vm13, %v3445_v12, %v3461_v0  ;;  %v3299_v12 = vadd.f32 %v3289_v24, %v3229_v1 }
 0x6da   : > { %v3417_v19 = vpop.f32.mrf.mxu0  ;;  %v3476_v54 = vpack.c.bf16 %v9097_v46, %v9095_v18  ;;  %v7919_v18 = vld [vmem:[%s9452_s7 + $0x20] sm:$0xff]  ;;  %v7920_v46 = vld [vmem:[%s9452_s7 + $0x28] sm:$0xff] }
 0x6db   : > { %v3434_v34 = vadd.f32 %v3417_v19, %v3364_v49  ;;  %v3369_v2 = vadd.f32 %v3359_v15, %v3299_v12 }
 0x6dd   : > { %v3446_v39 = vadd.f32 %v9086_v23, %v3434_v34  ;;  %v7918_v34 = vld [vmem:[%s9452_s7 + $0x18] sm:$0xff] }
 0x6df   : > { %v3462_v42 = vmul.f32 0.2, %v3446_v39  ;;  %vm3454_vm14 = vcmp.ge.f32.partialorder %v3446_v39, 0.0 }
 0x6e1   : > { %v3470_v7 = vsel %vm3454_vm14, %v3446_v39, %v3462_v42  ;;  %v7926_v39 = vld [vmem:[#allocation7 + $0x10] sm:$0xff]  ;;  %v7928_v42 = vld [vmem:[#allocation7 + $0x20] sm:$0xff] }
 0x6e2   : > { %v3419_v56 = vpop.f32.mrf.mxu0  ;;  %3721 = vmatpush.bf16.msrb.mxu0 %v7928_v42 }
 0x6e3   : > { %v3435_v3 = vadd.f32 %v3419_v56, %v3365_v33  ;;  %v7927_v33 = vld [vmem:[#allocation7 + $0x18] sm:$0xff] }
 0x6e4   : > { %v7923_v56 = vld [vmem:[%s9452_s7 + $0x40] sm:$0xff] }
 0x6e5   : > { %v3447_v48 = vadd.f32 %v9086_v23, %v3435_v3 }
 0x6e6   : > { %3794 = vmatpush.bf16.msra.mxu0 %v7933_v37 }
 0x6e7   : > { %v3463_v60 = vmul.f32 0.2, %v3447_v48  ;;  %vm3455_vm15 = vcmp.ge.f32.partialorder %v3447_v48, 0.0 }
 0x6e9   : > { %v3471_v59 = vsel %vm3455_vm15, %v3447_v48, %v3463_v60 }
 0x6ea   : > { %v3422_v52 = vpop.f32.mrf.mxu0  ;;  %v3477_v47 = vpack.c.bf16 %v3471_v59, %v3470_v7 }
 0x6eb   : > { %v3436_v11 = vadd.f32 %v3422_v52, %v3366_v57  ;;  %v7932_v52 = vld [vmem:[#allocation7 + $0x40] sm:$0xff] }
 0x6ec   : > { %3795 = vmatpush.bf16.msra.mxu0 %v7932_v52 }
 0x6ed   : > { %v3448_v43 = vadd.f32 %v9086_v23, %v3436_v11  ;;  %v7935_v11 = vld [vmem:[#allocation7 + $0x58] sm:$0xff] }
 0x6ef   : > { %v3464_v45 = vmul.f32 0.2, %v3448_v43  ;;  %vm3456_vm2 = vcmp.ge.f32.partialorder %v3448_v43, 0.0 }
 0x6f1   : > { %v3472_v55 = vsel %vm3456_vm2, %v3448_v43, %v3464_v45  ;;  %v7974_v45 = vld [vmem:[#allocation10 + $0xb8] sm:$0xff] }
 0x6f2   : > { %v3424_v35 = vpop.f32.mrf.mxu0  ;;  %4411 = vmatpush.bf16.msrb.mxu3 %v7974_v45  ;;  %v7946_v45 = vld [vmem:[#allocation8 + $0x20] sm:$0xff] }
 0x6f3   : > { %v3437_v50 = vadd.f32 %v3424_v35, %v3367_v8  ;;  %v7937_v35 = vld [vmem:[#allocation7 + $0x68] sm:$0xff] }
 0x6f5   : > { %v3449_v4 = vadd.f32 %v9086_v23, %v3437_v50  ;;  %v7936_v50 = vld [vmem:[#allocation7 + $0x60] sm:$0xff] }
 0x6f7   : > { %v3465_v5 = vmul.f32 0.2, %v3449_v4  ;;  %vm3457_vm3 = vcmp.ge.f32.partialorder %v3449_v4, 0.0 }
 0x6f9   : > { %v3473_v10 = vsel %vm3457_vm3, %v3449_v4, %v3465_v5  ;;  %v7938_v5 = vld [vmem:[#allocation7 + $0x70] sm:$0xff] }
 0x6fa   : > { %v3427_v61 = vpop.f32.mrf.mxu0  ;;  %v3478_v38 = vpack.c.bf16 %v3473_v10, %v3472_v55  ;;  %v7941_v10 = vld [vmem:[#allocation7 + $0x88] sm:$0xff] }
 0x6fb   : > { %v3438_v17 = vadd.f32 %v3427_v61, %v3368_v20  ;;  %v7940_v61 = vld [vmem:[#allocation7 + $0x80] sm:$0xff] }
 0x6fd   : > { %v3450_v21 = vadd.f32 %v9086_v23, %v3438_v17 }
 0x6ff   : > { %v3466_v13 = vmul.f32 0.2, %v3450_v21  ;;  %vm3458_vm4 = vcmp.ge.f32.partialorder %v3450_v21, 0.0 }
 0x701   : > { %v3474_v16 = vsel %vm3458_vm4, %v3450_v21, %v3466_v13 }
 0x702   : > { %v3429_v40 = vpop.f32.mrf.mxu0 }
 0x703   : > { %v3439_v0 = vadd.f32 %v3429_v40, %v3369_v2  ;;  %v7973_v40 = vld [vmem:[#allocation10 + $0xb0] sm:$0xff] }
 0x704   : > { %4412 = vmatpush.bf16.msrb.mxu3 %v7973_v40  ;;  %v7959_v40 = vld [vmem:[#allocation10 + $0x40] sm:$0xff] }
 0x705   : > { %v3451_v32 = vadd.f32 %v9086_v23, %v3439_v0  ;;  %v7916_v23 = vld [vmem:[%s9452_s7 + $0x8] sm:$0xff] }
 0x707   : > { %vm3459_vm5 = vcmp.ge.f32.partialorder %v3451_v32, 0.0  ;;  %v3467_v28 = vmul.f32 0.2, %v3451_v32 }
 0x709   : > { %v3475_v19 = vsel %vm3459_vm5, %v3451_v32, %v3467_v28 }
 0x70a   : > { %v3479_v49 = vpack.c.bf16 %v3475_v19, %v3474_v16 }
 0x70c   : > { %3574 = vmatpush.bf16.msra.mxu1 %v3479_v49 }
 0x710   : > { %3575 = vmatpush.bf16.msra.mxu1 %v3478_v38 }
 0x714   : > { %3576 = vmatpush.bf16.msra.mxu1 %v3477_v47 }
 0x718   : > { %3577 = vmatpush.bf16.msra.mxu1 %v3476_v54  ;;  %v7921_v54 = vld [vmem:[%s9452_s7 + $0x30] sm:$0xff] }
 0x71b   : > { %6871 = vmatmul.msk.bf16.vlgmr.msra.gmra.mxu1 %vm2528_vm10, %v7915_v63 }
 0x71c   : > { %3656 = vmatpush.bf16.msrb.mxu1 %v7927_v33 }
 0x720   : > { %3657 = vmatpush.bf16.msrb.mxu1 %v7926_v39 }
 0x72b   : > { %6872 = vmatmul.msk.bf16.gmra.mxu1 %vm2528_vm10, %v7916_v23 }
 0x73b   : > { %6873 = vmatmul.msk.bf16.gmra.mxu1 %vm2528_vm10, %v7917_v14 }
 0x74b   : > { %6874 = vmatmul.msk.bf16.gmra.mxu1 %vm2528_vm10, %v7918_v34 }
 0x75b   : > { %6875 = vmatmul.msk.bf16.gmra.mxu1 %vm2528_vm10, %v7919_v18 }
 0x76b   : > { %6876 = vmatmul.msk.bf16.gmra.mxu1 %vm2528_vm10, %v7920_v46 }
 0x77b   : > { %6877 = vmatmul.msk.bf16.gmra.mxu1 %vm2528_vm10, %v7921_v54 }
 0x78b   : > { %6878 = vmatmul.msk.bf16.gmra.mxu1 %vm2528_vm10, %v7922_v31 }
 0x798   : > { %v3579_v3 = vpop.f32.mrf.mxu1 }
 0x79b   : > { %6879 = vmatmul.msk.bf16.gmra.mxu1 %vm2528_vm10, %v7923_v56 }
 0x7a0   : > { %v3581_v48 = vpop.f32.mrf.mxu1 }
 0x7a1   : > { %v3624_v25 = vpack.c.bf16 %v3581_v48, %v3579_v3 }
 0x7a3   : > { %6897 = vmatmul.msk.bf16.vlgmr.msrb.gmra.mxu2 %vm2855_vm11, %v3624_v25 }
 0x7a4   : > { %3831 = vmatpush.bf16.msrb.mxu2 %v7935_v11 }
 0x7a8   : > { %v3584_v60 = vpop.f32.mrf.mxu1  ;;  %3832 = vmatpush.bf16.msrb.mxu2 %v7934_v6 }
 0x7b0   : > { %v3586_v51 = vpop.f32.mrf.mxu1 }
 0x7b1   : > { %v3629_v7 = vpack.c.bf16 %v3586_v51, %v3584_v60  ;;  %v8198_v51 = vld [vmem:[%s9454_s9] ss:$0 sm:$0xff] }
 0x7b3   : > { %6888 = vmatmul.msk.bf16.vlgmr.msrb.gmra.mxu1 %vm2855_vm11, %v3629_v7 }
 0x7b8   : > { %v3589_v59 = vpop.f32.mrf.mxu1 }
 0x7c0   : > { %v3591_v47 = vpop.f32.mrf.mxu1 }
 0x7c1   : > { %v3693_v57 = vpack.c.bf16 %v3591_v47, %v3589_v59 }
 0x7c3   : > { %6906 = vmatmul.msk.bf16.vlgmr.msrb.gmra.mxu0 %vm2855_vm11, %v3693_v57 }
 0x7c4   : > { %3868 = vmatpush.bf16.msrb.mxu0 %v7937_v35  ;;  %v7942_v35 = vld [vmem:[#allocation8] sm:$0xff] }
 0x7c8   : > { %v3594_v53 = vpop.f32.mrf.mxu1  ;;  %3869 = vmatpush.bf16.msrb.mxu0 %v7936_v50  ;;  %v7943_v50 = vld [vmem:[#allocation8 + $0x8] sm:$0xff] }
 0x7d0   : > { %v3596_v8 = vpop.f32.mrf.mxu1 }
 0x7d1   : > { %v3730_v43 = vpack.c.bf16 %v3596_v8, %v3594_v53 }
 0x7d3   : > { %6915 = vmatmul.msk.bf16.vlgmr.msra.gmra.mxu2 %vm2855_vm11, %v3730_v43 }
 0x7d4   : > { %3905 = vmatpush.bf16.msra.mxu2 %v7939_v30  ;;  %v7947_v30 = vld [vmem:[#allocation8 + $0x28] sm:$0xff] }
 0x7d8   : > { %v3599_v22 = vpop.f32.mrf.mxu1  ;;  %3906 = vmatpush.bf16.msra.mxu2 %v7938_v5  ;;  %v7948_v5 = vld [vmem:[#allocation8 + $0x30] sm:$0xff] }
 0x7e0   : > { %v3601_v58 = vpop.f32.mrf.mxu1 }
 0x7e1   : > { %v3767_v26 = vpack.c.bf16 %v3601_v58, %v3599_v22  ;;  %v7944_v58 = vld [vmem:[#allocation8 + $0x10] sm:$0xff] }
 0x7e3   : > { %6924 = vmatmul.msk.bf16.vlgmr.msra.gmra.mxu0 %vm2855_vm11, %v3767_v26  ;;  %v7945_v26 = vld [vmem:[#allocation8 + $0x18] sm:$0xff] }
 0x7e4   : > { %3942 = vmatpush.bf16.msra.mxu0 %v7941_v10  ;;  %v7956_v10 = vld [vmem:[#allocation10 + $0x28] sm:$0xff] }
 0x7e8   : > { %v3604_v4 = vpop.f32.mrf.mxu1  ;;  %3943 = vmatpush.bf16.msra.mxu0 %v7940_v61  ;;  %v7955_v61 = vld [vmem:[#allocation10 + $0x20] sm:$0xff] }
 0x7f0   : > { %v3606_v9 = vpop.f32.mrf.mxu1 }
 0x7f1   : > { %v3804_v29 = vpack.c.bf16 %v3606_v9, %v3604_v4  ;;  %v7972_v4 = vld [vmem:[#allocation10 + $0xa8] sm:$0xff]  ;;  %v7949_v9 = vld [vmem:[#allocation8 + $0x38] sm:$0xff] }
 0x7f2   : > { %4413 = vmatpush.bf16.msrb.mxu3 %v7972_v4 }
 0x7f3   : > { %6933 = vmatmul.msk.bf16.vlgmr.msrb.gmra.mxu2 %vm2855_vm11, %v3804_v29  ;;  %v7958_v29 = vld [vmem:[#allocation10 + $0x38] sm:$0xff] }
 0x7f8   : > { %v3609_v55 = vpop.f32.mrf.mxu1 }
 0x800   : > { %v3611_v38 = vpop.f32.mrf.mxu1 }
 0x801   : > { %v3841_v20 = vpack.c.bf16 %v3611_v38, %v3609_v55  ;;  %v7957_v55 = vld [vmem:[#allocation10 + $0x30] sm:$0xff]  ;;  %v7950_v38 = vld [vmem:[#allocation8 + $0x40] sm:$0xff] }
 0x803   : > { %6942 = vmatmul.msk.bf16.vlgmr.msrb.gmra.mxu0 %vm2855_vm11, %v3841_v20  ;;  %v7954_v20 = vld [vmem:[#allocation10 + $0x18] sm:$0xff] }
 0x804   : > { %4160 = vmatpush.bf16.msrb.mxu0 %v7958_v29 }
 0x808   : > { %v3614_v24 = vpop.f32.mrf.mxu1  ;;  %4161 = vmatpush.bf16.msrb.mxu0 %v7957_v55 }
 0x80c   : > { %4162 = vmatpush.bf16.msrb.mxu0 %v7956_v10 }
 0x810   : > { %v3616_v1 = vpop.f32.mrf.mxu1  ;;  %4163 = vmatpush.bf16.msrb.mxu0 %v7955_v61 }
 0x811   : > { %v3878_v17 = vpack.c.bf16 %v3616_v1, %v3614_v24  ;;  %v7962_v24 = vld [vmem:[#allocation10 + $0x58] sm:$0xff]  ;;  %v7953_v1 = vld [vmem:[#allocation10 + $0x10] sm:$0xff] }
 0x812   : > { %4252 = vmatpush.bf16.msra.mxu1 %v7962_v24 }
 0x813   : > { %6951 = vmatmul.msk.bf16.vlgmr.msra.gmra.mxu2 %vm2855_vm11, %v3878_v17  ;;  %v7961_v17 = vld [vmem:[#allocation10 + $0x50] sm:$0xff] }
 0x816   : > { %4253 = vmatpush.bf16.msra.mxu1 %v7961_v17 }
 0x818   : > { %v3619_v15 = vpop.f32.mrf.mxu1 }
 0x820   : > { %v3621_v12 = vpop.f32.mrf.mxu1 }
 0x821   : > { %v3915_v2 = vpack.c.bf16 %v3621_v12, %v3619_v15  ;;  %v7952_v12 = vld [vmem:[#allocation10 + $0x8] sm:$0xff] }
 0x823   : > { %6960 = vmatmul.msk.bf16.vlgmr.msra.gmra.mxu0 %vm2855_vm11, %v3915_v2  ;;  %v7960_v2 = vld [vmem:[#allocation10 + $0x48] sm:$0xff] }
 0x824   : > { %4201 = vmatpush.bf16.msra.mxu0 %v7954_v20  ;;  %4254 = vmatpush.bf16.msra.mxu1 %v7960_v2 }
 0x826   : > { %v3688_v21 = vpop.f32.mrf.mxu2 }
 0x828   : > { %4202 = vmatpush.bf16.msra.mxu0 %v7953_v1  ;;  %4255 = vmatpush.bf16.msra.mxu1 %v7959_v40 }
 0x82c   : > { %4203 = vmatpush.bf16.msra.mxu0 %v7952_v12 }
 0x82e   : > { %v3690_v13 = vpop.f32.mrf.mxu2 }
 0x830   : > { %v3659_v23 = vpop.f32.mrf.mxu1 }
 0x831   : > { %v3689_v18 = vadd.f32 %v3688_v21, %v3659_v23  ;;  %v7951_v21 = vld [vmem:[#allocation10] sm:$0xff] }
 0x832   : > { %4204 = vmatpush.bf16.msra.mxu0 %v7951_v21 }
 0x838   : > { %v3661_v54 = vpop.f32.mrf.mxu1 }
 0x839   : > { %v3691_v33 = vadd.f32 %v3690_v13, %v3661_v54 }
 0x840   : > { %v3723_v0 = vpop.f32.mrf.mxu0 }
 0x841   : > { %v3728_v46 = vadd.f32 %v3723_v0, %v3689_v18  ;;  %v7963_v18 = vld [vmem:[#allocation10 + $0x60] sm:$0xff] }
 0x848   : > { %v3725_v32 = vpop.f32.mrf.mxu0 }
 0x849   : > { %v3729_v56 = vadd.f32 %v3725_v32, %v3691_v33  ;;  %v7971_v33 = vld [vmem:[#allocation10 + $0xa0] sm:$0xff] }
 0x84a   : > { %4414 = vmatpush.bf16.msrb.mxu3 %v7971_v33 }
 0x856   : > { %v3760_v28 = vpop.f32.mrf.mxu2 }
 0x857   : > { %v3765_v62 = vadd.f32 %v3760_v28, %v3728_v46  ;;  %v7966_v28 = vld [vmem:[#allocation10 + $0x78] sm:$0xff]  ;;  %v7967_v46 = vld [vmem:[#allocation10 + $0x80] sm:$0xff] }
 0x85e   : > { %v3762_v19 = vpop.f32.mrf.mxu2 }
 0x85f   : > { %v3766_v36 = vadd.f32 %v3762_v19, %v3729_v56  ;;  %v7970_v19 = vld [vmem:[#allocation10 + $0x98] sm:$0xff] }
 0x860   : > { %v3797_v16 = vpop.f32.mrf.mxu0  ;;  %4358 = vmatpush.bf16.msrb.mxu1 %v7970_v19 }
 0x861   : > { %v3802_v39 = vadd.f32 %v3797_v16, %v3765_v62 }
 0x868   : > { %v3799_v49 = vpop.f32.mrf.mxu0 }
 0x869   : > { %v3803_v25 = vadd.f32 %v3799_v49, %v3766_v36  ;;  %v7965_v49 = vld [vmem:[#allocation10 + $0x70] sm:$0xff] }
 0x86a   : > { %v7977_v36 = vld [vmem:[#allocation10 + $0xd0] sm:$0xff] }
 0x876   : > { %v3834_v63 = vpop.f32.mrf.mxu2 }
 0x877   : > { %v3839_v3 = vadd.f32 %v3834_v63, %v3802_v39  ;;  %v7969_v63 = vld [vmem:[#allocation10 + $0x90] sm:$0xff] }
 0x878   : > { %4359 = vmatpush.bf16.msrb.mxu1 %v7969_v63 }
 0x87e   : > { %v3836_v34 = vpop.f32.mrf.mxu2 }
 0x87f   : > { %v3840_v44 = vadd.f32 %v3836_v34, %v3803_v25  ;;  %v7968_v34 = vld [vmem:[#allocation10 + $0x88] sm:$0xff]  ;;  %v7975_v25 = vld [vmem:[#allocation10 + $0xc0] sm:$0xff] }
 0x880   : > { %v3871_v14 = vpop.f32.mrf.mxu0  ;;  %4360 = vmatpush.bf16.msrb.mxu1 %v7968_v34 }
 0x881   : > { %v3876_v42 = vadd.f32 %v3871_v14, %v3839_v3  ;;  %v7964_v14 = vld [vmem:[#allocation10 + $0x68] sm:$0xff]  ;;  %v7978_v3 = vld [vmem:[#allocation10 + $0xd8] sm:$0xff] }
 0x884   : > { %4361 = vmatpush.bf16.msrb.mxu1 %v7967_v46  ;;  %v8199_v46 = vld [vmem:[%s9457_s12] ss:$0 sm:$0xff] }
 0x888   : > { %v3873_v27 = vpop.f32.mrf.mxu0 }
 0x889   : > { %v3877_v59 = vadd.f32 %v3873_v27, %v3840_v44 }
 0x896   : > { %v3908_v31 = vpop.f32.mrf.mxu2 }
 0x897   : > { %v3913_v60 = vadd.f32 %v3908_v31, %v3876_v42 }
 0x89e   : > { %v3910_v7 = vpop.f32.mrf.mxu2 }
 0x89f   : > { %v3914_v37 = vadd.f32 %v3910_v7, %v3877_v59  ;;  %v7980_v59 = vld [vmem:[#allocation10 + $0xe8] sm:$0xff] }
 0x8a0   : > { %v3945_v48 = vpop.f32.mrf.mxu0 }
 0x8a1   : > { %v3950_v41 = vadd.f32 %v3945_v48, %v3913_v60  ;;  %v7976_v48 = vld [vmem:[#allocation10 + $0xc8] sm:$0xff] }
 0x8a3   : > { %v3956_v52 = vadd.f32 %v8198_v51, %v3950_v41  ;;  %v7982_v41 = vld [vmem:[#allocation10 + $0xf8] sm:$0xff] }
 0x8a5   : > { %v3960_v53 = vmul.f32 0.2, %v3956_v52  ;;  %vm3958_vm6 = vcmp.ge.f32.partialorder %v3956_v52, 0.0 }
 0x8a7   : > { %v3962_v8 = vsel %vm3958_vm6, %v3956_v52, %v3960_v53  ;;  %v7985_v53 = vld [vmem:[#allocation10 + $0x110] sm:$0xff] }
 0x8a8   : > { %v3947_v47 = vpop.f32.mrf.mxu0 }
 0x8a9   : > { %v3951_v57 = vadd.f32 %v3947_v47, %v3914_v37  ;;  %v7979_v37 = vld [vmem:[#allocation10 + $0xe0] sm:$0xff] }
 0x8ab   : > { %v3957_v11 = vadd.f32 %v8198_v51, %v3951_v57  ;;  %v7981_v51 = vld [vmem:[#allocation10 + $0xf0] sm:$0xff]  ;;  %v7986_v57 = vld [vmem:[#allocation10 + $0x118] sm:$0xff] }
 0x8ac   : > { %4570 = vmatpush.bf16.msra.mxu3 %v7986_v57 }
 0x8ad   : > { %vm3959_vm7 = vcmp.ge.f32.partialorder %v3957_v11, 0.0  ;;  %v3961_v6 = vmul.f32 0.2, %v3957_v11 }
 0x8af   : > { %v3963_v43 = vsel %vm3959_vm7, %v3957_v11, %v3961_v6  ;;  %v7984_v6 = vld [vmem:[#allocation10 + $0x108] sm:$0xff] }
 0x8b0   : > { %v3964_v22 = vpack.c.bf16 %v3963_v43, %v3962_v8  ;;  %4571 = vmatpush.bf16.msra.mxu3 %v7985_v53  ;;  %v7983_v8 = vld [vmem:[#allocation10 + $0x100] sm:$0xff] }
 0x8b2   : > { %4063 = vmatpush.bf16.msrb.mxu2 %v3964_v22 }
 0x8b4   : > { %4572 = vmatpush.bf16.msra.mxu3 %v7984_v6  ;;  %v7991_v6 = vld [vmem:[#allocation13] sm:$0xff] }
 0x8b5   : > { %6997 = vmatmul.msk.bf16.vlgmr.msrb.gmra.mxu2 %vm4028_vm8, %v7942_v35 }
 0x8b8   : > { %4573 = vmatpush.bf16.msra.mxu3 %v7983_v8  ;;  %v7996_v8 = vld [vmem:[#allocation13 + $0x28] sm:$0xff] }
 0x8c5   : > { %6998 = vmatmul.msk.bf16.gmra.mxu2 %vm4028_vm8, %v7943_v50 }
 0x8d5   : > { %6999 = vmatmul.msk.bf16.gmra.mxu2 %vm4028_vm8, %v7944_v58 }
 0x8e5   : > { %7000 = vmatmul.msk.bf16.gmra.mxu2 %vm4028_vm8, %v7945_v26 }
 0x8f5   : > { %7001 = vmatmul.msk.bf16.gmra.mxu2 %vm4028_vm8, %v7946_v45 }
 0x905   : > { %7002 = vmatmul.msk.bf16.gmra.mxu2 %vm4028_vm8, %v7947_v30 }
 0x915   : > { %7003 = vmatmul.msk.bf16.gmra.mxu2 %vm4028_vm8, %v7948_v5 }
 0x925   : > { %7004 = vmatmul.msk.bf16.gmra.mxu2 %vm4028_vm8, %v7949_v9 }
 0x935   : > { %7005 = vmatmul.msk.bf16.gmra.mxu2 %vm4028_vm8, %v7950_v38 }
 0x938   : > { %v4065_v15 = vpop.f32.mrf.mxu2 }
 0x940   : > { %v4067_v0 = vpop.f32.mrf.mxu2 }
 0x941   : > { %v4110_v27 = vpack.c.bf16 %v4067_v0, %v4065_v15 }
 0x948   : > { %v4070_v13 = vpop.f32.mrf.mxu2 }
 0x950   : > { %v4072_v32 = vpop.f32.mrf.mxu2 }
 0x951   : > { %v4119_v16 = vpack.c.bf16 %v4072_v32, %v4070_v13 }
 0x953   : > { %7022 = vmatmul.msk.bf16.vlgmr.msrb.gmra.mxu0 %vm2528_vm10, %v4119_v16 }
 0x954   : > { %4305 = vmatpush.bf16.msrb.mxu0 %v7966_v28 }
 0x958   : > { %v4075_v23 = vpop.f32.mrf.mxu2  ;;  %4306 = vmatpush.bf16.msrb.mxu0 %v7965_v49 }
 0x95c   : > { %4307 = vmatpush.bf16.msrb.mxu0 %v7964_v14 }
 0x960   : > { %v4077_v54 = vpop.f32.mrf.mxu2  ;;  %4308 = vmatpush.bf16.msrb.mxu0 %v7963_v18 }
 0x961   : > { %v4211_v62 = vpack.c.bf16 %v4077_v54, %v4075_v23 }
 0x963   : > { %7039 = vmatmul.msk.bf16.vlgmr.msra.gmra.mxu0 %vm2528_vm10, %v4110_v27  ;;  %7056 = vmatmul.msk.bf16.vlgmr.msra.gmra.mxu1 %vm2528_vm10, %v4211_v62 }
 0x964   : > { %4464 = vmatpush.bf16.msra.mxu0 %v7978_v3  ;;  %4517 = vmatpush.bf16.msra.mxu1 %v7982_v41  ;;  %v7989_v41 = vld [vmem:[#allocation11 + $0x10] sm:$0xff] }
 0x968   : > { %v4080_v31 = vpop.f32.mrf.mxu2  ;;  %4465 = vmatpush.bf16.msra.mxu0 %v7977_v36  ;;  %4518 = vmatpush.bf16.msra.mxu1 %v7981_v51  ;;  %v7994_v51 = vld [vmem:[#allocation13 + $0x18] sm:$0xff] }
 0x96c   : > { %4466 = vmatpush.bf16.msra.mxu0 %v7976_v48  ;;  %4519 = vmatpush.bf16.msra.mxu1 %v7980_v59  ;;  %v7993_v59 = vld [vmem:[#allocation13 + $0x10] sm:$0xff] }
 0x970   : > { %v4082_v39 = vpop.f32.mrf.mxu2  ;;  %4467 = vmatpush.bf16.msra.mxu0 %v7975_v25  ;;  %4520 = vmatpush.bf16.msra.mxu1 %v7979_v37  ;;  %v7992_v37 = vld [vmem:[#allocation13 + $0x8] sm:$0xff] }
 0x971   : > { %v4264_v56 = vpack.c.bf16 %v4082_v39, %v4080_v31 }
 0x973   : > { %7073 = vmatmul.msk.bf16.vlgmr.msrb.gmra.mxu0 %vm2528_vm10, %v4264_v56 }
 0x978   : > { %v4085_v42 = vpop.f32.mrf.mxu2 }
 0x980   : > { %v4087_v60 = vpop.f32.mrf.mxu2 }
 0x981   : > { %v4317_v44 = vpack.c.bf16 %v4087_v60, %v4085_v42  ;;  %v7987_v60 = vld [vmem:[#allocation11] sm:$0xff] }
 0x983   : > { %7090 = vmatmul.msk.bf16.vlgmr.msrb.gmra.mxu1 %vm2528_vm10, %v4317_v44  ;;  %v7988_v44 = vld [vmem:[#allocation11 + $0x8] sm:$0xff] }
 0x988   : > { %v4090_v7 = vpop.f32.mrf.mxu2 }
 0x990   : > { %v4092_v52 = vpop.f32.mrf.mxu2 }
 0x991   : > { %v4370_v47 = vpack.c.bf16 %v4092_v52, %v4090_v7  ;;  %v7998_v7 = vld [vmem:[#allocation13 + $0x38] sm:$0xff] }
 0x992   : > { %4725 = vmatpush.bf16.msrb.mxu1 %v7998_v7  ;;  %v7990_v52 = vld [vmem:[#allocation11 + $0x18] sm:$0xff] }
 0x993   : > { %7107 = vmatmul.msk.bf16.vlgmr.msrb.gmra.mxu3 %vm2528_vm10, %v4370_v47  ;;  %v4603_v47 = vld [vmem:[#allocation11 + $0x20] sm:$0xf] }
 0x994   : > { %4765 = vmatpush.bf16.msrb.mxu3 %v7994_v51  ;;  %v4621_v57 = vunpack.c.l.b16 %v4603_v47 }
 0x996   : > { %v4626_v53 = vpack.c.b16 %v4621_v57, %v4621_v57 }
 0x998   : > { %v4095_v11 = vpop.f32.mrf.mxu2  ;;  %4766 = vmatpush.bf16.msrb.mxu3 %v7993_v59 }
 0x99c   : > { %4767 = vmatpush.bf16.msrb.mxu3 %v7992_v37 }
 0x9a0   : > { %v4097_v43 = vpop.f32.mrf.mxu2  ;;  %4768 = vmatpush.bf16.msrb.mxu3 %v7991_v6 }
 0x9a1   : > { %v4423_v22 = vpack.c.bf16 %v4097_v43, %v4095_v11  ;;  %v7997_v11 = vld [vmem:[#allocation13 + $0x30] sm:$0xff]  ;;  %v7995_v43 = vld [vmem:[#allocation13 + $0x20] sm:$0xff] }
 0x9a2   : > { %4726 = vmatpush.bf16.msrb.mxu1 %v7997_v11 }
 0x9a3   : > { %7124 = vmatmul.msk.bf16.vlgmr.msra.gmra.mxu0 %vm2528_vm10, %v4423_v22  ;;  %v8002_v22 = vld [vmem:[#allocation13 + $0x58] sm:$0xff] }
 0x9a6   : > { %4727 = vmatpush.bf16.msrb.mxu1 %v7996_v8 }
 0x9a8   : > { %v4100_v35 = vpop.f32.mrf.mxu2 }
 0x9aa   : > { %4728 = vmatpush.bf16.msrb.mxu1 %v7995_v43 }
 0x9b0   : > { %v4102_v50 = vpop.f32.mrf.mxu2 }
 0x9b1   : > { %v4476_v58 = vpack.c.bf16 %v4102_v50, %v4100_v35  ;;  %v8006_v35 = vld [vmem:[#allocation13 + $0x78] sm:$0xff]  ;;  %v8001_v50 = vld [vmem:[#allocation13 + $0x50] sm:$0xff] }
 0x9b3   : > { %7141 = vmatmul.msk.bf16.vlgmr.msra.gmra.mxu1 %vm2528_vm10, %v4476_v58  ;;  %v8005_v58 = vld [vmem:[#allocation13 + $0x70] sm:$0xff] }
 0x9b4   : > { %4815 = vmatpush.bf16.msra.mxu1 %v8002_v22 }
 0x9b8   : > { %v4105_v26 = vpop.f32.mrf.mxu2  ;;  %4816 = vmatpush.bf16.msra.mxu1 %v8001_v50 }
 0x9c0   : > { %v4107_v45 = vpop.f32.mrf.mxu2 }
 0x9c1   : > { %v4529_v4 = vpack.c.bf16 %v4107_v45, %v4105_v26  ;;  %v8000_v26 = vld [vmem:[#allocation13 + $0x48] sm:$0xff] }
 0x9c2   : > { %v8004_v45 = vld [vmem:[#allocation13 + $0x68] sm:$0xff]  ;;  %4817 = vmatpush.bf16.msra.mxu1 %v8000_v26 }
 0x9c3   : > { %7158 = vmatmul.msk.bf16.vlgmr.msra.gmra.mxu3 %vm2528_vm10, %v4529_v4  ;;  %v7999_v4 = vld [vmem:[#allocation13 + $0x40] sm:$0xff] }
 0x9c4   : > { %4866 = vmatpush.bf16.msra.mxu3 %v8006_v35 }
 0x9c6   : > { %4818 = vmatpush.bf16.msra.mxu1 %v7999_v4  ;;  %v8200_v4 = vld [vmem:[%s9460_s15] ss:$0 sm:$0xff] }
 0x9c8   : > { %4867 = vmatpush.bf16.msra.mxu3 %v8005_v58 }
 0x9cc   : > { %4868 = vmatpush.bf16.msra.mxu3 %v8004_v45 }
 0x9d0   : > { %v4165_v30 = vpop.f32.mrf.mxu0 }
 0x9d8   : > { %v4167_v5 = vpop.f32.mrf.mxu0 }
 0x9e0   : > { %v4206_v9 = vpop.f32.mrf.mxu0  ;;  %v4257_v29 = vpop.f32.mrf.mxu1 }
 0x9e1   : > { %v4207_v17 = vadd.f32 %v4206_v9, %v4165_v30  ;;  %v8003_v30 = vld [vmem:[#allocation13 + $0x60] sm:$0xff]  ;;  %v8014_v9 = vld [vmem:[#allocation13 + $0xb8] sm:$0xff] }
 0x9e2   : > { %4869 = vmatpush.bf16.msra.mxu3 %v8003_v30 }
 0x9e3   : > { %v4262_v15 = vadd.f32 %v4257_v29, %v4207_v17 }
 0x9e8   : > { %v4208_v55 = vpop.f32.mrf.mxu0  ;;  %v4259_v10 = vpop.f32.mrf.mxu1 }
 0x9e9   : > { %v4209_v21 = vadd.f32 %v4208_v55, %v4167_v5  ;;  %v8013_v55 = vld [vmem:[#allocation13 + $0xb0] sm:$0xff] }
 0x9eb   : > { %v4263_v32 = vadd.f32 %v4259_v10, %v4209_v21 }
 0x9f0   : > { %v4310_v61 = vpop.f32.mrf.mxu0 }
 0x9f1   : > { %v4315_v40 = vadd.f32 %v4310_v61, %v4262_v15  ;;  %v8010_v61 = vld [vmem:[#allocation13 + $0x98] sm:$0xff]  ;;  %v8008_v15 = vld [vmem:[#allocation13 + $0x88] sm:$0xff] }
 0x9f8   : > { %v4312_v24 = vpop.f32.mrf.mxu0 }
 0x9f9   : > { %v4316_v16 = vadd.f32 %v4312_v24, %v4263_v32  ;;  %v8009_v24 = vld [vmem:[#allocation13 + $0x90] sm:$0xff] }
 0x9fa   : > { %v8017_v32 = vld [vmem:[#allocation13 + $0xd0] sm:$0xff] }
 0xa00   : > { %v4363_v38 = vpop.f32.mrf.mxu1 }
 0xa01   : > { %v4368_v13 = vadd.f32 %v4363_v38, %v4315_v40  ;;  %v8012_v38 = vld [vmem:[#allocation13 + $0xa8] sm:$0xff]  ;;  %v8018_v40 = vld [vmem:[#allocation13 + $0xd8] sm:$0xff] }
 0xa08   : > { %v4365_v1 = vpop.f32.mrf.mxu1 }
 0xa09   : > { %v4369_v63 = vadd.f32 %v4365_v1, %v4316_v16  ;;  %v8011_v1 = vld [vmem:[#allocation13 + $0xa0] sm:$0xff] }
 0xa16   : > { %v4416_v20 = vpop.f32.mrf.mxu3 }
 0xa17   : > { %v4421_v28 = vadd.f32 %v4416_v20, %v4368_v13 }
 0xa1e   : > { %v4418_v12 = vpop.f32.mrf.mxu3 }
 0xa1f   : > { %v4422_v34 = vadd.f32 %v4418_v12, %v4369_v63  ;;  %v8007_v12 = vld [vmem:[#allocation13 + $0x80] sm:$0xff] }
 0xa20   : > { %v4469_v2 = vpop.f32.mrf.mxu0  ;;  %v8015_v63 = vld [vmem:[#allocation13 + $0xc0] sm:$0xff] }
 0xa21   : > { %v4474_v19 = vadd.f32 %v4469_v2, %v4421_v28  ;;  %v8021_v28 = vld [vmem:[#allocation13 + $0xf0] sm:$0xff] }
 0xa28   : > { %v4471_v14 = vpop.f32.mrf.mxu0 }
 0xa29   : > { %v4475_v27 = vadd.f32 %v4471_v14, %v4422_v34 }
 0xa30   : > { %v4522_v0 = vpop.f32.mrf.mxu1 }
 0xa31   : > { %v4527_v23 = vadd.f32 %v4522_v0, %v4474_v19  ;;  %v8022_v0 = vld [vmem:[#allocation13 + $0xf8] sm:$0xff]  ;;  %v8016_v19 = vld [vmem:[#allocation13 + $0xc8] sm:$0xff] }
 0xa38   : > { %v4524_v54 = vpop.f32.mrf.mxu1 }
 0xa39   : > { %v4528_v62 = vadd.f32 %v4524_v54, %v4475_v27  ;;  %v8025_v54 = vld [vmem:[#allocation13 + $0x110] sm:$0xff] }
 0xa46   : > { %v4575_v49 = vpop.f32.mrf.mxu3 }
 0xa47   : > { %v4580_v18 = vadd.f32 %v4575_v49, %v4527_v23  ;;  %v8020_v49 = vld [vmem:[#allocation13 + $0xe8] sm:$0xff]  ;;  %v8019_v23 = vld [vmem:[#allocation13 + $0xe0] sm:$0xff] }
 0xa49   : > { %v4586_v31 = vadd.f32 %v8199_v46, %v4580_v18  ;;  %v8026_v18 = vld [vmem:[#allocation13 + $0x118] sm:$0xff] }
 0xa4b   : > { %v4590_v56 = vmul.f32 0.2, %v4586_v31  ;;  %vm4588_vm9 = vcmp.ge.f32.partialorder %v4586_v31, 0.0 }
 0xa4d   : > { %v4592_v42 = vsel %vm4588_vm9, %v4586_v31, %v4590_v56  ;;  %v8023_v31 = vld [vmem:[#allocation13 + $0x100] sm:$0xff] }
 0xa4e   : > { %v4577_v33 = vpop.f32.mrf.mxu3 }
 0xa4f   : > { %v4581_v39 = vadd.f32 %v4577_v33, %v4528_v62  ;;  %v8024_v62 = vld [vmem:[#allocation13 + $0x108] sm:$0xff] }
 0xa51   : > { %v4587_v3 = vadd.f32 %v8199_v46, %v4581_v39 }
 0xa53   : > { %vm4589_vm11 = vcmp.ge.f32.partialorder %v4587_v3, 0.0  ;;  %v4591_v36 = vmul.f32 0.2, %v4587_v3 }
 0xa55   : > { %v4593_v48 = vsel %vm4589_vm11, %v4587_v3, %v4591_v36 }
 0xa56   : > { %v4594_v25 = vpack.c.bf16 %v4593_v48, %v4592_v42 }
 0xa58   : > { %4649 = vmatpush.bf16.msrb.mxu0 %v4594_v25 }
 0xa5b   : > { %7175 = vmatmul.msk.bf16.vlgmr.msrb.gmra.mxu0 %vm4028_vm8, %v7987_v60 }
 0xa6b   : > { %7176 = vmatmul.msk.bf16.gmra.mxu0 %vm4028_vm8, %v7988_v44 }
 0xa7b   : > { %7177 = vmatmul.msk.bf16.gmra.mxu0 %vm4028_vm8, %v7989_v41 }
 0xa8b   : > { %7178 = vmatmul.msk.bf16.gmra.mxu0 %vm4028_vm8, %v7990_v52 }
 0xa9b   : > { %7179 = vmatmul.msk.bf16.gmra.mxu0 %vm4028_vm8, %v4626_v53 }
 0xad8   : > { %v4651_v5 = vpop.f32.mrf.mxu0 }
 0xad9   : > { %v4675_v29 = vpack.c.bf16 %v4651_v5, %v4651_v5 }
 0xadb   : > { %7213 = vmatmul.msk.bf16.vlgmr.msrb.gmra.mxu3 %vm2528_vm10, %v4675_v29 }
 0xadc   : > { %4968 = vmatpush.bf16.msrb.mxu3 %v8014_v9 }
 0xae0   : > { %v4653_v10 = vpop.f32.mrf.mxu0  ;;  %4969 = vmatpush.bf16.msrb.mxu3 %v8013_v55 }
 0xae1   : > { %v4684_v20 = vpack.c.bf16 %v4653_v10, %v4653_v10 }
 0xae3   : > { %7196 = vmatmul.msk.bf16.vlgmr.msrb.gmra.mxu1 %vm2528_vm10, %v4684_v20  ;;  %v8027_v20 = vld [vmem:[#allocation14] sm:$0xff] }
 0xae4   : > { %4917 = vmatpush.bf16.msrb.mxu1 %v8010_v61  ;;  %4970 = vmatpush.bf16.msrb.mxu3 %v8012_v38 }
 0xae8   : > { %v4656_v17 = vpop.f32.mrf.mxu0  ;;  %4918 = vmatpush.bf16.msrb.mxu1 %v8009_v24  ;;  %4971 = vmatpush.bf16.msrb.mxu3 %v8011_v1  ;;  %v8028_v24 = vld [vmem:[#allocation14 + $0x8] sm:$0xff]  ;;  %v8029_v1 = vld [vmem:[#allocation14 + $0x10] sm:$0xff] }
 0xae9   : > { %v4774_v2 = vpack.c.bf16 %v4656_v17, %v4656_v17  ;;  %v8038_v17 = vld [vmem:[%s9462_s17 + $0x38] sm:$0xff] }
 0xaec   : > { %4919 = vmatpush.bf16.msrb.mxu1 %v8008_v15  ;;  %v8046_v15 = vld [vmem:[%s9462_s17 + $0x78] sm:$0xff] }
 0xaed   : > { %5306 = vmatpush.bf16.msra.mxu0 %v8046_v15  ;;  %v8085_v15 = vld [vmem:[%s9462_s17 + $0x1b0] sm:$0xff] }
 0xaf0   : > { %v4658_v21 = vpop.f32.mrf.mxu0  ;;  %4920 = vmatpush.bf16.msrb.mxu1 %v8007_v12  ;;  %v8037_v12 = vld [vmem:[%s9462_s17 + $0x30] sm:$0xff] }
 0xaf1   : > { %v4825_v13 = vpack.c.bf16 %v4658_v21, %v4658_v21  ;;  %v8036_v21 = vld [vmem:[%s9462_s17 + $0x28] sm:$0xff] }
 0xaf3   : > { %7230 = vmatmul.msk.bf16.vlgmr.msra.gmra.mxu1 %vm2528_vm10, %v4774_v2  ;;  %7247 = vmatmul.msk.bf16.vlgmr.msra.gmra.mxu3 %vm2528_vm10, %v4825_v13  ;;  %v8045_v2 = vld [vmem:[%s9462_s17 + $0x70] sm:$0xff]  ;;  %v8043_v13 = vld [vmem:[%s9462_s17 + $0x60] sm:$0xff] }
 0xaf4   : > { %5019 = vmatpush.bf16.msra.mxu1 %v8018_v40  ;;  %5070 = vmatpush.bf16.msra.mxu3 %v8022_v0  ;;  %v8044_v40 = vld [vmem:[%s9462_s17 + $0x68] sm:$0xff]  ;;  %v8035_v0 = vld [vmem:[%s9462_s17 + $0x20] sm:$0xff] }
 0xaf5   : > { %5307 = vmatpush.bf16.msra.mxu0 %v8045_v2  ;;  %v8089_v2 = vld [vmem:[%s9462_s17 + $0x1d0] sm:$0xff] }
 0xaf8   : > { %v4661_v16 = vpop.f32.mrf.mxu0  ;;  %5020 = vmatpush.bf16.msra.mxu1 %v8017_v32  ;;  %5071 = vmatpush.bf16.msra.mxu3 %v8021_v28  ;;  %v8030_v32 = vld [vmem:[#allocation14 + $0x18] sm:$0xff] }
 0xaf9   : > { %v4876_v14 = vpack.c.bf16 %v4661_v16, %v4661_v16  ;;  %5308 = vmatpush.bf16.msra.mxu0 %v8044_v40  ;;  %v8034_v28 = vld [vmem:[%s9462_s17 + $0x18] sm:$0xff]  ;;  %v8084_v40 = vld [vmem:[%s9462_s17 + $0x1a8] sm:$0xff] }
 0xafa   : > { %v8042_v16 = vld [vmem:[%s9462_s17 + $0x58] sm:$0xff] }
 0xafc   : > { %5021 = vmatpush.bf16.msra.mxu1 %v8016_v19  ;;  %5072 = vmatpush.bf16.msra.mxu3 %v8020_v49  ;;  %v8033_v19 = vld [vmem:[%s9462_s17 + $0x10] sm:$0xff]  ;;  %v5148_v49 = vld [vmem:[#allocation14 + $0x20] sm:$0xf] }
 0xafd   : > { %5309 = vmatpush.bf16.msra.mxu0 %v8043_v13  ;;  %v8098_v13 = vld [vmem:[%s9462_s17 + $0x218] sm:$0xff] }
 0xb00   : > { %v4663_v34 = vpop.f32.mrf.mxu0  ;;  %5022 = vmatpush.bf16.msra.mxu1 %v8015_v63  ;;  %5073 = vmatpush.bf16.msra.mxu3 %v8019_v23  ;;  %v5166_v63 = vunpack.c.l.b16 %v5148_v49 }
 0xb01   : > { %v4927_v46 = vpack.c.bf16 %v4663_v34, %v4663_v34  ;;  %5310 = vmatpush.bf16.msra.mxu0 %v8042_v16  ;;  %v8054_v34 = vld [vmem:[%s9462_s17 + $0xb8] sm:$0xff]  ;;  %v8097_v16 = vld [vmem:[%s9462_s17 + $0x210] sm:$0xff] }
 0xb02   : > { %v5171_v23 = vpack.c.b16 %v5166_v63, %v5166_v63  ;;  %v8082_v63 = vld [vmem:[%s9462_s17 + $0x198] sm:$0xff] }
 0xb03   : > { %7264 = vmatmul.msk.bf16.vlgmr.msrb.gmra.mxu1 %vm2528_vm10, %v4876_v14  ;;  %7281 = vmatmul.msk.bf16.vlgmr.msrb.gmra.mxu3 %vm2528_vm10, %v4927_v46  ;;  %v8041_v14 = vld [vmem:[%s9462_s17 + $0x50] sm:$0xff] }
 0xb04   : > { %5121 = vmatpush.bf16.msrb.mxu1 %v8026_v18  ;;  %5367 = vmatpush.bf16.msrb.mxu3 %v8038_v17  ;;  %v8040_v18 = vld [vmem:[%s9462_s17 + $0x48] sm:$0xff]  ;;  %v8053_v46 = vld [vmem:[%s9462_s17 + $0xb0] sm:$0xff]  ;;  %v8090_v17 = vld [vmem:[%s9462_s17 + $0x1d8] sm:$0xff] }
 0xb05   : > { %5311 = vmatpush.bf16.msra.mxu0 %v8041_v14  ;;  %v8096_v14 = vld [vmem:[%s9462_s17 + $0x208] sm:$0xff] }
 0xb08   : > { %v4666_v27 = vpop.f32.mrf.mxu0  ;;  %5122 = vmatpush.bf16.msrb.mxu1 %v8025_v54  ;;  %5368 = vmatpush.bf16.msrb.mxu3 %v8037_v12  ;;  %v8039_v54 = vld [vmem:[%s9462_s17 + $0x40] sm:$0xff] }
 0xb09   : > { %v4978_v33 = vpack.c.bf16 %v4666_v27, %v4666_v27  ;;  %5312 = vmatpush.bf16.msra.mxu0 %v8040_v18  ;;  %v8062_v27 = vld [vmem:[%s9462_s17 + $0xf8] sm:$0xff]  ;;  %v8099_v12 = vld [vmem:[%s9462_s17 + $0x220] sm:$0xff] }
 0xb0a   : > { %v8095_v18 = vld [vmem:[%s9462_s17 + $0x200] sm:$0xff] }
 0xb0c   : > { %5123 = vmatpush.bf16.msrb.mxu1 %v8024_v62  ;;  %5369 = vmatpush.bf16.msrb.mxu3 %v8036_v21  ;;  %v8052_v62 = vld [vmem:[%s9462_s17 + $0xa8] sm:$0xff] }
 0xb0d   : > { %5313 = vmatpush.bf16.msra.mxu0 %v8039_v54  ;;  %v8080_v54 = vld [vmem:[%s9462_s17 + $0x188] sm:$0xff] }
 0xb10   : > { %v4668_v39 = vpop.f32.mrf.mxu0  ;;  %5124 = vmatpush.bf16.msrb.mxu1 %v8023_v31  ;;  %5370 = vmatpush.bf16.msrb.mxu3 %v8035_v0  ;;  %v8061_v31 = vld [vmem:[%s9462_s17 + $0xf0] sm:$0xff] }
 0xb11   : > { %v5029_v56 = vpack.c.bf16 %v4668_v39, %v4668_v39  ;;  %5526 = vmatpush.bf16.msrb.mxu0 %v8062_v27  ;;  %v8032_v39 = vld [vmem:[%s9462_s17 + $0x8] sm:$0xff] }
 0xb13   : > { %7298 = vmatmul.msk.bf16.vlgmr.msra.gmra.mxu1 %vm2528_vm10, %v4978_v33  ;;  %7315 = vmatmul.msk.bf16.vlgmr.msra.gmra.mxu3 %vm2528_vm10, %v5029_v56  ;;  %v8051_v33 = vld [vmem:[%s9462_s17 + $0xa0] sm:$0xff]  ;;  %v8060_v56 = vld [vmem:[%s9462_s17 + $0xe8] sm:$0xff] }
 0xb14   : > { %5371 = vmatpush.bf16.msrb.mxu3 %v8034_v28  ;;  %5446 = vmatpush.bf16.msra.mxu1 %v8054_v34  ;;  %v8083_v28 = vld [vmem:[%s9462_s17 + $0x1a0] sm:$0xff]  ;;  %v8081_v34 = vld [vmem:[%s9462_s17 + $0x190] sm:$0xff] }
 0xb15   : > { %5527 = vmatpush.bf16.msrb.mxu0 %v8061_v31 }
 0xb18   : > { %v4671_v3 = vpop.f32.mrf.mxu0  ;;  %5372 = vmatpush.bf16.msrb.mxu3 %v8033_v19  ;;  %5447 = vmatpush.bf16.msra.mxu1 %v8053_v46  ;;  %v8087_v19 = vld [vmem:[%s9462_s17 + $0x1c0] sm:$0xff] }
 0xb19   : > { %v5080_v36 = vpack.c.bf16 %v4671_v3, %v4671_v3  ;;  %v8050_v3 = vld [vmem:[%s9462_s17 + $0x98] sm:$0xff]  ;;  %5528 = vmatpush.bf16.msrb.mxu0 %v8060_v56 }
 0xb1c   : > { %5448 = vmatpush.bf16.msra.mxu1 %v8052_v62  ;;  %5373 = vmatpush.bf16.msrb.mxu3 %v8032_v39  ;;  %v8079_v62 = vld [vmem:[%s9462_s17 + $0x180] sm:$0xff] }
 0xb20   : > { %v4673_v42 = vpop.f32.mrf.mxu0  ;;  %5449 = vmatpush.bf16.msra.mxu1 %v8051_v33 }
 0xb21   : > { %v8070_v42 = vld [vmem:[%s9462_s17 + $0x138] sm:$0xff] }
 0xb23   : > { %7332 = vmatmul.msk.bf16.vlgmr.msrb.gmra.mxu1 %vm2528_vm10, %v5080_v36  ;;  %v8031_v36 = vld [vmem:[%s9462_s17] sm:$0xff] }
 0xb24   : > { %5450 = vmatpush.bf16.msra.mxu1 %v8050_v3  ;;  %5374 = vmatpush.bf16.msrb.mxu3 %v8031_v36 }
 0xb28   : > { %5606 = vmatpush.bf16.msra.mxu3 %v8070_v42 }
 0xb5e   : > { %v4770_v48 = vpop.f32.mrf.mxu3 }
 0xb60   : > { %v4730_v25 = vpop.f32.mrf.mxu1 }
 0xb61   : > { %v4771_v11 = vadd.f32 %v4770_v48, %v4730_v25  ;;  %v8059_v48 = vld [vmem:[%s9462_s17 + $0xe0] sm:$0xff]  ;;  %v8049_v25 = vld [vmem:[%s9462_s17 + $0x90] sm:$0xff] }
 0xb62   : > { %5529 = vmatpush.bf16.msrb.mxu0 %v8059_v48  ;;  %5451 = vmatpush.bf16.msra.mxu1 %v8049_v25 }
 0xb66   : > { %v4772_v60 = vpop.f32.mrf.mxu3 }
 0xb67   : > { %v8058_v60 = vld [vmem:[%s9462_s17 + $0xd8] sm:$0xff] }
 0xb68   : > { %v4732_v44 = vpop.f32.mrf.mxu1  ;;  %5530 = vmatpush.bf16.msrb.mxu0 %v8058_v60 }
 0xb69   : > { %v8048_v44 = vld [vmem:[%s9462_s17 + $0x88] sm:$0xff] }
 0xb6a   : > { %5452 = vmatpush.bf16.msra.mxu1 %v8048_v44 }
 0xb70   : > { %v4820_v41 = vpop.f32.mrf.mxu1 }
 0xb71   : > { %v4824_v6 = vadd.f32 %v4820_v41, %v4771_v11  ;;  %v8069_v41 = vld [vmem:[%s9462_s17 + $0x130] sm:$0xff]  ;;  %v8055_v11 = vld [vmem:[%s9462_s17 + $0xc0] sm:$0xff] }
 0xb72   : > { %5607 = vmatpush.bf16.msra.mxu3 %v8069_v41 }
 0xb76   : > { %v4871_v51 = vpop.f32.mrf.mxu3 }
 0xb77   : > { %v4875_v43 = vadd.f32 %v4871_v51, %v4824_v6  ;;  %v8068_v51 = vld [vmem:[%s9462_s17 + $0x128] sm:$0xff] }
 0xb78   : > { %v4822_v7 = vpop.f32.mrf.mxu1  ;;  %5608 = vmatpush.bf16.msra.mxu3 %v8068_v51  ;;  %v8076_v6 = vld [vmem:[%s9462_s17 + $0x168] sm:$0xff] }
 0xb79   : > { %v8057_v7 = vld [vmem:[%s9462_s17 + $0xd0] sm:$0xff] }
 0xb7a   : > { %5531 = vmatpush.bf16.msrb.mxu0 %v8057_v7 }
 0xb7e   : > { %v4873_v59 = vpop.f32.mrf.mxu3 }
 0xb7f   : > { %v8047_v59 = vld [vmem:[%s9462_s17 + $0x80] sm:$0xff] }
 0xb80   : > { %v4922_v37 = vpop.f32.mrf.mxu1  ;;  %5453 = vmatpush.bf16.msra.mxu1 %v8047_v59 }
 0xb81   : > { %v4926_v35 = vadd.f32 %v4922_v37, %v4875_v43  ;;  %v8078_v37 = vld [vmem:[%s9462_s17 + $0x178] sm:$0xff]  ;;  %v8075_v43 = vld [vmem:[%s9462_s17 + $0x160] sm:$0xff] }
 0xb84   : > { %5686 = vmatpush.bf16.msrb.mxu1 %v8078_v37 }
 0xb86   : > { %v4973_v52 = vpop.f32.mrf.mxu3 }
 0xb87   : > { %v4977_v50 = vadd.f32 %v4973_v52, %v4926_v35  ;;  %v8056_v52 = vld [vmem:[%s9462_s17 + $0xc8] sm:$0xff]  ;;  %v8094_v35 = vld [vmem:[%s9462_s17 + $0x1f8] sm:$0xff] }
 0xb88   : > { %v4924_v47 = vpop.f32.mrf.mxu1  ;;  %5532 = vmatpush.bf16.msrb.mxu0 %v8056_v52 }
 0xb89   : > { %v8067_v47 = vld [vmem:[%s9462_s17 + $0x120] sm:$0xff] }
 0xb8a   : > { %5609 = vmatpush.bf16.msra.mxu3 %v8067_v47 }
 0xb8c   : > { %5533 = vmatpush.bf16.msrb.mxu0 %v8055_v11 }
 0xb8e   : > { %v4975_v57 = vpop.f32.mrf.mxu3 }
 0xb8f   : > { %v8077_v57 = vld [vmem:[%s9462_s17 + $0x170] sm:$0xff] }
 0xb90   : > { %v5024_v53 = vpop.f32.mrf.mxu1  ;;  %5687 = vmatpush.bf16.msrb.mxu1 %v8077_v57 }
 0xb91   : > { %v5028_v58 = vadd.f32 %v5024_v53, %v4977_v50  ;;  %v8066_v53 = vld [vmem:[%s9462_s17 + $0x118] sm:$0xff] }
 0xb92   : > { %5610 = vmatpush.bf16.msra.mxu3 %v8066_v53  ;;  %v8074_v50 = vld [vmem:[%s9462_s17 + $0x158] sm:$0xff] }
 0xb94   : > { %5688 = vmatpush.bf16.msrb.mxu1 %v8076_v6 }
 0xb96   : > { %v5075_v8 = vpop.f32.mrf.mxu3 }
 0xb97   : > { %v5079_v45 = vadd.f32 %v5075_v8, %v5028_v58  ;;  %v8065_v8 = vld [vmem:[%s9462_s17 + $0x110] sm:$0xff]  ;;  %v8063_v58 = vld [vmem:[%s9462_s17 + $0x100] sm:$0xff] }
 0xb98   : > { %v5026_v22 = vpop.f32.mrf.mxu1  ;;  %5611 = vmatpush.bf16.msra.mxu3 %v8065_v8  ;;  %5689 = vmatpush.bf16.msrb.mxu1 %v8075_v43 }
 0xb99   : > { %v8064_v22 = vld [vmem:[%s9462_s17 + $0x108] sm:$0xff] }
 0xb9c   : > { %5612 = vmatpush.bf16.msra.mxu3 %v8064_v22  ;;  %5690 = vmatpush.bf16.msrb.mxu1 %v8074_v50 }
 0xb9e   : > { %v5077_v26 = vpop.f32.mrf.mxu3 }
 0xb9f   : > { %v8093_v26 = vld [vmem:[%s9462_s17 + $0x1f0] sm:$0xff] }
 0xba0   : > { %v5126_v30 = vpop.f32.mrf.mxu1  ;;  %5613 = vmatpush.bf16.msra.mxu3 %v8063_v58 }
 0xba1   : > { %v5130_v5 = vadd.f32 %v5126_v30, %v5079_v45 }
 0xba3   : > { %v5135_v9 = vadd.f32 %v8200_v4, %v5130_v5  ;;  %v8073_v4 = vld [vmem:[%s9462_s17 + $0x150] sm:$0xff]  ;;  %v8102_v5 = vld [vmem:[%s9462_s17 + $0x238] sm:$0xff] }
 0xba4   : > { %5691 = vmatpush.bf16.msrb.mxu1 %v8073_v4 }
 0xba5   : > { %vm5136_vm10 = vcmp.ge.f32.partialorder %v5135_v9, 0.0  ;;  %v5137_v29 = vmul.f32 0.2, %v5135_v9 }
 0xba7   : > { %v5138_v55 = vsel %vm5136_vm10, %v5135_v9, %v5137_v29  ;;  %v8092_v9 = vld [vmem:[%s9462_s17 + $0x1e8] sm:$0xff] }
 0xba8   : > { %v5128_v10 = vpop.f32.mrf.mxu1  ;;  %v5139_v61 = vpack.c.bf16 %v5138_v55, %v5138_v55  ;;  %v8072_v29 = vld [vmem:[%s9462_s17 + $0x148] sm:$0xff]  ;;  %v8101_v55 = vld [vmem:[%s9462_s17 + $0x230] sm:$0xff] }
 0xba9   : > { %5692 = vmatpush.bf16.msrb.mxu1 %v8072_v29  ;;  %v8091_v10 = vld [vmem:[%s9462_s17 + $0x1e0] sm:$0xff] }
 0xbaa   : > { %v5188_v38 = vsel %vm1753_vm0, %v5139_v61, 0 }
 0xbab   : > { %5197 = vmatpush.bf16.msra.mxu2 %v5188_v38  ;;  %v8086_v38 = vld [vmem:[%s9462_s17 + $0x1b8] sm:$0xff] }
 0xbae   : > { %7349 = vmatmul.msk.bf16.vlgmr.msra.gmra.mxu2 %vm1740_vm1, %v8027_v20  ;;  %v8071_v20 = vld [vmem:[%s9462_s17 + $0x140] sm:$0xff] }
 0xbaf   : > { %5846 = vmatpush.bf16.msrb.mxu2 %v8094_v35  ;;  %5693 = vmatpush.bf16.msrb.mxu1 %v8071_v20 }
 0xbb3   : > { %5847 = vmatpush.bf16.msrb.mxu2 %v8093_v26 }
 0xbb7   : > { %5848 = vmatpush.bf16.msrb.mxu2 %v8092_v9 }
 0xbbb   : > { %5849 = vmatpush.bf16.msrb.mxu2 %v8091_v10  ;;  %v8202_v10 = vld [vmem:[%s9464_s19] ss:$0 sm:$0xff] }
 0xbbe   : > { %7350 = vmatmul.msk.bf16.gmra.mxu2 %vm1740_vm1, %v8028_v24 }
 0xbbf   : > { %5850 = vmatpush.bf16.msrb.mxu2 %v8090_v17  ;;  %v8203_v17 = vld [vmem:[#allocation2] ss:$0 sm:$0xff] }
 0xbc3   : > { %5851 = vmatpush.bf16.msrb.mxu2 %v8089_v2 }
 0xbce   : > { %7351 = vmatmul.msk.bf16.gmra.mxu2 %vm1740_vm1, %v8029_v1  ;;  %v8100_v1 = vld [vmem:[%s9462_s17 + $0x228] sm:$0xff] }
 0xbde   : > { %7352 = vmatmul.msk.bf16.gmra.mxu2 %vm1740_vm1, %v8030_v32  ;;  %v8088_v32 = vld [vmem:[%s9462_s17 + $0x1c8] sm:$0xff] }
 0xbdf   : > { %5852 = vmatpush.bf16.msrb.mxu2 %v8088_v32 }
 0xbe3   : > { %5853 = vmatpush.bf16.msrb.mxu2 %v8087_v19 }
 0xbee   : > { %7353 = vmatmul.msk.bf16.gmra.mxu2 %vm1740_vm1, %v5171_v23 }
 0xc31   : > { %v5199_v45 = vpop.f32.mrf.mxu2 }
 0xc32   : > { %v5223_v30 = vpack.c.bf16 %v5199_v45, %v5199_v45 }
 0xc34   : > { %5375 = vmatmul.bf16.vlgmr.msrb.gmra.mxu3 %v5223_v30  ;;  %v8201_v30 = vld [vmem:[%s9463_s18] ss:$0 sm:$0xff] }
 0xc35   : > { %5926 = vmatpush.bf16.msrb.mxu3 %v8102_v5 }
 0xc39   : > { %v5201_v61 = vpop.f32.mrf.mxu2  ;;  %5927 = vmatpush.bf16.msrb.mxu3 %v8101_v55 }
 0xc3a   : > { %v5240_v24 = vpack.c.bf16 %v5201_v61, %v5201_v61 }
 0xc3c   : > { %5314 = vmatmul.bf16.vlgmr.msra.gmra.mxu0 %v5240_v24 }
 0xc3d   : > { %5766 = vmatpush.bf16.msra.mxu0 %v8086_v38  ;;  %5928 = vmatpush.bf16.msrb.mxu3 %v8100_v1 }
 0xc41   : > { %v5204_v21 = vpop.f32.mrf.mxu2  ;;  %5767 = vmatpush.bf16.msra.mxu0 %v8085_v15  ;;  %5929 = vmatpush.bf16.msrb.mxu3 %v8099_v12 }
 0xc42   : > { %v5380_v0 = vpack.c.bf16 %v5204_v21, %v5204_v21 }
 0xc44   : > { %5454 = vmatmul.bf16.vlgmr.msra.gmra.mxu1 %v5380_v0 }
 0xc45   : > { %5768 = vmatpush.bf16.msra.mxu0 %v8084_v40  ;;  %5930 = vmatpush.bf16.msrb.mxu3 %v8098_v13 }
 0xc49   : > { %v5206_v49 = vpop.f32.mrf.mxu2  ;;  %5769 = vmatpush.bf16.msra.mxu0 %v8083_v28  ;;  %5931 = vmatpush.bf16.msrb.mxu3 %v8097_v16 }
 0xc4a   : > { %v5460_v23 = vpack.c.bf16 %v5206_v49, %v5206_v49 }
 0xc4c   : > { %5534 = vmatmul.bf16.vlgmr.msrb.gmra.mxu0 %v5460_v23 }
 0xc4d   : > { %5770 = vmatpush.bf16.msra.mxu0 %v8082_v63  ;;  %5932 = vmatpush.bf16.msrb.mxu3 %v8096_v14 }
 0xc51   : > { %v5209_v46 = vpop.f32.mrf.mxu2  ;;  %5771 = vmatpush.bf16.msra.mxu0 %v8081_v34  ;;  %5933 = vmatpush.bf16.msrb.mxu3 %v8095_v18 }
 0xc52   : > { %v5540_v27 = vpack.c.bf16 %v5209_v46, %v5209_v46 }
 0xc54   : > { %5614 = vmatmul.bf16.vlgmr.msra.gmra.mxu3 %v5540_v27 }
 0xc55   : > { %5772 = vmatpush.bf16.msra.mxu0 %v8080_v54 }
 0xc59   : > { %v5211_v31 = vpop.f32.mrf.mxu2  ;;  %5773 = vmatpush.bf16.msra.mxu0 %v8079_v62 }
 0xc5a   : > { %v5620_v33 = vpack.c.bf16 %v5211_v31, %v5211_v31 }
 0xc5c   : > { %5694 = vmatmul.bf16.vlgmr.msrb.gmra.mxu1 %v5620_v33 }
 0xc61   : > { %v5214_v39 = vpop.f32.mrf.mxu2 }
 0xc62   : > { %v5700_v56 = vpack.c.bf16 %v5214_v39, %v5214_v39 }
 0xc64   : > { %5774 = vmatmul.bf16.vlgmr.msra.gmra.mxu0 %v5700_v56 }
 0xc69   : > { %v5216_v3 = vpop.f32.mrf.mxu2 }
 0xc6a   : > { %v5780_v36 = vpack.c.bf16 %v5216_v3, %v5216_v3 }
 0xc6c   : > { %5854 = vmatmul.bf16.vlgmr.msrb.gmra.mxu2 %v5780_v36 }
 0xc71   : > { %v5219_v42 = vpop.f32.mrf.mxu2 }
 0xc72   : > { %v5860_v48 = vpack.c.bf16 %v5219_v42, %v5219_v42 }
 0xc74   : > { %5934 = vmatmul.bf16.vlgmr.msrb.gmra.mxu3 %v5860_v48 }
 0xc79   : > { %v5221_v25 = vpop.f32.mrf.mxu2 }
 0xcb7   : > { %v5376_v60 = vpop.f32.mrf.mxu3 }
 0xcb9   : > { %v5315_v44 = vpop.f32.mrf.mxu0 }
 0xcba   : > { %v5377_v8 = vadd.f32 %v5376_v60, %v5315_v44 }
 0xcbf   : > { %v5378_v41 = vpop.f32.mrf.mxu3 }
 0xcc1   : > { %v5317_v51 = vpop.f32.mrf.mxu0  ;;  %v5455_v7 = vpop.f32.mrf.mxu1 }
 0xcc2   : > { %v5459_v22 = vadd.f32 %v5455_v7, %v5377_v8 }
 0xcc9   : > { %v5535_v59 = vpop.f32.mrf.mxu0  ;;  %v5457_v37 = vpop.f32.mrf.mxu1 }
 0xcca   : > { %v5539_v35 = vadd.f32 %v5535_v59, %v5459_v22 }
 0xcd1   : > { %v5537_v52 = vpop.f32.mrf.mxu0 }
 0xcd7   : > { %v5615_v47 = vpop.f32.mrf.mxu3 }
 0xcd8   : > { %v5619_v50 = vadd.f32 %v5615_v47, %v5539_v35 }
 0xcd9   : > { %v5695_v57 = vpop.f32.mrf.mxu1 }
 0xcda   : > { %v5699_v26 = vadd.f32 %v5695_v57, %v5619_v50 }
 0xcdf   : > { %v5617_v53 = vpop.f32.mrf.mxu3 }
 0xce1   : > { %v5775_v11 = vpop.f32.mrf.mxu0  ;;  %v5697_v6 = vpop.f32.mrf.mxu1 }
 0xce2   : > { %v5779_v45 = vadd.f32 %v5775_v11, %v5699_v26 }
 0xce9   : > { %v5777_v43 = vpop.f32.mrf.mxu0 }
 0xcef   : > { %v5855_v58 = vpop.f32.mrf.mxu2 }
 0xcf0   : > { %v5859_v4 = vadd.f32 %v5855_v58, %v5779_v45 }
 0xcf7   : > { %v5935_v5 = vpop.f32.mrf.mxu3  ;;  %v5857_v9 = vpop.f32.mrf.mxu2 }
 0xcf8   : > { %v5939_v29 = vadd.f32 %v5935_v5, %v5859_v4 }
 0xcfa   : > { %v5944_v55 = vadd.f32 %v8201_v30, %v5939_v29 }
 0xcfc   : > { %v5946_v61 = vmul.f32 0.2, %v5944_v55  ;;  %vm5945_vm1 = vcmp.ge.f32.partialorder %v5944_v55, 0.0 }
 0xcfe   : > { %v5947_v38 = vsel %vm5945_vm1, %v5944_v55, %v5946_v61 }
 0xcff   : > { %v5952_v20 = vmul.f32 %v8202_v10, %v5947_v38  ;;  %v5937_v24 = vpop.f32.mrf.mxu3 }
 0xd01   : > { %v5953_v1 = vsel %vm1753_vm0, %v5952_v20, 0.0 }
 0xd02   : > { %5954 = vadd.xlane.f32.xlu0 %v5953_v1 }
 0xd75   : > { %v5955_v15 = vpop.xlane.xlu0 %5954 }
 0xd76   : > { %v5960_v12 = vadd.f32 %v8203_v17, %v5955_v15 }
 0xd78   : > { %5962 = vst.msk [vmem:[%s789_s25] sm:$0xf] %vm5961_vm12, %v5960_v12 }
 0xd79 PF: > { %s9491_s0 = sld [smem:[#allocation21_spill]] }
 0xd7f   : > { %s38_s26 = sadd.s32 1, %s9491_s0  }
 0xd80   : > { %p35_p7 = scmp.ge.s32.totalorder %s38_s26, 4  }
 0xd82   :  { %37 = sbr.rel (!%p35_p7) target bundleno = 15 (0xf), region = 215 }
 0xd87   :  { %5982 = vsyncpa [#allocation4], 1 }
 0xd88   :  { %5984 = vsyncpa [#allocation4 + $0x1], 1 }
 0xd89   :  { %5985 = vsyncpa [#allocation6], 1 }
 0xd8a   :  { %5986 = vsyncpa [#allocation9], 1 }
 0xd8b   :  { %5987 = vsyncpa [#allocation12], 1 }
 0xd8c   :  { %5988 = vsyncpa [#allocation15], 1 }

</bundles_post_ra>
